<compile_context>
chip_gen: v7x
topology: tpu7x:2x2x1
jax: 0.10.0
libtpu: 0.0.40
codegen_flags: <defaults>
</compile_context>

<pallas_src>
import functools

import jax
import jax.numpy as jnp
from jax import lax
from jax.experimental import pallas as pl
from jax.experimental.pallas import tpu as pltpu


NEG = -1e9       # bias on the width zero-padding lanes: sigmoid(NEG) == 0.0 exactly
H_PAD_ROWS = 15  # conv2 only ever reads padded rows 0..14 (bottom pad row unused)


def _sigmoid(x):
    # single EUP tanh, no divide; tanh saturates -> exact 0 on the NEG pad lanes.
    return 0.5 * jnp.tanh(0.5 * x) + 0.5


# ----------------------------- fused Pallas kernel ---------------------------
def _fused_kernel(cols_ref, w1_ref, b1_ref, w2_ref, b2_ref, wl_ref, bl_ref,
                  o_ref, x2_ref):
    """One batch tile of TB samples, everything on-chip.

    cols_ref: (14, TB, 128) bf16  conv1 im2col rows, lane = ow1*9 + (kh*3+kw),
                                  lanes 126/127 are zero padding.
    w1_ref:   (128, 256)    bf16  block-diag conv1 weight -> lanes (w_pad, c_out)
    b1_ref:   (1, 256)      f32   conv1 bias (NEG on the w_pad==0 / w_pad==15 lanes)
    w2_ref:   (768, 224)    bf16  K-stacked conv2 weight, row = kh*256+w_pad*16+c_in,
                                  col = ow2*32 + c_out
    b2_ref:   (1, 224)      f32
    wl_ref:   (7, 224, 128) bf16  per-oh2 linear slab, out lanes padded 10 -> 128
    bl_ref:   (1, 128)      f32
    o_ref:    (TB, 128)     f32
    x2_ref:   (TB, 15*256)  bf16  lane-dense padded sigmoid(conv1) scratch,
                                  lane = h_pad*256 + w_pad*16 + c.
    """
    f32 = jnp.float32
    bf16 = jnp.bfloat16
    tb = o_ref.shape[0]

    # zero only the top h-padding row (h_pad == 0); rows 1..14 are fully
    # overwritten below and h_pad == 15 is never read (not allocated).
    x2_ref[:, pl.ds(0, 256)] = jnp.zeros((tb, 256), bf16)

    # ---- conv1 + sigmoid: one padded activation row per step ----------------
    for oh1 in range(14):
        acc = jnp.dot(cols_ref[oh1], w1_ref[...],
                      preferred_element_type=f32)                 # (TB, 256) f32
        # pad lanes: zero weight columns + NEG bias -> sigmoid == 0 exactly
        row = _sigmoid(acc + b1_ref[...])
        x2_ref[:, pl.ds((oh1 + 1) * 256, 256)] = row.astype(bf16)

    # ---- init output with the linear bias (accumulate through o_ref) --------
    o_ref[...] = jnp.broadcast_to(bl_ref[...], o_ref.shape)

    # ---- conv2 + sigmoid + linear: one conv2 output row per step ------------
    for oh2 in range(7):
        # contiguous, 128-aligned 768-lane slice covering h_pad = 2*oh2 .. 2*oh2+2
        xin = x2_ref[:, pl.ds(512 * oh2, 768)]                    # (TB, 768) bf16
        acc = jnp.dot(xin, w2_ref[...],
                      preferred_element_type=f32) + b2_ref[...]   # (TB, 224) f32
        h2 = _sigmoid(acc).astype(bf16)
        # linear folded into the row loop -> no flatten / reshape needed
        o_ref[...] += jnp.dot(h2, wl_ref[oh2], preferred_element_type=f32)


def _fused_forward(cols, kp, tb):
    bp = cols.shape[1]
    return pl.pallas_call(
        _fused_kernel,
        out_shape=jax.ShapeDtypeStruct((bp, 128), jnp.float32),
        grid_spec=pltpu.PrefetchScalarGridSpec(
            num_scalar_prefetch=0,
            grid=(bp // tb,),
            in_specs=[
                pl.BlockSpec((14, tb, 128), lambda i: (0, i, 0)),   # im2col tile
                pl.BlockSpec((128, 256), lambda i: (0, 0)),
                pl.BlockSpec((1, 256), lambda i: (0, 0)),
                pl.BlockSpec((768, 224), lambda i: (0, 0)),
                pl.BlockSpec((1, 224), lambda i: (0, 0)),
                pl.BlockSpec((7, 224, 128), lambda i: (0, 0, 0)),
                pl.BlockSpec((1, 128), lambda i: (0, 0)),
            ],
            out_specs=pl.BlockSpec((tb, 128), lambda i: (i, 0)),
            scratch_shapes=[pltpu.VMEM((tb, H_PAD_ROWS * 256), jnp.bfloat16)],
        ),
        compiler_params=pltpu.CompilerParams(
            dimension_semantics=("parallel",),
        ),
    )(cols, kp["w1_bd"], kp["b1_row"], kp["w2_bd"], kp["b2_row"],
      kp["wl_k"], kp["bl_row"])


# ------------------------------ forward wrapper -------------------------------
def _pick_tb(b):
    """Batch tile: fill the MXU M dimension, keep >=2 grid steps at large batch."""
    bp8 = -(-b // 8) * 8
    if bp8 <= 256:
        return int(bp8)          # tiny batch: one step, tile == padded batch
    return 256 if bp8 >= 512 else 128


@functools.partial(jax.jit, static_argnames=("tb",))
def model3_forward(kparams, x, tb=None):
    x = x.reshape(-1, 1, 28, 28).astype(jnp.float32)
    b = x.shape[0]
    if tb is None:
        tb = _pick_tb(b)
    assert tb % 8 == 0, tb
    bp = ((b + tb - 1) // tb) * tb

    # conv1 im2col as a single XLA op; feature order == (kh, kw) since Cin == 1
    patches = lax.conv_general_dilated_patches(
        x, filter_shape=(3, 3), window_strides=(2, 2),
        padding=((1, 1), (1, 1)),
        dimension_numbers=("NCHW", "OIHW", "NCHW"))               # (B, 9, 14, 14)
    cols = patches.transpose(2, 0, 3, 1).reshape(14, b, 126)       # (oh1, b, ow1*9+t)
    # pad batch to the tile, pad lanes 126 -> 128, and ship bf16 to halve the DMA
    cols = jnp.pad(cols, ((0, 0), (0, bp - b), (0, 2))).astype(jnp.bfloat16)

    y = _fused_forward(cols, kparams, tb)
    return y[:b, :10]


# --------------------------- weight packing (once) ----------------------------
def prepare_kernel_params(params):
    f32, bf16 = jnp.float32, jnp.bfloat16
    w1, b1 = params["w1"].astype(f32), params["b1"].astype(f32)   # (16,1,3,3), (16,)
    w2, b2 = params["w2"].astype(f32), params["b2"].astype(f32)   # (32,16,3,3), (32,)
    wl, bl = params["wl"].astype(f32), params["bl"].astype(f32)   # (10,1568), (10,)

    # conv1: block-diagonal weight; output lanes = w_pad*16 + c_out, w_pad in 0..15.
    # w_pad == 0 / 15 are the zero-padding columns (zero weights + NEG bias).
    w1_mat = w1.reshape(16, 9).T                                   # (t=kh*3+kw, c_out)
    w1_bd = jnp.kron(jnp.eye(14, dtype=f32), w1_mat)               # (126, 224)
    w1_bd = jnp.pad(w1_bd, ((0, 2), (16, 16)))                     # (128, 256)
    pad_b = jnp.full((16,), NEG, f32)
    b1_row = jnp.concatenate([pad_b, jnp.tile(b1, 14), pad_b]).reshape(1, 256)

    # conv2: K-stacked block-banded weight; row = kh*256 + w_pad*16 + c_in,
    # col = ow2*32 + c_out (height AND width im2col folded into one matrix).
    w2_bd = jnp.zeros((768, 224), f32)
    for kh in range(3):
        for kw in range(3):
            blk = w2[:, :, kh, kw].T                               # (c_in=16, c_out=32)
            for ow in range(7):
                wp = 2 * ow + kw
                r0 = kh * 256 + wp * 16
                w2_bd = w2_bd.at[r0:r0 + 16, ow * 32:(ow + 1) * 32].set(blk)
    b2_row = jnp.tile(b2, 7).reshape(1, 224)

    # linear: permute the NCHW flatten order (c, oh2, ow2) -> (oh2, ow2, c) once,
    # split per conv2 output row, and pad the 10 output lanes to 128.
    wl_k = wl.reshape(10, 32, 7, 7).transpose(2, 3, 1, 0).reshape(7, 224, 10)
    wl_k = jnp.pad(wl_k, ((0, 0), (0, 0), (0, 118)))               # (7, 224, 128)
    bl_row = jnp.pad(bl, (0, 118)).reshape(1, 128)

    return dict(w1_bd=w1_bd.astype(bf16), b1_row=b1_row,
                w2_bd=w2_bd.astype(bf16), b2_row=b2_row,
                wl_k=wl_k.astype(bf16), bl_row=bl_row)


# --------------------------- parameter init -----------------------------------
def _xavier_uniform(key, shape, fan_in, fan_out, gain):
    bound = gain * (6.0 / (fan_in + fan_out)) ** 0.5
    return jax.random.uniform(key, shape, jnp.float32, -bound, bound)


def init_params(key):
    # matches the PyTorch init(): xavier_uniform(gain=calculate_gain('relu'))
    # for >=2-D params, zeros for biases.
    gain = 2.0 ** 0.5
    k1, k2, k3 = jax.random.split(key, 3)
    w1 = _xavier_uniform(k1, (16, 1, 3, 3), fan_in=1 * 9, fan_out=16 * 9, gain=gain)
    w2 = _xavier_uniform(k2, (32, 16, 3, 3), fan_in=16 * 9, fan_out=32 * 9, gain=gain)
    wl = _xavier_uniform(k3, (10, 7 * 7 * 32), fan_in=7 * 7 * 32, fan_out=10, gain=gain)
    return dict(w1=w1, b1=jnp.zeros((16,), jnp.float32),
                w2=w2, b2=jnp.zeros((32,), jnp.float32),
                wl=wl, bl=jnp.zeros((10,), jnp.float32))


# ------------------------- plain-XLA reference --------------------------------
def model3_reference(params, x):
    x = x.reshape(-1, 1, 28, 28).astype(jnp.float32)
    h = lax.conv_general_dilated(x, params["w1"], (2, 2), ((1, 1), (1, 1)),
                                 dimension_numbers=("NCHW", "OIHW", "NCHW"))
    h = jax.nn.sigmoid(h + params["b1"][None, :, None, None])
    h = lax.conv_general_dilated(h, params["w2"], (2, 2), ((1, 1), (1, 1)),
                                 dimension_numbers=("NCHW", "OIHW", "NCHW"))
    h = jax.nn.sigmoid(h + params["b2"][None, :, None, None])
    h = h.reshape(h.shape[0], -1)
    return h @ params["wl"].T + params["bl"]


# --------------------------------- main ----------------------------------------
if __name__ == "__main__":
    key = jax.random.PRNGKey(0)
    pkey, xkey = jax.random.split(key)
    params = init_params(pkey)
    kparams = prepare_kernel_params(params)

    # batch=2 MNIST-like input (module hard-codes 28x28 via Linear(7*7*32, 10))
    x = jax.random.normal(xkey, (2, 1, 28, 28), dtype=jnp.float32)

    y = jax.block_until_ready(model3_forward(kparams, x))
    assert y.shape == (2, 10), y.shape
    assert bool(jnp.all(jnp.isfinite(y)))

    # correctness vs a plain-XLA f32 reference of the same module
    y_ref = jax.block_until_ready(jax.jit(model3_reference)(params, x))
    err = float(jnp.max(jnp.abs(y - y_ref)))
    assert err < 5e-2, f"max |pallas - reference| = {err}"

    print("KERNEL_OK")
</pallas_src>

<mosaic_0001>
module attributes {stable_mosaic.version = 11 : i64} {
  func.func @_fused_kernel(%arg0: i32, %arg1: memref<14x8x128xbf16, #tpu.memory_space<vmem>>, %arg2: memref<128x256xbf16, #tpu.memory_space<vmem>>, %arg3: memref<1x256xf32, #tpu.memory_space<vmem>>, %arg4: memref<768x224xbf16, #tpu.memory_space<vmem>>, %arg5: memref<1x224xf32, #tpu.memory_space<vmem>>, %arg6: memref<7x224x128xbf16, #tpu.memory_space<vmem>>, %arg7: memref<1x128xf32, #tpu.memory_space<vmem>>, %arg8: memref<8x128xf32, #tpu.memory_space<vmem>>, %arg9: memref<8x3840xbf16, #tpu.memory_space<vmem>>) attributes {dimension_semantics = [#tpu.dimension_semantics<parallel>], iteration_bounds = array<i64: 1>, scalar_prefetch = 0 : i64, scratch_operands = 1 : i64, tpu.core_type = #tpu.core_type<tc>, window_params = [{transform_indices = @transform_0, window_bounds = array<i64: 14, 8, 128>}, {pipeline_mode = #tpu.pipeline_mode<synchronous>, transform_indices = @transform_1, window_bounds = array<i64: 128, 256>}, {pipeline_mode = #tpu.pipeline_mode<synchronous>, transform_indices = @transform_2, window_bounds = array<i64: 1, 256>}, {pipeline_mode = #tpu.pipeline_mode<synchronous>, transform_indices = @transform_3, window_bounds = array<i64: 768, 224>}, {pipeline_mode = #tpu.pipeline_mode<synchronous>, transform_indices = @transform_4, window_bounds = array<i64: 1, 224>}, {pipeline_mode = #tpu.pipeline_mode<synchronous>, transform_indices = @transform_5, window_bounds = array<i64: 7, 224, 128>}, {pipeline_mode = #tpu.pipeline_mode<synchronous>, transform_indices = @transform_6, window_bounds = array<i64: 1, 128>}, {transform_indices = @transform_7, window_bounds = array<i64: 8, 128>}]} {
    %cst = arith.constant 0.000000e+00 : bf16
    %0 = vector.broadcast %cst : bf16 to vector<8x256xbf16>
    %c0 = arith.constant 0 : index
    %c0_0 = arith.constant 0 : index
    %1 = vector.load %arg9[%c0, %c0_0] : memref<8x3840xbf16, #tpu.memory_space<vmem>>, vector<8x256xbf16>
    tpu.vector_store %arg9[%c0, %c0_0], %0 {strides = array<i32>} : memref<8x3840xbf16, #tpu.memory_space<vmem>>, vector<8x256xbf16>,
    %c0_1 = arith.constant 0 : index
    %c0_2 = arith.constant 0 : index
    %c0_3 = arith.constant 0 : index
    %2 = vector.load %arg1[%c0_1, %c0_2, %c0_3] : memref<14x8x128xbf16, #tpu.memory_space<vmem>>, vector<1x8x128xbf16>
    %3 = vector.shape_cast %2 : vector<1x8x128xbf16> to vector<8x128xbf16>
    %c0_4 = arith.constant 0 : index
    %c0_5 = arith.constant 0 : index
    %4 = vector.load %arg2[%c0_4, %c0_5] : memref<128x256xbf16, #tpu.memory_space<vmem>>, vector<128x256xbf16>
    %cst_6 = arith.constant dense<0.000000e+00> : vector<8x256xf32>
    %5 = tpu.matmul %3, %4, %cst_6 {dimension_numbers = #tpu.dot_dimension_numbers<[1], [0], [0], [1], [0, 0, 1, 1], [], []>} : vector<8x128xbf16>, vector<128x256xbf16>, vector<8x256xf32> -> vector<8x256xf32>
    %c0_7 = arith.constant 0 : index
    %c0_8 = arith.constant 0 : index
    %6 = vector.load %arg3[%c0_7, %c0_8] : memref<1x256xf32, #tpu.memory_space<vmem>>, vector<1x256xf32>
    %7 = vector.broadcast %6 : vector<1x256xf32> to vector<8x256xf32>
    %8 = arith.addf %5, %7 : vector<8x256xf32>
    %cst_9 = arith.constant 5.000000e-01 : f32
    %9 = vector.broadcast %cst_9 : f32 to vector<8x256xf32>
    %10 = arith.mulf %9, %8 : vector<8x256xf32>
    %11 = math.tanh %10 : vector<8x256xf32>
    %cst_10 = arith.constant 5.000000e-01 : f32
    %12 = vector.broadcast %cst_10 : f32 to vector<8x256xf32>
    %13 = arith.mulf %12, %11 : vector<8x256xf32>
    %cst_11 = arith.constant 5.000000e-01 : f32
    %14 = vector.broadcast %cst_11 : f32 to vector<8x256xf32>
    %15 = arith.addf %13, %14 : vector<8x256xf32>
    %16 = arith.truncf %15 : vector<8x256xf32> to vector<8x256xbf16>
    %c0_12 = arith.constant 0 : index
    %c256 = arith.constant 256 : index
    %17 = vector.load %arg9[%c0_12, %c256] : memref<8x3840xbf16, #tpu.memory_space<vmem>>, vector<8x256xbf16>
    tpu.vector_store %arg9[%c0_12, %c256], %16 {strides = array<i32>} : memref<8x3840xbf16, #tpu.memory_space<vmem>>, vector<8x256xbf16>,
    %c1 = arith.constant 1 : index
    %c0_13 = arith.constant 0 : index
    %c0_14 = arith.constant 0 : index
    %18 = vector.load %arg1[%c1, %c0_13, %c0_14] : memref<14x8x128xbf16, #tpu.memory_space<vmem>>, vector<1x8x128xbf16>
    %19 = vector.shape_cast %18 : vector<1x8x128xbf16> to vector<8x128xbf16>
    %c0_15 = arith.constant 0 : index
    %c0_16 = arith.constant 0 : index
    %20 = vector.load %arg2[%c0_15, %c0_16] : memref<128x256xbf16, #tpu.memory_space<vmem>>, vector<128x256xbf16>
    %cst_17 = arith.constant dense<0.000000e+00> : vector<8x256xf32>
    %21 = tpu.matmul %19, %20, %cst_17 {dimension_numbers = #tpu.dot_dimension_numbers<[1], [0], [0], [1], [0, 0, 1, 1], [], []>} : vector<8x128xbf16>, vector<128x256xbf16>, vector<8x256xf32> -> vector<8x256xf32>
    %c0_18 = arith.constant 0 : index
    %c0_19 = arith.constant 0 : index
    %22 = vector.load %arg3[%c0_18, %c0_19] : memref<1x256xf32, #tpu.memory_space<vmem>>, vector<1x256xf32>
    %23 = vector.broadcast %22 : vector<1x256xf32> to vector<8x256xf32>
    %24 = arith.addf %21, %23 : vector<8x256xf32>
    %cst_20 = arith.constant 5.000000e-01 : f32
    %25 = vector.broadcast %cst_20 : f32 to vector<8x256xf32>
    %26 = arith.mulf %25, %24 : vector<8x256xf32>
    %27 = math.tanh %26 : vector<8x256xf32>
    %cst_21 = arith.constant 5.000000e-01 : f32
    %28 = vector.broadcast %cst_21 : f32 to vector<8x256xf32>
    %29 = arith.mulf %28, %27 : vector<8x256xf32>
    %cst_22 = arith.constant 5.000000e-01 : f32
    %30 = vector.broadcast %cst_22 : f32 to vector<8x256xf32>
    %31 = arith.addf %29, %30 : vector<8x256xf32>
    %32 = arith.truncf %31 : vector<8x256xf32> to vector<8x256xbf16>
    %c0_23 = arith.constant 0 : index
    %c512 = arith.constant 512 : index
    %33 = vector.load %arg9[%c0_23, %c512] : memref<8x3840xbf16, #tpu.memory_space<vmem>>, vector<8x256xbf16>
    tpu.vector_store %arg9[%c0_23, %c512], %32 {strides = array<i32>} : memref<8x3840xbf16, #tpu.memory_space<vmem>>, vector<8x256xbf16>,
    %c2 = arith.constant 2 : index
    %c0_24 = arith.constant 0 : index
    %c0_25 = arith.constant 0 : index
    %34 = vector.load %arg1[%c2, %c0_24, %c0_25] : memref<14x8x128xbf16, #tpu.memory_space<vmem>>, vector<1x8x128xbf16>
    %35 = vector.shape_cast %34 : vector<1x8x128xbf16> to vector<8x128xbf16>
    %c0_26 = arith.constant 0 : index
    %c0_27 = arith.constant 0 : index
    %36 = vector.load %arg2[%c0_26, %c0_27] : memref<128x256xbf16, #tpu.memory_space<vmem>>, vector<128x256xbf16>
    %cst_28 = arith.constant dense<0.000000e+00> : vector<8x256xf32>
    %37 = tpu.matmul %35, %36, %cst_28 {dimension_numbers = #tpu.dot_dimension_numbers<[1], [0], [0], [1], [0, 0, 1, 1], [], []>} : vector<8x128xbf16>, vector<128x256xbf16>, vector<8x256xf32> -> vector<8x256xf32>
    %c0_29 = arith.constant 0 : index
    %c0_30 = arith.constant 0 : index
    %38 = vector.load %arg3[%c0_29, %c0_30] : memref<1x256xf32, #tpu.memory_space<vmem>>, vector<1x256xf32>
    %39 = vector.broadcast %38 : vector<1x256xf32> to vector<8x256xf32>
    %40 = arith.addf %37, %39 : vector<8x256xf32>
    %cst_31 = arith.constant 5.000000e-01 : f32
    %41 = vector.broadcast %cst_31 : f32 to vector<8x256xf32>
    %42 = arith.mulf %41, %40 : vector<8x256xf32>
    %43 = math.tanh %42 : vector<8x256xf32>
    %cst_32 = arith.constant 5.000000e-01 : f32
    %44 = vector.broadcast %cst_32 : f32 to vector<8x256xf32>
    %45 = arith.mulf %44, %43 : vector<8x256xf32>
    %cst_33 = arith.constant 5.000000e-01 : f32
    %46 = vector.broadcast %cst_33 : f32 to vector<8x256xf32>
    %47 = arith.addf %45, %46 : vector<8x256xf32>
    %48 = arith.truncf %47 : vector<8x256xf32> to vector<8x256xbf16>
    %c0_34 = arith.constant 0 : index
    %c768 = arith.constant 768 : index
    %49 = vector.load %arg9[%c0_34, %c768] : memref<8x3840xbf16, #tpu.memory_space<vmem>>, vector<8x256xbf16>
    tpu.vector_store %arg9[%c0_34, %c768], %48 {strides = array<i32>} : memref<8x3840xbf16, #tpu.memory_space<vmem>>, vector<8x256xbf16>,
    %c3 = arith.constant 3 : index
    %c0_35 = arith.constant 0 : index
    %c0_36 = arith.constant 0 : index
    %50 = vector.load %arg1[%c3, %c0_35, %c0_36] : memref<14x8x128xbf16, #tpu.memory_space<vmem>>, vector<1x8x128xbf16>
    %51 = vector.shape_cast %50 : vector<1x8x128xbf16> to vector<8x128xbf16>
    %c0_37 = arith.constant 0 : index
    %c0_38 = arith.constant 0 : index
    %52 = vector.load %arg2[%c0_37, %c0_38] : memref<128x256xbf16, #tpu.memory_space<vmem>>, vector<128x256xbf16>
    %cst_39 = arith.constant dense<0.000000e+00> : vector<8x256xf32>
    %53 = tpu.matmul %51, %52, %cst_39 {dimension_numbers = #tpu.dot_dimension_numbers<[1], [0], [0], [1], [0, 0, 1, 1], [], []>} : vector<8x128xbf16>, vector<128x256xbf16>, vector<8x256xf32> -> vector<8x256xf32>
    %c0_40 = arith.constant 0 : index
    %c0_41 = arith.constant 0 : index
    %54 = vector.load %arg3[%c0_40, %c0_41] : memref<1x256xf32, #tpu.memory_space<vmem>>, vector<1x256xf32>
    %55 = vector.broadcast %54 : vector<1x256xf32> to vector<8x256xf32>
    %56 = arith.addf %53, %55 : vector<8x256xf32>
    %cst_42 = arith.constant 5.000000e-01 : f32
    %57 = vector.broadcast %cst_42 : f32 to vector<8x256xf32>
    %58 = arith.mulf %57, %56 : vector<8x256xf32>
    %59 = math.tanh %58 : vector<8x256xf32>
    %cst_43 = arith.constant 5.000000e-01 : f32
    %60 = vector.broadcast %cst_43 : f32 to vector<8x256xf32>
    %61 = arith.mulf %60, %59 : vector<8x256xf32>
    %cst_44 = arith.constant 5.000000e-01 : f32
    %62 = vector.broadcast %cst_44 : f32 to vector<8x256xf32>
    %63 = arith.addf %61, %62 : vector<8x256xf32>
    %64 = arith.truncf %63 : vector<8x256xf32> to vector<8x256xbf16>
    %c0_45 = arith.constant 0 : index
    %c1024 = arith.constant 1024 : index
    %65 = vector.load %arg9[%c0_45, %c1024] : memref<8x3840xbf16, #tpu.memory_space<vmem>>, vector<8x256xbf16>
    tpu.vector_store %arg9[%c0_45, %c1024], %64 {strides = array<i32>} : memref<8x3840xbf16, #tpu.memory_space<vmem>>, vector<8x256xbf16>,
    %c4 = arith.constant 4 : index
    %c0_46 = arith.constant 0 : index
    %c0_47 = arith.constant 0 : index
    %66 = vector.load %arg1[%c4, %c0_46, %c0_47] : memref<14x8x128xbf16, #tpu.memory_space<vmem>>, vector<1x8x128xbf16>
    %67 = vector.shape_cast %66 : vector<1x8x128xbf16> to vector<8x128xbf16>
    %c0_48 = arith.constant 0 : index
    %c0_49 = arith.constant 0 : index
    %68 = vector.load %arg2[%c0_48, %c0_49] : memref<128x256xbf16, #tpu.memory_space<vmem>>, vector<128x256xbf16>
    %cst_50 = arith.constant dense<0.000000e+00> : vector<8x256xf32>
    %69 = tpu.matmul %67, %68, %cst_50 {dimension_numbers = #tpu.dot_dimension_numbers<[1], [0], [0], [1], [0, 0, 1, 1], [], []>} : vector<8x128xbf16>, vector<128x256xbf16>, vector<8x256xf32> -> vector<8x256xf32>
    %c0_51 = arith.constant 0 : index
    %c0_52 = arith.constant 0 : index
    %70 = vector.load %arg3[%c0_51, %c0_52] : memref<1x256xf32, #tpu.memory_space<vmem>>, vector<1x256xf32>
    %71 = vector.broadcast %70 : vector<1x256xf32> to vector<8x256xf32>
    %72 = arith.addf %69, %71 : vector<8x256xf32>
    %cst_53 = arith.constant 5.000000e-01 : f32
    %73 = vector.broadcast %cst_53 : f32 to vector<8x256xf32>
    %74 = arith.mulf %73, %72 : vector<8x256xf32>
    %75 = math.tanh %74 : vector<8x256xf32>
    %cst_54 = arith.constant 5.000000e-01 : f32
    %76 = vector.broadcast %cst_54 : f32 to vector<8x256xf32>
    %77 = arith.mulf %76, %75 : vector<8x256xf32>
    %cst_55 = arith.constant 5.000000e-01 : f32
    %78 = vector.broadcast %cst_55 : f32 to vector<8x256xf32>
    %79 = arith.addf %77, %78 : vector<8x256xf32>
    %80 = arith.truncf %79 : vector<8x256xf32> to vector<8x256xbf16>
    %c0_56 = arith.constant 0 : index
    %c1280 = arith.constant 1280 : index
    %81 = vector.load %arg9[%c0_56, %c1280] : memref<8x3840xbf16, #tpu.memory_space<vmem>>, vector<8x256xbf16>
    tpu.vector_store %arg9[%c0_56, %c1280], %80 {strides = array<i32>} : memref<8x3840xbf16, #tpu.memory_space<vmem>>, vector<8x256xbf16>,
    %c5 = arith.constant 5 : index
    %c0_57 = arith.constant 0 : index
    %c0_58 = arith.constant 0 : index
    %82 = vector.load %arg1[%c5, %c0_57, %c0_58] : memref<14x8x128xbf16, #tpu.memory_space<vmem>>, vector<1x8x128xbf16>
    %83 = vector.shape_cast %82 : vector<1x8x128xbf16> to vector<8x128xbf16>
    %c0_59 = arith.constant 0 : index
    %c0_60 = arith.constant 0 : index
    %84 = vector.load %arg2[%c0_59, %c0_60] : memref<128x256xbf16, #tpu.memory_space<vmem>>, vector<128x256xbf16>
    %cst_61 = arith.constant dense<0.000000e+00> : vector<8x256xf32>
    %85 = tpu.matmul %83, %84, %cst_61 {dimension_numbers = #tpu.dot_dimension_numbers<[1], [0], [0], [1], [0, 0, 1, 1], [], []>} : vector<8x128xbf16>, vector<128x256xbf16>, vector<8x256xf32> -> vector<8x256xf32>
    %c0_62 = arith.constant 0 : index
    %c0_63 = arith.constant 0 : index
    %86 = vector.load %arg3[%c0_62, %c0_63] : memref<1x256xf32, #tpu.memory_space<vmem>>, vector<1x256xf32>
    %87 = vector.broadcast %86 : vector<1x256xf32> to vector<8x256xf32>
    %88 = arith.addf %85, %87 : vector<8x256xf32>
    %cst_64 = arith.constant 5.000000e-01 : f32
    %89 = vector.broadcast %cst_64 : f32 to vector<8x256xf32>
    %90 = arith.mulf %89, %88 : vector<8x256xf32>
    %91 = math.tanh %90 : vector<8x256xf32>
    %cst_65 = arith.constant 5.000000e-01 : f32
    %92 = vector.broadcast %cst_65 : f32 to vector<8x256xf32>
    %93 = arith.mulf %92, %91 : vector<8x256xf32>
    %cst_66 = arith.constant 5.000000e-01 : f32
    %94 = vector.broadcast %cst_66 : f32 to vector<8x256xf32>
    %95 = arith.addf %93, %94 : vector<8x256xf32>
    %96 = arith.truncf %95 : vector<8x256xf32> to vector<8x256xbf16>
    %c0_67 = arith.constant 0 : index
    %c1536 = arith.constant 1536 : index
    %97 = vector.load %arg9[%c0_67, %c1536] : memref<8x3840xbf16, #tpu.memory_space<vmem>>, vector<8x256xbf16>
    tpu.vector_store %arg9[%c0_67, %c1536], %96 {strides = array<i32>} : memref<8x3840xbf16, #tpu.memory_space<vmem>>, vector<8x256xbf16>,
    %c6 = arith.constant 6 : index
    %c0_68 = arith.constant 0 : index
    %c0_69 = arith.constant 0 : index
    %98 = vector.load %arg1[%c6, %c0_68, %c0_69] : memref<14x8x128xbf16, #tpu.memory_space<vmem>>, vector<1x8x128xbf16>
    %99 = vector.shape_cast %98 : vector<1x8x128xbf16> to vector<8x128xbf16>
    %c0_70 = arith.constant 0 : index
    %c0_71 = arith.constant 0 : index
    %100 = vector.load %arg2[%c0_70, %c0_71] : memref<128x256xbf16, #tpu.memory_space<vmem>>, vector<128x256xbf16>
    %cst_72 = arith.constant dense<0.000000e+00> : vector<8x256xf32>
    %101 = tpu.matmul %99, %100, %cst_72 {dimension_numbers = #tpu.dot_dimension_numbers<[1], [0], [0], [1], [0, 0, 1, 1], [], []>} : vector<8x128xbf16>, vector<128x256xbf16>, vector<8x256xf32> -> vector<8x256xf32>
    %c0_73 = arith.constant 0 : index
    %c0_74 = arith.constant 0 : index
    %102 = vector.load %arg3[%c0_73, %c0_74] : memref<1x256xf32, #tpu.memory_space<vmem>>, vector<1x256xf32>
    %103 = vector.broadcast %102 : vector<1x256xf32> to vector<8x256xf32>
    %104 = arith.addf %101, %103 : vector<8x256xf32>
    %cst_75 = arith.constant 5.000000e-01 : f32
    %105 = vector.broadcast %cst_75 : f32 to vector<8x256xf32>
    %106 = arith.mulf %105, %104 : vector<8x256xf32>
    %107 = math.tanh %106 : vector<8x256xf32>
    %cst_76 = arith.constant 5.000000e-01 : f32
    %108 = vector.broadcast %cst_76 : f32 to vector<8x256xf32>
    %109 = arith.mulf %108, %107 : vector<8x256xf32>
    %cst_77 = arith.constant 5.000000e-01 : f32
    %110 = vector.broadcast %cst_77 : f32 to vector<8x256xf32>
    %111 = arith.addf %109, %110 : vector<8x256xf32>
    %112 = arith.truncf %111 : vector<8x256xf32> to vector<8x256xbf16>
    %c0_78 = arith.constant 0 : index
    %c1792 = arith.constant 1792 : index
    %113 = vector.load %arg9[%c0_78, %c1792] : memref<8x3840xbf16, #tpu.memory_space<vmem>>, vector<8x256xbf16>
    tpu.vector_store %arg9[%c0_78, %c1792], %112 {strides = array<i32>} : memref<8x3840xbf16, #tpu.memory_space<vmem>>, vector<8x256xbf16>,
    %c7 = arith.constant 7 : index
    %c0_79 = arith.constant 0 : index
    %c0_80 = arith.constant 0 : index
    %114 = vector.load %arg1[%c7, %c0_79, %c0_80] : memref<14x8x128xbf16, #tpu.memory_space<vmem>>, vector<1x8x128xbf16>
    %115 = vector.shape_cast %114 : vector<1x8x128xbf16> to vector<8x128xbf16>
    %c0_81 = arith.constant 0 : index
    %c0_82 = arith.constant 0 : index
    %116 = vector.load %arg2[%c0_81, %c0_82] : memref<128x256xbf16, #tpu.memory_space<vmem>>, vector<128x256xbf16>
    %cst_83 = arith.constant dense<0.000000e+00> : vector<8x256xf32>
    %117 = tpu.matmul %115, %116, %cst_83 {dimension_numbers = #tpu.dot_dimension_numbers<[1], [0], [0], [1], [0, 0, 1, 1], [], []>} : vector<8x128xbf16>, vector<128x256xbf16>, vector<8x256xf32> -> vector<8x256xf32>
    %c0_84 = arith.constant 0 : index
    %c0_85 = arith.constant 0 : index
    %118 = vector.load %arg3[%c0_84, %c0_85] : memref<1x256xf32, #tpu.memory_space<vmem>>, vector<1x256xf32>
    %119 = vector.broadcast %118 : vector<1x256xf32> to vector<8x256xf32>
    %120 = arith.addf %117, %119 : vector<8x256xf32>
    %cst_86 = arith.constant 5.000000e-01 : f32
    %121 = vector.broadcast %cst_86 : f32 to vector<8x256xf32>
    %122 = arith.mulf %121, %120 : vector<8x256xf32>
    %123 = math.tanh %122 : vector<8x256xf32>
    %cst_87 = arith.constant 5.000000e-01 : f32
    %124 = vector.broadcast %cst_87 : f32 to vector<8x256xf32>
    %125 = arith.mulf %124, %123 : vector<8x256xf32>
    %cst_88 = arith.constant 5.000000e-01 : f32
    %126 = vector.broadcast %cst_88 : f32 to vector<8x256xf32>
    %127 = arith.addf %125, %126 : vector<8x256xf32>
    %128 = arith.truncf %127 : vector<8x256xf32> to vector<8x256xbf16>
    %c0_89 = arith.constant 0 : index
    %c2048 = arith.constant 2048 : index
    %129 = vector.load %arg9[%c0_89, %c2048] : memref<8x3840xbf16, #tpu.memory_space<vmem>>, vector<8x256xbf16>
    tpu.vector_store %arg9[%c0_89, %c2048], %128 {strides = array<i32>} : memref<8x3840xbf16, #tpu.memory_space<vmem>>, vector<8x256xbf16>,
    %c8 = arith.constant 8 : index
    %c0_90 = arith.constant 0 : index
    %c0_91 = arith.constant 0 : index
    %130 = vector.load %arg1[%c8, %c0_90, %c0_91] : memref<14x8x128xbf16, #tpu.memory_space<vmem>>, vector<1x8x128xbf16>
    %131 = vector.shape_cast %130 : vector<1x8x128xbf16> to vector<8x128xbf16>
    %c0_92 = arith.constant 0 : index
    %c0_93 = arith.constant 0 : index
    %132 = vector.load %arg2[%c0_92, %c0_93] : memref<128x256xbf16, #tpu.memory_space<vmem>>, vector<128x256xbf16>
    %cst_94 = arith.constant dense<0.000000e+00> : vector<8x256xf32>
    %133 = tpu.matmul %131, %132, %cst_94 {dimension_numbers = #tpu.dot_dimension_numbers<[1], [0], [0], [1], [0, 0, 1, 1], [], []>} : vector<8x128xbf16>, vector<128x256xbf16>, vector<8x256xf32> -> vector<8x256xf32>
    %c0_95 = arith.constant 0 : index
    %c0_96 = arith.constant 0 : index
    %134 = vector.load %arg3[%c0_95, %c0_96] : memref<1x256xf32, #tpu.memory_space<vmem>>, vector<1x256xf32>
    %135 = vector.broadcast %134 : vector<1x256xf32> to vector<8x256xf32>
    %136 = arith.addf %133, %135 : vector<8x256xf32>
    %cst_97 = arith.constant 5.000000e-01 : f32
    %137 = vector.broadcast %cst_97 : f32 to vector<8x256xf32>
    %138 = arith.mulf %137, %136 : vector<8x256xf32>
    %139 = math.tanh %138 : vector<8x256xf32>
    %cst_98 = arith.constant 5.000000e-01 : f32
    %140 = vector.broadcast %cst_98 : f32 to vector<8x256xf32>
    %141 = arith.mulf %140, %139 : vector<8x256xf32>
    %cst_99 = arith.constant 5.000000e-01 : f32
    %142 = vector.broadcast %cst_99 : f32 to vector<8x256xf32>
    %143 = arith.addf %141, %142 : vector<8x256xf32>
    %144 = arith.truncf %143 : vector<8x256xf32> to vector<8x256xbf16>
    %c0_100 = arith.constant 0 : index
    %c2304 = arith.constant 2304 : index
    %145 = vector.load %arg9[%c0_100, %c2304] : memref<8x3840xbf16, #tpu.memory_space<vmem>>, vector<8x256xbf16>
    tpu.vector_store %arg9[%c0_100, %c2304], %144 {strides = array<i32>} : memref<8x3840xbf16, #tpu.memory_space<vmem>>, vector<8x256xbf16>,
    %c9 = arith.constant 9 : index
    %c0_101 = arith.constant 0 : index
    %c0_102 = arith.constant 0 : index
    %146 = vector.load %arg1[%c9, %c0_101, %c0_102] : memref<14x8x128xbf16, #tpu.memory_space<vmem>>, vector<1x8x128xbf16>
    %147 = vector.shape_cast %146 : vector<1x8x128xbf16> to vector<8x128xbf16>
    %c0_103 = arith.constant 0 : index
    %c0_104 = arith.constant 0 : index
    %148 = vector.load %arg2[%c0_103, %c0_104] : memref<128x256xbf16, #tpu.memory_space<vmem>>, vector<128x256xbf16>
    %cst_105 = arith.constant dense<0.000000e+00> : vector<8x256xf32>
    %149 = tpu.matmul %147, %148, %cst_105 {dimension_numbers = #tpu.dot_dimension_numbers<[1], [0], [0], [1], [0, 0, 1, 1], [], []>} : vector<8x128xbf16>, vector<128x256xbf16>, vector<8x256xf32> -> vector<8x256xf32>
    %c0_106 = arith.constant 0 : index
    %c0_107 = arith.constant 0 : index
    %150 = vector.load %arg3[%c0_106, %c0_107] : memref<1x256xf32, #tpu.memory_space<vmem>>, vector<1x256xf32>
    %151 = vector.broadcast %150 : vector<1x256xf32> to vector<8x256xf32>
    %152 = arith.addf %149, %151 : vector<8x256xf32>
    %cst_108 = arith.constant 5.000000e-01 : f32
    %153 = vector.broadcast %cst_108 : f32 to vector<8x256xf32>
    %154 = arith.mulf %153, %152 : vector<8x256xf32>
    %155 = math.tanh %154 : vector<8x256xf32>
    %cst_109 = arith.constant 5.000000e-01 : f32
    %156 = vector.broadcast %cst_109 : f32 to vector<8x256xf32>
    %157 = arith.mulf %156, %155 : vector<8x256xf32>
    %cst_110 = arith.constant 5.000000e-01 : f32
    %158 = vector.broadcast %cst_110 : f32 to vector<8x256xf32>
    %159 = arith.addf %157, %158 : vector<8x256xf32>
    %160 = arith.truncf %159 : vector<8x256xf32> to vector<8x256xbf16>
    %c0_111 = arith.constant 0 : index
    %c2560 = arith.constant 2560 : index
    %161 = vector.load %arg9[%c0_111, %c2560] : memref<8x3840xbf16, #tpu.memory_space<vmem>>, vector<8x256xbf16>
    tpu.vector_store %arg9[%c0_111, %c2560], %160 {strides = array<i32>} : memref<8x3840xbf16, #tpu.memory_space<vmem>>, vector<8x256xbf16>,
    %c10 = arith.constant 10 : index
    %c0_112 = arith.constant 0 : index
    %c0_113 = arith.constant 0 : index
    %162 = vector.load %arg1[%c10, %c0_112, %c0_113] : memref<14x8x128xbf16, #tpu.memory_space<vmem>>, vector<1x8x128xbf16>
    %163 = vector.shape_cast %162 : vector<1x8x128xbf16> to vector<8x128xbf16>
    %c0_114 = arith.constant 0 : index
    %c0_115 = arith.constant 0 : index
    %164 = vector.load %arg2[%c0_114, %c0_115] : memref<128x256xbf16, #tpu.memory_space<vmem>>, vector<128x256xbf16>
    %cst_116 = arith.constant dense<0.000000e+00> : vector<8x256xf32>
    %165 = tpu.matmul %163, %164, %cst_116 {dimension_numbers = #tpu.dot_dimension_numbers<[1], [0], [0], [1], [0, 0, 1, 1], [], []>} : vector<8x128xbf16>, vector<128x256xbf16>, vector<8x256xf32> -> vector<8x256xf32>
    %c0_117 = arith.constant 0 : index
    %c0_118 = arith.constant 0 : index
    %166 = vector.load %arg3[%c0_117, %c0_118] : memref<1x256xf32, #tpu.memory_space<vmem>>, vector<1x256xf32>
    %167 = vector.broadcast %166 : vector<1x256xf32> to vector<8x256xf32>
    %168 = arith.addf %165, %167 : vector<8x256xf32>
    %cst_119 = arith.constant 5.000000e-01 : f32
    %169 = vector.broadcast %cst_119 : f32 to vector<8x256xf32>
    %170 = arith.mulf %169, %168 : vector<8x256xf32>
    %171 = math.tanh %170 : vector<8x256xf32>
    %cst_120 = arith.constant 5.000000e-01 : f32
    %172 = vector.broadcast %cst_120 : f32 to vector<8x256xf32>
    %173 = arith.mulf %172, %171 : vector<8x256xf32>
    %cst_121 = arith.constant 5.000000e-01 : f32
    %174 = vector.broadcast %cst_121 : f32 to vector<8x256xf32>
    %175 = arith.addf %173, %174 : vector<8x256xf32>
    %176 = arith.truncf %175 : vector<8x256xf32> to vector<8x256xbf16>
    %c0_122 = arith.constant 0 : index
    %c2816 = arith.constant 2816 : index
    %177 = vector.load %arg9[%c0_122, %c2816] : memref<8x3840xbf16, #tpu.memory_space<vmem>>, vector<8x256xbf16>
    tpu.vector_store %arg9[%c0_122, %c2816], %176 {strides = array<i32>} : memref<8x3840xbf16, #tpu.memory_space<vmem>>, vector<8x256xbf16>,
    %c11 = arith.constant 11 : index
    %c0_123 = arith.constant 0 : index
    %c0_124 = arith.constant 0 : index
    %178 = vector.load %arg1[%c11, %c0_123, %c0_124] : memref<14x8x128xbf16, #tpu.memory_space<vmem>>, vector<1x8x128xbf16>
    %179 = vector.shape_cast %178 : vector<1x8x128xbf16> to vector<8x128xbf16>
    %c0_125 = arith.constant 0 : index
    %c0_126 = arith.constant 0 : index
    %180 = vector.load %arg2[%c0_125, %c0_126] : memref<128x256xbf16, #tpu.memory_space<vmem>>, vector<128x256xbf16>
    %cst_127 = arith.constant dense<0.000000e+00> : vector<8x256xf32>
    %181 = tpu.matmul %179, %180, %cst_127 {dimension_numbers = #tpu.dot_dimension_numbers<[1], [0], [0], [1], [0, 0, 1, 1], [], []>} : vector<8x128xbf16>, vector<128x256xbf16>, vector<8x256xf32> -> vector<8x256xf32>
    %c0_128 = arith.constant 0 : index
    %c0_129 = arith.constant 0 : index
    %182 = vector.load %arg3[%c0_128, %c0_129] : memref<1x256xf32, #tpu.memory_space<vmem>>, vector<1x256xf32>
    %183 = vector.broadcast %182 : vector<1x256xf32> to vector<8x256xf32>
    %184 = arith.addf %181, %183 : vector<8x256xf32>
    %cst_130 = arith.constant 5.000000e-01 : f32
    %185 = vector.broadcast %cst_130 : f32 to vector<8x256xf32>
    %186 = arith.mulf %185, %184 : vector<8x256xf32>
    %187 = math.tanh %186 : vector<8x256xf32>
    %cst_131 = arith.constant 5.000000e-01 : f32
    %188 = vector.broadcast %cst_131 : f32 to vector<8x256xf32>
    %189 = arith.mulf %188, %187 : vector<8x256xf32>
    %cst_132 = arith.constant 5.000000e-01 : f32
    %190 = vector.broadcast %cst_132 : f32 to vector<8x256xf32>
    %191 = arith.addf %189, %190 : vector<8x256xf32>
    %192 = arith.truncf %191 : vector<8x256xf32> to vector<8x256xbf16>
    %c0_133 = arith.constant 0 : index
    %c3072 = arith.constant 3072 : index
    %193 = vector.load %arg9[%c0_133, %c3072] : memref<8x3840xbf16, #tpu.memory_space<vmem>>, vector<8x256xbf16>
    tpu.vector_store %arg9[%c0_133, %c3072], %192 {strides = array<i32>} : memref<8x3840xbf16, #tpu.memory_space<vmem>>, vector<8x256xbf16>,
    %c12 = arith.constant 12 : index
    %c0_134 = arith.constant 0 : index
    %c0_135 = arith.constant 0 : index
    %194 = vector.load %arg1[%c12, %c0_134, %c0_135] : memref<14x8x128xbf16, #tpu.memory_space<vmem>>, vector<1x8x128xbf16>
    %195 = vector.shape_cast %194 : vector<1x8x128xbf16> to vector<8x128xbf16>
    %c0_136 = arith.constant 0 : index
    %c0_137 = arith.constant 0 : index
    %196 = vector.load %arg2[%c0_136, %c0_137] : memref<128x256xbf16, #tpu.memory_space<vmem>>, vector<128x256xbf16>
    %cst_138 = arith.constant dense<0.000000e+00> : vector<8x256xf32>
    %197 = tpu.matmul %195, %196, %cst_138 {dimension_numbers = #tpu.dot_dimension_numbers<[1], [0], [0], [1], [0, 0, 1, 1], [], []>} : vector<8x128xbf16>, vector<128x256xbf16>, vector<8x256xf32> -> vector<8x256xf32>
    %c0_139 = arith.constant 0 : index
    %c0_140 = arith.constant 0 : index
    %198 = vector.load %arg3[%c0_139, %c0_140] : memref<1x256xf32, #tpu.memory_space<vmem>>, vector<1x256xf32>
    %199 = vector.broadcast %198 : vector<1x256xf32> to vector<8x256xf32>
    %200 = arith.addf %197, %199 : vector<8x256xf32>
    %cst_141 = arith.constant 5.000000e-01 : f32
    %201 = vector.broadcast %cst_141 : f32 to vector<8x256xf32>
    %202 = arith.mulf %201, %200 : vector<8x256xf32>
    %203 = math.tanh %202 : vector<8x256xf32>
    %cst_142 = arith.constant 5.000000e-01 : f32
    %204 = vector.broadcast %cst_142 : f32 to vector<8x256xf32>
    %205 = arith.mulf %204, %203 : vector<8x256xf32>
    %cst_143 = arith.constant 5.000000e-01 : f32
    %206 = vector.broadcast %cst_143 : f32 to vector<8x256xf32>
    %207 = arith.addf %205, %206 : vector<8x256xf32>
    %208 = arith.truncf %207 : vector<8x256xf32> to vector<8x256xbf16>
    %c0_144 = arith.constant 0 : index
    %c3328 = arith.constant 3328 : index
    %209 = vector.load %arg9[%c0_144, %c3328] : memref<8x3840xbf16, #tpu.memory_space<vmem>>, vector<8x256xbf16>
    tpu.vector_store %arg9[%c0_144, %c3328], %208 {strides = array<i32>} : memref<8x3840xbf16, #tpu.memory_space<vmem>>, vector<8x256xbf16>,
    %c13 = arith.constant 13 : index
    %c0_145 = arith.constant 0 : index
    %c0_146 = arith.constant 0 : index
    %210 = vector.load %arg1[%c13, %c0_145, %c0_146] : memref<14x8x128xbf16, #tpu.memory_space<vmem>>, vector<1x8x128xbf16>
    %211 = vector.shape_cast %210 : vector<1x8x128xbf16> to vector<8x128xbf16>
    %c0_147 = arith.constant 0 : index
    %c0_148 = arith.constant 0 : index
    %212 = vector.load %arg2[%c0_147, %c0_148] : memref<128x256xbf16, #tpu.memory_space<vmem>>, vector<128x256xbf16>
    %cst_149 = arith.constant dense<0.000000e+00> : vector<8x256xf32>
    %213 = tpu.matmul %211, %212, %cst_149 {dimension_numbers = #tpu.dot_dimension_numbers<[1], [0], [0], [1], [0, 0, 1, 1], [], []>} : vector<8x128xbf16>, vector<128x256xbf16>, vector<8x256xf32> -> vector<8x256xf32>
    %c0_150 = arith.constant 0 : index
    %c0_151 = arith.constant 0 : index
    %214 = vector.load %arg3[%c0_150, %c0_151] : memref<1x256xf32, #tpu.memory_space<vmem>>, vector<1x256xf32>
    %215 = vector.broadcast %214 : vector<1x256xf32> to vector<8x256xf32>
    %216 = arith.addf %213, %215 : vector<8x256xf32>
    %cst_152 = arith.constant 5.000000e-01 : f32
    %217 = vector.broadcast %cst_152 : f32 to vector<8x256xf32>
    %218 = arith.mulf %217, %216 : vector<8x256xf32>
    %219 = math.tanh %218 : vector<8x256xf32>
    %cst_153 = arith.constant 5.000000e-01 : f32
    %220 = vector.broadcast %cst_153 : f32 to vector<8x256xf32>
    %221 = arith.mulf %220, %219 : vector<8x256xf32>
    %cst_154 = arith.constant 5.000000e-01 : f32
    %222 = vector.broadcast %cst_154 : f32 to vector<8x256xf32>
    %223 = arith.addf %221, %222 : vector<8x256xf32>
    %224 = arith.truncf %223 : vector<8x256xf32> to vector<8x256xbf16>
    %c0_155 = arith.constant 0 : index
    %c3584 = arith.constant 3584 : index
    %225 = vector.load %arg9[%c0_155, %c3584] : memref<8x3840xbf16, #tpu.memory_space<vmem>>, vector<8x256xbf16>
    tpu.vector_store %arg9[%c0_155, %c3584], %224 {strides = array<i32>} : memref<8x3840xbf16, #tpu.memory_space<vmem>>, vector<8x256xbf16>,
    %c0_156 = arith.constant 0 : index
    %c0_157 = arith.constant 0 : index
    %226 = vector.load %arg7[%c0_156, %c0_157] : memref<1x128xf32, #tpu.memory_space<vmem>>, vector<1x128xf32>
    %227 = vector.shape_cast %226 : vector<1x128xf32> to vector<1x128xf32>
    %228 = vector.broadcast %227 : vector<1x128xf32> to vector<8x128xf32>
    %c0_158 = arith.constant 0 : index
    %c0_159 = arith.constant 0 : index
    %229 = vector.load %arg8[%c0_158, %c0_159] : memref<8x128xf32, #tpu.memory_space<vmem>>, vector<8x128xf32>
    tpu.vector_store %arg8[%c0_158, %c0_159], %228 {strides = array<i32>} : memref<8x128xf32, #tpu.memory_space<vmem>>, vector<8x128xf32>,
    %c0_160 = arith.constant 0 : index
    %c0_161 = arith.constant 0 : index
    %230 = vector.load %arg9[%c0_160, %c0_161] : memref<8x3840xbf16, #tpu.memory_space<vmem>>, vector<8x768xbf16>
    %c0_162 = arith.constant 0 : index
    %c0_163 = arith.constant 0 : index
    %231 = vector.load %arg4[%c0_162, %c0_163] : memref<768x224xbf16, #tpu.memory_space<vmem>>, vector<768x224xbf16>
    %cst_164 = arith.constant dense<0.000000e+00> : vector<8x224xf32>
    %232 = tpu.matmul %230, %231, %cst_164 {dimension_numbers = #tpu.dot_dimension_numbers<[1], [0], [0], [1], [0, 0, 1, 1], [], []>} : vector<8x768xbf16>, vector<768x224xbf16>, vector<8x224xf32> -> vector<8x224xf32>
    %c0_165 = arith.constant 0 : index
    %c0_166 = arith.constant 0 : index
    %233 = vector.load %arg5[%c0_165, %c0_166] : memref<1x224xf32, #tpu.memory_space<vmem>>, vector<1x224xf32>
    %234 = vector.broadcast %233 : vector<1x224xf32> to vector<8x224xf32>
    %235 = arith.addf %232, %234 : vector<8x224xf32>
    %cst_167 = arith.constant 5.000000e-01 : f32
    %236 = vector.broadcast %cst_167 : f32 to vector<8x224xf32>
    %237 = arith.mulf %236, %235 : vector<8x224xf32>
    %238 = math.tanh %237 : vector<8x224xf32>
    %cst_168 = arith.constant 5.000000e-01 : f32
    %239 = vector.broadcast %cst_168 : f32 to vector<8x224xf32>
    %240 = arith.mulf %239, %238 : vector<8x224xf32>
    %cst_169 = arith.constant 5.000000e-01 : f32
    %241 = vector.broadcast %cst_169 : f32 to vector<8x224xf32>
    %242 = arith.addf %240, %241 : vector<8x224xf32>
    %243 = arith.truncf %242 : vector<8x224xf32> to vector<8x224xbf16>
    %c0_170 = arith.constant 0 : index
    %c0_171 = arith.constant 0 : index
    %244 = vector.load %arg8[%c0_170, %c0_171] : memref<8x128xf32, #tpu.memory_space<vmem>>, vector<8x128xf32>
    %c0_172 = arith.constant 0 : index
    %c0_173 = arith.constant 0 : index
    %c0_174 = arith.constant 0 : index
    %245 = vector.load %arg6[%c0_172, %c0_173, %c0_174] : memref<7x224x128xbf16, #tpu.memory_space<vmem>>, vector<1x224x128xbf16>
    %246 = vector.shape_cast %245 : vector<1x224x128xbf16> to vector<224x128xbf16>
    %cst_175 = arith.constant dense<0.000000e+00> : vector<8x128xf32>
    %247 = tpu.matmul %243, %246, %cst_175 {dimension_numbers = #tpu.dot_dimension_numbers<[1], [0], [0], [1], [0, 0, 1, 1], [], []>} : vector<8x224xbf16>, vector<224x128xbf16>, vector<8x128xf32> -> vector<8x128xf32>
    %248 = arith.addf %244, %247 : vector<8x128xf32>
    %c0_176 = arith.constant 0 : index
    %c0_177 = arith.constant 0 : index
    %249 = vector.load %arg8[%c0_176, %c0_177] : memref<8x128xf32, #tpu.memory_space<vmem>>, vector<8x128xf32>
    tpu.vector_store %arg8[%c0_176, %c0_177], %248 {strides = array<i32>} : memref<8x128xf32, #tpu.memory_space<vmem>>, vector<8x128xf32>,
    %c0_178 = arith.constant 0 : index
    %c512_179 = arith.constant 512 : index
    %250 = vector.load %arg9[%c0_178, %c512_179] : memref<8x3840xbf16, #tpu.memory_space<vmem>>, vector<8x768xbf16>
    %c0_180 = arith.constant 0 : index
    %c0_181 = arith.constant 0 : index
    %251 = vector.load %arg4[%c0_180, %c0_181] : memref<768x224xbf16, #tpu.memory_space<vmem>>, vector<768x224xbf16>
    %cst_182 = arith.constant dense<0.000000e+00> : vector<8x224xf32>
    %252 = tpu.matmul %250, %251, %cst_182 {dimension_numbers = #tpu.dot_dimension_numbers<[1], [0], [0], [1], [0, 0, 1, 1], [], []>} : vector<8x768xbf16>, vector<768x224xbf16>, vector<8x224xf32> -> vector<8x224xf32>
    %c0_183 = arith.constant 0 : index
    %c0_184 = arith.constant 0 : index
    %253 = vector.load %arg5[%c0_183, %c0_184] : memref<1x224xf32, #tpu.memory_space<vmem>>, vector<1x224xf32>
    %254 = vector.broadcast %253 : vector<1x224xf32> to vector<8x224xf32>
    %255 = arith.addf %252, %254 : vector<8x224xf32>
    %cst_185 = arith.constant 5.000000e-01 : f32
    %256 = vector.broadcast %cst_185 : f32 to vector<8x224xf32>
    %257 = arith.mulf %256, %255 : vector<8x224xf32>
    %258 = math.tanh %257 : vector<8x224xf32>
    %cst_186 = arith.constant 5.000000e-01 : f32
    %259 = vector.broadcast %cst_186 : f32 to vector<8x224xf32>
    %260 = arith.mulf %259, %258 : vector<8x224xf32>
    %cst_187 = arith.constant 5.000000e-01 : f32
    %261 = vector.broadcast %cst_187 : f32 to vector<8x224xf32>
    %262 = arith.addf %260, %261 : vector<8x224xf32>
    %263 = arith.truncf %262 : vector<8x224xf32> to vector<8x224xbf16>
    %c0_188 = arith.constant 0 : index
    %c0_189 = arith.constant 0 : index
    %264 = vector.load %arg8[%c0_188, %c0_189] : memref<8x128xf32, #tpu.memory_space<vmem>>, vector<8x128xf32>
    %c1_190 = arith.constant 1 : index
    %c0_191 = arith.constant 0 : index
    %c0_192 = arith.constant 0 : index
    %265 = vector.load %arg6[%c1_190, %c0_191, %c0_192] : memref<7x224x128xbf16, #tpu.memory_space<vmem>>, vector<1x224x128xbf16>
    %266 = vector.shape_cast %265 : vector<1x224x128xbf16> to vector<224x128xbf16>
    %cst_193 = arith.constant dense<0.000000e+00> : vector<8x128xf32>
    %267 = tpu.matmul %263, %266, %cst_193 {dimension_numbers = #tpu.dot_dimension_numbers<[1], [0], [0], [1], [0, 0, 1, 1], [], []>} : vector<8x224xbf16>, vector<224x128xbf16>, vector<8x128xf32> -> vector<8x128xf32>
    %268 = arith.addf %264, %267 : vector<8x128xf32>
    %c0_194 = arith.constant 0 : index
    %c0_195 = arith.constant 0 : index
    %269 = vector.load %arg8[%c0_194, %c0_195] : memref<8x128xf32, #tpu.memory_space<vmem>>, vector<8x128xf32>
    tpu.vector_store %arg8[%c0_194, %c0_195], %268 {strides = array<i32>} : memref<8x128xf32, #tpu.memory_space<vmem>>, vector<8x128xf32>,
    %c0_196 = arith.constant 0 : index
    %c1024_197 = arith.constant 1024 : index
    %270 = vector.load %arg9[%c0_196, %c1024_197] : memref<8x3840xbf16, #tpu.memory_space<vmem>>, vector<8x768xbf16>
    %c0_198 = arith.constant 0 : index
    %c0_199 = arith.constant 0 : index
    %271 = vector.load %arg4[%c0_198, %c0_199] : memref<768x224xbf16, #tpu.memory_space<vmem>>, vector<768x224xbf16>
    %cst_200 = arith.constant dense<0.000000e+00> : vector<8x224xf32>
    %272 = tpu.matmul %270, %271, %cst_200 {dimension_numbers = #tpu.dot_dimension_numbers<[1], [0], [0], [1], [0, 0, 1, 1], [], []>} : vector<8x768xbf16>, vector<768x224xbf16>, vector<8x224xf32> -> vector<8x224xf32>
    %c0_201 = arith.constant 0 : index
    %c0_202 = arith.constant 0 : index
    %273 = vector.load %arg5[%c0_201, %c0_202] : memref<1x224xf32, #tpu.memory_space<vmem>>, vector<1x224xf32>
    %274 = vector.broadcast %273 : vector<1x224xf32> to vector<8x224xf32>
    %275 = arith.addf %272, %274 : vector<8x224xf32>
    %cst_203 = arith.constant 5.000000e-01 : f32
    %276 = vector.broadcast %cst_203 : f32 to vector<8x224xf32>
    %277 = arith.mulf %276, %275 : vector<8x224xf32>
    %278 = math.tanh %277 : vector<8x224xf32>
    %cst_204 = arith.constant 5.000000e-01 : f32
    %279 = vector.broadcast %cst_204 : f32 to vector<8x224xf32>
    %280 = arith.mulf %279, %278 : vector<8x224xf32>
    %cst_205 = arith.constant 5.000000e-01 : f32
    %281 = vector.broadcast %cst_205 : f32 to vector<8x224xf32>
    %282 = arith.addf %280, %281 : vector<8x224xf32>
    %283 = arith.truncf %282 : vector<8x224xf32> to vector<8x224xbf16>
    %c0_206 = arith.constant 0 : index
    %c0_207 = arith.constant 0 : index
    %284 = vector.load %arg8[%c0_206, %c0_207] : memref<8x128xf32, #tpu.memory_space<vmem>>, vector<8x128xf32>
    %c2_208 = arith.constant 2 : index
    %c0_209 = arith.constant 0 : index
    %c0_210 = arith.constant 0 : index
    %285 = vector.load %arg6[%c2_208, %c0_209, %c0_210] : memref<7x224x128xbf16, #tpu.memory_space<vmem>>, vector<1x224x128xbf16>
    %286 = vector.shape_cast %285 : vector<1x224x128xbf16> to vector<224x128xbf16>
    %cst_211 = arith.constant dense<0.000000e+00> : vector<8x128xf32>
    %287 = tpu.matmul %283, %286, %cst_211 {dimension_numbers = #tpu.dot_dimension_numbers<[1], [0], [0], [1], [0, 0, 1, 1], [], []>} : vector<8x224xbf16>, vector<224x128xbf16>, vector<8x128xf32> -> vector<8x128xf32>
    %288 = arith.addf %284, %287 : vector<8x128xf32>
    %c0_212 = arith.constant 0 : index
    %c0_213 = arith.constant 0 : index
    %289 = vector.load %arg8[%c0_212, %c0_213] : memref<8x128xf32, #tpu.memory_space<vmem>>, vector<8x128xf32>
    tpu.vector_store %arg8[%c0_212, %c0_213], %288 {strides = array<i32>} : memref<8x128xf32, #tpu.memory_space<vmem>>, vector<8x128xf32>,
    %c0_214 = arith.constant 0 : index
    %c1536_215 = arith.constant 1536 : index
    %290 = vector.load %arg9[%c0_214, %c1536_215] : memref<8x3840xbf16, #tpu.memory_space<vmem>>, vector<8x768xbf16>
    %c0_216 = arith.constant 0 : index
    %c0_217 = arith.constant 0 : index
    %291 = vector.load %arg4[%c0_216, %c0_217] : memref<768x224xbf16, #tpu.memory_space<vmem>>, vector<768x224xbf16>
    %cst_218 = arith.constant dense<0.000000e+00> : vector<8x224xf32>
    %292 = tpu.matmul %290, %291, %cst_218 {dimension_numbers = #tpu.dot_dimension_numbers<[1], [0], [0], [1], [0, 0, 1, 1], [], []>} : vector<8x768xbf16>, vector<768x224xbf16>, vector<8x224xf32> -> vector<8x224xf32>
    %c0_219 = arith.constant 0 : index
    %c0_220 = arith.constant 0 : index
    %293 = vector.load %arg5[%c0_219, %c0_220] : memref<1x224xf32, #tpu.memory_space<vmem>>, vector<1x224xf32>
    %294 = vector.broadcast %293 : vector<1x224xf32> to vector<8x224xf32>
    %295 = arith.addf %292, %294 : vector<8x224xf32>
    %cst_221 = arith.constant 5.000000e-01 : f32
    %296 = vector.broadcast %cst_221 : f32 to vector<8x224xf32>
    %297 = arith.mulf %296, %295 : vector<8x224xf32>
    %298 = math.tanh %297 : vector<8x224xf32>
    %cst_222 = arith.constant 5.000000e-01 : f32
    %299 = vector.broadcast %cst_222 : f32 to vector<8x224xf32>
    %300 = arith.mulf %299, %298 : vector<8x224xf32>
    %cst_223 = arith.constant 5.000000e-01 : f32
    %301 = vector.broadcast %cst_223 : f32 to vector<8x224xf32>
    %302 = arith.addf %300, %301 : vector<8x224xf32>
    %303 = arith.truncf %302 : vector<8x224xf32> to vector<8x224xbf16>
    %c0_224 = arith.constant 0 : index
    %c0_225 = arith.constant 0 : index
    %304 = vector.load %arg8[%c0_224, %c0_225] : memref<8x128xf32, #tpu.memory_space<vmem>>, vector<8x128xf32>
    %c3_226 = arith.constant 3 : index
    %c0_227 = arith.constant 0 : index
    %c0_228 = arith.constant 0 : index
    %305 = vector.load %arg6[%c3_226, %c0_227, %c0_228] : memref<7x224x128xbf16, #tpu.memory_space<vmem>>, vector<1x224x128xbf16>
    %306 = vector.shape_cast %305 : vector<1x224x128xbf16> to vector<224x128xbf16>
    %cst_229 = arith.constant dense<0.000000e+00> : vector<8x128xf32>
    %307 = tpu.matmul %303, %306, %cst_229 {dimension_numbers = #tpu.dot_dimension_numbers<[1], [0], [0], [1], [0, 0, 1, 1], [], []>} : vector<8x224xbf16>, vector<224x128xbf16>, vector<8x128xf32> -> vector<8x128xf32>
    %308 = arith.addf %304, %307 : vector<8x128xf32>
    %c0_230 = arith.constant 0 : index
    %c0_231 = arith.constant 0 : index
    %309 = vector.load %arg8[%c0_230, %c0_231] : memref<8x128xf32, #tpu.memory_space<vmem>>, vector<8x128xf32>
    tpu.vector_store %arg8[%c0_230, %c0_231], %308 {strides = array<i32>} : memref<8x128xf32, #tpu.memory_space<vmem>>, vector<8x128xf32>,
    %c0_232 = arith.constant 0 : index
    %c2048_233 = arith.constant 2048 : index
    %310 = vector.load %arg9[%c0_232, %c2048_233] : memref<8x3840xbf16, #tpu.memory_space<vmem>>, vector<8x768xbf16>
    %c0_234 = arith.constant 0 : index
    %c0_235 = arith.constant 0 : index
    %311 = vector.load %arg4[%c0_234, %c0_235] : memref<768x224xbf16, #tpu.memory_space<vmem>>, vector<768x224xbf16>
    %cst_236 = arith.constant dense<0.000000e+00> : vector<8x224xf32>
    %312 = tpu.matmul %310, %311, %cst_236 {dimension_numbers = #tpu.dot_dimension_numbers<[1], [0], [0], [1], [0, 0, 1, 1], [], []>} : vector<8x768xbf16>, vector<768x224xbf16>, vector<8x224xf32> -> vector<8x224xf32>
    %c0_237 = arith.constant 0 : index
    %c0_238 = arith.constant 0 : index
    %313 = vector.load %arg5[%c0_237, %c0_238] : memref<1x224xf32, #tpu.memory_space<vmem>>, vector<1x224xf32>
    %314 = vector.broadcast %313 : vector<1x224xf32> to vector<8x224xf32>
    %315 = arith.addf %312, %314 : vector<8x224xf32>
    %cst_239 = arith.constant 5.000000e-01 : f32
    %316 = vector.broadcast %cst_239 : f32 to vector<8x224xf32>
    %317 = arith.mulf %316, %315 : vector<8x224xf32>
    %318 = math.tanh %317 : vector<8x224xf32>
    %cst_240 = arith.constant 5.000000e-01 : f32
    %319 = vector.broadcast %cst_240 : f32 to vector<8x224xf32>
    %320 = arith.mulf %319, %318 : vector<8x224xf32>
    %cst_241 = arith.constant 5.000000e-01 : f32
    %321 = vector.broadcast %cst_241 : f32 to vector<8x224xf32>
    %322 = arith.addf %320, %321 : vector<8x224xf32>
    %323 = arith.truncf %322 : vector<8x224xf32> to vector<8x224xbf16>
    %c0_242 = arith.constant 0 : index
    %c0_243 = arith.constant 0 : index
    %324 = vector.load %arg8[%c0_242, %c0_243] : memref<8x128xf32, #tpu.memory_space<vmem>>, vector<8x128xf32>
    %c4_244 = arith.constant 4 : index
    %c0_245 = arith.constant 0 : index
    %c0_246 = arith.constant 0 : index
    %325 = vector.load %arg6[%c4_244, %c0_245, %c0_246] : memref<7x224x128xbf16, #tpu.memory_space<vmem>>, vector<1x224x128xbf16>
    %326 = vector.shape_cast %325 : vector<1x224x128xbf16> to vector<224x128xbf16>
    %cst_247 = arith.constant dense<0.000000e+00> : vector<8x128xf32>
    %327 = tpu.matmul %323, %326, %cst_247 {dimension_numbers = #tpu.dot_dimension_numbers<[1], [0], [0], [1], [0, 0, 1, 1], [], []>} : vector<8x224xbf16>, vector<224x128xbf16>, vector<8x128xf32> -> vector<8x128xf32>
    %328 = arith.addf %324, %327 : vector<8x128xf32>
    %c0_248 = arith.constant 0 : index
    %c0_249 = arith.constant 0 : index
    %329 = vector.load %arg8[%c0_248, %c0_249] : memref<8x128xf32, #tpu.memory_space<vmem>>, vector<8x128xf32>
    tpu.vector_store %arg8[%c0_248, %c0_249], %328 {strides = array<i32>} : memref<8x128xf32, #tpu.memory_space<vmem>>, vector<8x128xf32>,
    %c0_250 = arith.constant 0 : index
    %c2560_251 = arith.constant 2560 : index
    %330 = vector.load %arg9[%c0_250, %c2560_251] : memref<8x3840xbf16, #tpu.memory_space<vmem>>, vector<8x768xbf16>
    %c0_252 = arith.constant 0 : index
    %c0_253 = arith.constant 0 : index
    %331 = vector.load %arg4[%c0_252, %c0_253] : memref<768x224xbf16, #tpu.memory_space<vmem>>, vector<768x224xbf16>
    %cst_254 = arith.constant dense<0.000000e+00> : vector<8x224xf32>
    %332 = tpu.matmul %330, %331, %cst_254 {dimension_numbers = #tpu.dot_dimension_numbers<[1], [0], [0], [1], [0, 0, 1, 1], [], []>} : vector<8x768xbf16>, vector<768x224xbf16>, vector<8x224xf32> -> vector<8x224xf32>
    %c0_255 = arith.constant 0 : index
    %c0_256 = arith.constant 0 : index
    %333 = vector.load %arg5[%c0_255, %c0_256] : memref<1x224xf32, #tpu.memory_space<vmem>>, vector<1x224xf32>
    %334 = vector.broadcast %333 : vector<1x224xf32> to vector<8x224xf32>
    %335 = arith.addf %332, %334 : vector<8x224xf32>
    %cst_257 = arith.constant 5.000000e-01 : f32
    %336 = vector.broadcast %cst_257 : f32 to vector<8x224xf32>
    %337 = arith.mulf %336, %335 : vector<8x224xf32>
    %338 = math.tanh %337 : vector<8x224xf32>
    %cst_258 = arith.constant 5.000000e-01 : f32
    %339 = vector.broadcast %cst_258 : f32 to vector<8x224xf32>
    %340 = arith.mulf %339, %338 : vector<8x224xf32>
    %cst_259 = arith.constant 5.000000e-01 : f32
    %341 = vector.broadcast %cst_259 : f32 to vector<8x224xf32>
    %342 = arith.addf %340, %341 : vector<8x224xf32>
    %343 = arith.truncf %342 : vector<8x224xf32> to vector<8x224xbf16>
    %c0_260 = arith.constant 0 : index
    %c0_261 = arith.constant 0 : index
    %344 = vector.load %arg8[%c0_260, %c0_261] : memref<8x128xf32, #tpu.memory_space<vmem>>, vector<8x128xf32>
    %c5_262 = arith.constant 5 : index
    %c0_263 = arith.constant 0 : index
    %c0_264 = arith.constant 0 : index
    %345 = vector.load %arg6[%c5_262, %c0_263, %c0_264] : memref<7x224x128xbf16, #tpu.memory_space<vmem>>, vector<1x224x128xbf16>
    %346 = vector.shape_cast %345 : vector<1x224x128xbf16> to vector<224x128xbf16>
    %cst_265 = arith.constant dense<0.000000e+00> : vector<8x128xf32>
    %347 = tpu.matmul %343, %346, %cst_265 {dimension_numbers = #tpu.dot_dimension_numbers<[1], [0], [0], [1], [0, 0, 1, 1], [], []>} : vector<8x224xbf16>, vector<224x128xbf16>, vector<8x128xf32> -> vector<8x128xf32>
    %348 = arith.addf %344, %347 : vector<8x128xf32>
    %c0_266 = arith.constant 0 : index
    %c0_267 = arith.constant 0 : index
    %349 = vector.load %arg8[%c0_266, %c0_267] : memref<8x128xf32, #tpu.memory_space<vmem>>, vector<8x128xf32>
    tpu.vector_store %arg8[%c0_266, %c0_267], %348 {strides = array<i32>} : memref<8x128xf32, #tpu.memory_space<vmem>>, vector<8x128xf32>,
    %c0_268 = arith.constant 0 : index
    %c3072_269 = arith.constant 3072 : index
    %350 = vector.load %arg9[%c0_268, %c3072_269] : memref<8x3840xbf16, #tpu.memory_space<vmem>>, vector<8x768xbf16>
    %c0_270 = arith.constant 0 : index
    %c0_271 = arith.constant 0 : index
    %351 = vector.load %arg4[%c0_270, %c0_271] : memref<768x224xbf16, #tpu.memory_space<vmem>>, vector<768x224xbf16>
    %cst_272 = arith.constant dense<0.000000e+00> : vector<8x224xf32>
    %352 = tpu.matmul %350, %351, %cst_272 {dimension_numbers = #tpu.dot_dimension_numbers<[1], [0], [0], [1], [0, 0, 1, 1], [], []>} : vector<8x768xbf16>, vector<768x224xbf16>, vector<8x224xf32> -> vector<8x224xf32>
    %c0_273 = arith.constant 0 : index
    %c0_274 = arith.constant 0 : index
    %353 = vector.load %arg5[%c0_273, %c0_274] : memref<1x224xf32, #tpu.memory_space<vmem>>, vector<1x224xf32>
    %354 = vector.broadcast %353 : vector<1x224xf32> to vector<8x224xf32>
    %355 = arith.addf %352, %354 : vector<8x224xf32>
    %cst_275 = arith.constant 5.000000e-01 : f32
    %356 = vector.broadcast %cst_275 : f32 to vector<8x224xf32>
    %357 = arith.mulf %356, %355 : vector<8x224xf32>
    %358 = math.tanh %357 : vector<8x224xf32>
    %cst_276 = arith.constant 5.000000e-01 : f32
    %359 = vector.broadcast %cst_276 : f32 to vector<8x224xf32>
    %360 = arith.mulf %359, %358 : vector<8x224xf32>
    %cst_277 = arith.constant 5.000000e-01 : f32
    %361 = vector.broadcast %cst_277 : f32 to vector<8x224xf32>
    %362 = arith.addf %360, %361 : vector<8x224xf32>
    %363 = arith.truncf %362 : vector<8x224xf32> to vector<8x224xbf16>
    %c0_278 = arith.constant 0 : index
    %c0_279 = arith.constant 0 : index
    %364 = vector.load %arg8[%c0_278, %c0_279] : memref<8x128xf32, #tpu.memory_space<vmem>>, vector<8x128xf32>
    %c6_280 = arith.constant 6 : index
    %c0_281 = arith.constant 0 : index
    %c0_282 = arith.constant 0 : index
    %365 = vector.load %arg6[%c6_280, %c0_281, %c0_282] : memref<7x224x128xbf16, #tpu.memory_space<vmem>>, vector<1x224x128xbf16>
    %366 = vector.shape_cast %365 : vector<1x224x128xbf16> to vector<224x128xbf16>
    %cst_283 = arith.constant dense<0.000000e+00> : vector<8x128xf32>
    %367 = tpu.matmul %363, %366, %cst_283 {dimension_numbers = #tpu.dot_dimension_numbers<[1], [0], [0], [1], [0, 0, 1, 1], [], []>} : vector<8x224xbf16>, vector<224x128xbf16>, vector<8x128xf32> -> vector<8x128xf32>
    %368 = arith.addf %364, %367 : vector<8x128xf32>
    %c0_284 = arith.constant 0 : index
    %c0_285 = arith.constant 0 : index
    %369 = vector.load %arg8[%c0_284, %c0_285] : memref<8x128xf32, #tpu.memory_space<vmem>>, vector<8x128xf32>
    tpu.vector_store %arg8[%c0_284, %c0_285], %368 {strides = array<i32>} : memref<8x128xf32, #tpu.memory_space<vmem>>, vector<8x128xf32>,
    return
  }
  func.func @transform_0(%arg0: i32) -> (i32, i32, i32) {
    %c0_i32 = arith.constant 0 : i32
    %c0_i32_0 = arith.constant 0 : i32
    %c0_i32_1 = arith.constant 0 : i32
    return %c0_i32, %arg0, %c0_i32_0 : i32, i32, i32
  }
  func.func @transform_1(%arg0: i32) -> (i32, i32) {
    %c0_i32 = arith.constant 0 : i32
    %c0_i32_0 = arith.constant 0 : i32
    %c0_i32_1 = arith.constant 0 : i32
    return %c0_i32, %c0_i32_0 : i32, i32
  }
  func.func @transform_2(%arg0: i32) -> (i32, i32) {
    %c0_i32 = arith.constant 0 : i32
    %c0_i32_0 = arith.constant 0 : i32
    %c0_i32_1 = arith.constant 0 : i32
    return %c0_i32, %c0_i32_0 : i32, i32
  }
  func.func @transform_3(%arg0: i32) -> (i32, i32) {
    %c0_i32 = arith.constant 0 : i32
    %c0_i32_0 = arith.constant 0 : i32
    %c0_i32_1 = arith.constant 0 : i32
    return %c0_i32, %c0_i32_0 : i32, i32
  }
  func.func @transform_4(%arg0: i32) -> (i32, i32) {
    %c0_i32 = arith.constant 0 : i32
    %c0_i32_0 = arith.constant 0 : i32
    %c0_i32_1 = arith.constant 0 : i32
    return %c0_i32, %c0_i32_0 : i32, i32
  }
  func.func @transform_5(%arg0: i32) -> (i32, i32, i32) {
    %c0_i32 = arith.constant 0 : i32
    %c0_i32_0 = arith.constant 0 : i32
    %c0_i32_1 = arith.constant 0 : i32
    %c0_i32_2 = arith.constant 0 : i32
    return %c0_i32, %c0_i32_0, %c0_i32_1 : i32, i32, i32
  }
  func.func @transform_6(%arg0: i32) -> (i32, i32) {
    %c0_i32 = arith.constant 0 : i32
    %c0_i32_0 = arith.constant 0 : i32
    %c0_i32_1 = arith.constant 0 : i32
    return %c0_i32, %c0_i32_0 : i32, i32
  }
  func.func @transform_7(%arg0: i32) -> (i32, i32) {
    %c0_i32 = arith.constant 0 : i32
    %c0_i32_0 = arith.constant 0 : i32
    return %arg0, %c0_i32 : i32, i32
  }
}

</mosaic_0001>

<bundles_post_ra>
// kernel: model3_forward.1
= control target key start
LH: loop header
LB: loop body
LE: loop exit
PB: predicated region body
PF: predicated region fallthrough
CT: control target
= control target key end

     0   :  { %v14563_v1 = vmov 0   ;;  %v47_v59 = vlaneseq  ;;  %vm3245_vm0 = vcmask 785408   ;;  %s14555_s1 = inlined_call_operand.vmem [shape: bf16[128,256], index: 1, kind: input, shape index: {}]   ;;  %s14556_s0 = inlined_call_operand.vmem [shape: bf16[14,8,128], index: 0, kind: input, shape index: {}]   ;;  %s14557_s3 = inlined_call_operand.vmem [shape: bf16[768,224], index: 3, kind: input, shape index: {}]   ;;  %s14558_s2 = inlined_call_operand.vmem [shape: f32[1,256], index: 2, kind: input, shape index: {}]   ;;  %s14559_s5 = inlined_call_operand.vmem [shape: bf16[7,224,128], index: 5, kind: input, shape index: {}]   ;;  %s14560_s4 = inlined_call_operand.vmem [shape: f32[1,224], index: 4, kind: input, shape index: {}]   ;;  %s14561_s6 = inlined_call_operand.vmem [shape: f32[1,128], index: 6, kind: input, shape index: {}]   ;;  %s14562_s7 = inlined_call_operand.vmem [shape: f32[8,128], index: 7, kind: output, shape index: {}]  }
   0x1   :  { %v11133_v0 = vld [vmem:[%s14555_s1 + $0x4] ss:$8 sps:$4 sm:$0xff]   ;;  %169 = vmatprep.mubr.bf16.mxu0 %v14563_v1  ;;  %673 = vmatprep.mubr.bf16.mxu1 %v14563_v1  ;;  %v11140_v2 = vld [vmem:[%s14555_s1] ss:$8 sps:$4 sm:$0xff]   ;;  %v11146_v3 = vld [vmem:[%s14555_s1 + $0x14] ss:$8 sps:$4 sm:$0xff]   ;;  %v8972_v48 = vcombine.high %v14563_v1, %v14563_v1 }
   0x2   :  { %137 = vmatprep.subr.bf16.mxu0 %v11133_v0  ;;  %v11152_v4 = vld [vmem:[%s14555_s1 + $0x10] ss:$8 sps:$4 sm:$0xff]   ;;  %v11158_v5 = vld [vmem:[%s14555_s1 + $0x24] ss:$8 sps:$4 sm:$0xff]   ;;  %v11164_v6 = vld [vmem:[%s14555_s1 + $0x20] ss:$8 sps:$4 sm:$0xff]  }
   0x3   :  { %138 = vmatpush1.bf16.msra.mxu0 %v11140_v2  ;;  %v11170_v7 = vld [vmem:[%s14555_s1 + $0x34] ss:$8 sps:$4 sm:$0xff]   ;;  %v11176_v8 = vld [vmem:[%s14555_s1 + $0x30] ss:$8 sps:$4 sm:$0xff]   ;;  %v11181_v9 = vld [vmem:[%s14555_s1 + $0x44] ss:$8 sps:$4 sm:$0xff]  }
   0x4   :  { %139 = vmatprep.subr.bf16.mxu0 %v11146_v3  ;;  %v11187_v10 = vld [vmem:[%s14555_s1 + $0x40] ss:$8 sps:$4 sm:$0xff]   ;;  %v11192_v11 = vld [vmem:[%s14555_s1 + $0x54] ss:$8 sps:$4 sm:$0xff]   ;;  %v11199_v12 = vld [vmem:[%s14555_s1 + $0x50] ss:$8 sps:$4 sm:$0xff]  }
   0x5   :  { %v11204_v13 = vld [vmem:[%s14555_s1 + $0x64] ss:$8 sps:$4 sm:$0xff]   ;;  %v11212_v14 = vld [vmem:[%s14555_s1 + $0x60] ss:$8 sps:$4 sm:$0xff]   ;;  %v11218_v15 = vld [vmem:[%s14555_s1 + $0x74] ss:$8 sps:$4 sm:$0xff]  }
   0x6   :  { %v11224_v16 = vld [vmem:[%s14555_s1 + $0x70] ss:$8 sps:$4 sm:$0xff]   ;;  %v28_v17 = vld [vmem:[%s14556_s0] sm:$0xf]  ;;  %v8736_v18 = vld [vmem:[%s14556_s0 + $0x4] sm:$0xf] }
   0x7   :  { %140 = vmatpush1.bf16.msra.mxu0 %v11152_v4  ;;  %v8754_v19 = vld [vmem:[%s14556_s0 + $0x8] sm:$0xf]  ;;  %v8790_v20 = vld [vmem:[%s14556_s0 + $0x10] sm:$0xf]  ;;  %v8826_v21 = vld [vmem:[%s14556_s0 + $0x18] sm:$0xf] }
   0x8   :  { %141 = vmatprep.subr.bf16.mxu0 %v11158_v5  ;;  %v11326_v22 = vld [vmem:[%s14555_s1 + $0x4] ss:$8 sps:$4 sm:$0xff]   ;;  %v10164_v23 = vld [vmem:[%s14555_s1] ss:$8 sps:$4 sm:$0xff]   ;;  %v10168_v24 = vld [vmem:[%s14555_s1 + $0x14] ss:$8 sps:$4 sm:$0xff]  }
   0x9   :  { %641 = vmatprep.subr.bf16.mxu1 %v11326_v22  ;;  %v10170_v25 = vld [vmem:[%s14555_s1 + $0x10] ss:$8 sps:$4 sm:$0xff]   ;;  %v8862_v26 = vld [vmem:[%s14556_s0 + $0x20] sm:$0xf]  ;;  %v10174_v27 = vld [vmem:[%s14555_s1 + $0x24] ss:$8 sps:$4 sm:$0xff]  }
   0xa   :  { %642 = vmatpush1.bf16.msra.mxu1 %v10164_v23  ;;  %v10176_v28 = vld [vmem:[%s14555_s1 + $0x20] ss:$8 sps:$4 sm:$0xff]   ;;  %v10180_v29 = vld [vmem:[%s14555_s1 + $0x34] ss:$8 sps:$4 sm:$0xff]   ;;  %v10182_v30 = vld [vmem:[%s14555_s1 + $0x30] ss:$8 sps:$4 sm:$0xff]  }
   0xb   :  { %142 = vmatpush1.bf16.msra.mxu0 %v11164_v6  ;;  %643 = vmatprep.subr.bf16.mxu1 %v10168_v24  ;;  %v10186_v31 = vld [vmem:[%s14555_s1 + $0x44] ss:$8 sps:$4 sm:$0xff]   ;;  %v10188_v32 = vld [vmem:[%s14555_s1 + $0x40] ss:$8 sps:$4 sm:$0xff]   ;;  %v10192_v33 = vld [vmem:[%s14555_s1 + $0x54] ss:$8 sps:$4 sm:$0xff]  }
   0xc   :  { %143 = vmatprep.subr.bf16.mxu0 %v11170_v7  ;;  %v10194_v34 = vld [vmem:[%s14555_s1 + $0x50] ss:$8 sps:$4 sm:$0xff]   ;;  %v10198_v35 = vld [vmem:[%s14555_s1 + $0x64] ss:$8 sps:$4 sm:$0xff]   ;;  %v10200_v36 = vld [vmem:[%s14555_s1 + $0x60] ss:$8 sps:$4 sm:$0xff]  }
   0xd   :  { %v10204_v37 = vld [vmem:[%s14555_s1 + $0x74] ss:$8 sps:$4 sm:$0xff]   ;;  %v10206_v38 = vld [vmem:[%s14555_s1 + $0x70] ss:$8 sps:$4 sm:$0xff]   ;;  %v8772_v39 = vld [vmem:[%s14556_s0 + $0xc] sm:$0xf] }
   0xe   :  { %644 = vmatpush1.bf16.msra.mxu1 %v10170_v25  ;;  %v8898_v40 = vld [vmem:[%s14556_s0 + $0x28] sm:$0xf]  ;;  %v10122_v45 = vld [vmem:[%s14557_s3 + $0x4] ss:$8 sps:$4 sm:$0xff]   ;;  %v8934_v46 = vld [vmem:[%s14556_s0 + $0x30] sm:$0xf] }
   0xf   :  { %144 = vmatpush1.bf16.msra.mxu0 %v11176_v8  ;;  %645 = vmatprep.subr.bf16.mxu1 %v10174_v27  ;;  %v10120_v47 = vld [vmem:[%s14557_s3] ss:$8 sps:$4 sm:$0xff]   ;;  %v10125_v49 = vld [vmem:[%s14557_s3 + $0x14] ss:$8 sps:$4 sm:$0xff]   ;;  %v10123_v50 = vld [vmem:[%s14557_s3 + $0x10] ss:$8 sps:$4 sm:$0xff]  }
  0x10   :  { %145 = vmatprep.subr.bf16.mxu0 %v11181_v9  ;;  %v11447_v51 = vld [vmem:[%s14557_s3 + $0x24] ss:$8 sps:$4 sm:$0xff]   ;;  %v11452_v52 = vld [vmem:[%s14557_s3 + $0x20] ss:$8 sps:$4 sm:$0xff]   ;;  %v11458_v53 = vld [vmem:[%s14557_s3 + $0x34] ss:$8 sps:$4 sm:$0xff]  }
  0x11   :  { %v11464_v54 = vld [vmem:[%s14557_s3 + $0x30] ss:$8 sps:$4 sm:$0xff]   ;;  %v11469_v55 = vld [vmem:[%s14557_s3 + $0x44] ss:$8 sps:$4 sm:$0xff]   ;;  %v11476_v56 = vld [vmem:[%s14557_s3 + $0x40] ss:$8 sps:$4 sm:$0xff]  }
  0x12   :  { %646 = vmatpush1.bf16.msra.mxu1 %v10176_v28  ;;  %v11481_v57 = vld [vmem:[%s14557_s3 + $0x54] ss:$8 sps:$4 sm:$0xff]   ;;  %v11488_v58 = vld [vmem:[%s14557_s3 + $0x50] ss:$8 sps:$4 sm:$0xff]   ;;  %v11494_v60 = vld [vmem:[%s14557_s3 + $0x64] ss:$8 sps:$4 sm:$0xff]  }
  0x13   :  { %146 = vmatpush1.bf16.msra.mxu0 %v11187_v10  ;;  %647 = vmatprep.subr.bf16.mxu1 %v10180_v29  ;;  %v11501_v62 = vld [vmem:[%s14557_s3 + $0x60] ss:$8 sps:$4 sm:$0xff]  }
  0x14   :  { %147 = vmatprep.subr.bf16.mxu0 %v11192_v11 }
  0x16   :  { %648 = vmatpush1.bf16.msra.mxu1 %v10182_v30 }
  0x17   :  { %148 = vmatpush1.bf16.msra.mxu0 %v11199_v12  ;;  %649 = vmatprep.subr.bf16.mxu1 %v10186_v31 }
  0x18   :  { %149 = vmatprep.subr.bf16.mxu0 %v11204_v13 }
  0x1a   :  { %650 = vmatpush1.bf16.msra.mxu1 %v10188_v32 }
  0x1b   :  { %150 = vmatpush1.bf16.msra.mxu0 %v11212_v14  ;;  %651 = vmatprep.subr.bf16.mxu1 %v10192_v33 }
  0x1c   :  { %151 = vmatprep.subr.bf16.mxu0 %v11218_v15 }
  0x1e   :  { %652 = vmatpush1.bf16.msra.mxu1 %v10194_v34 }
  0x1f   :  { %152 = vmatpush1.bf16.msra.mxu0 %v11224_v16  ;;  %653 = vmatprep.subr.bf16.mxu1 %v10198_v35 }
  0x20   :  { %305 = vmatprep.subr.bf16.mxu0 %v11133_v0 }
  0x22   :  { %170 = vmatmul.mubr.bf16.vlgmr.msra.gmra.mrb[0].mxu0 %v28_v17  ;;  %654 = vmatpush1.bf16.msra.mxu1 %v10200_v36  ;;  %v11570_v17 = vld [vmem:[%s14557_s3 + $0xb4] ss:$8 sps:$4 sm:$0xff]  }
  0x23   :  { %306 = vmatpush1.bf16.msra.mxu0 %v11140_v2  ;;  %337 = vmatprep.mubr.bf16.mxu0 %v14563_v1 }
  0x24   :  { %307 = vmatprep.subr.bf16.mxu0 %v11146_v3  ;;  %655 = vmatprep.subr.bf16.mxu1 %v10204_v37 }
  0x26   :  { %656 = vmatpush1.bf16.msra.mxu1 %v10206_v38 }
  0x27   :  { %308 = vmatpush1.bf16.msra.mxu0 %v11152_v4  ;;  %977 = vmatprep.subr.bf16.mxu1 %v11326_v22 }
  0x28   :  { %309 = vmatprep.subr.bf16.mxu0 %v11158_v5 }
  0x29   :  { %674 = vmatmul.mubr.bf16.vlgmr.msra.gmra.mrb[0].mxu1 %v8772_v39  ;;  %v10183_v39 = vld [vmem:[%s14557_s3 + $0x110] ss:$8 sps:$4 sm:$0xff]  }
  0x2a   :  { %978 = vmatpush1.bf16.msra.mxu1 %v10164_v23  ;;  %1009 = vmatprep.mubr.bf16.mxu1 %v14563_v1  ;;  %v11606_v23 = vld [vmem:[%s14557_s3 + $0xe4] ss:$8 sps:$4 sm:$0xff]  }
  0x2b   :  { %310 = vmatpush1.bf16.msra.mxu0 %v11164_v6  ;;  %979 = vmatprep.subr.bf16.mxu1 %v10168_v24 }
  0x2c   :  { %311 = vmatprep.subr.bf16.mxu0 %v11170_v7 }
  0x2e   :  { %980 = vmatpush1.bf16.msra.mxu1 %v10170_v25  ;;  %v11613_v25 = vld [vmem:[%s14557_s3 + $0xe0] ss:$8 sps:$4 sm:$0xff]  }
  0x2f   :  { %312 = vmatpush1.bf16.msra.mxu0 %v11176_v8  ;;  %981 = vmatprep.subr.bf16.mxu1 %v10174_v27 }
  0x30   :  { %313 = vmatprep.subr.bf16.mxu0 %v11181_v9 }
  0x32   :  { %982 = vmatpush1.bf16.msra.mxu1 %v10176_v28 }
  0x33   :  { %314 = vmatpush1.bf16.msra.mxu0 %v11187_v10  ;;  %983 = vmatprep.subr.bf16.mxu1 %v10180_v29 }
  0x34   :  { %315 = vmatprep.subr.bf16.mxu0 %v11192_v11 }
  0x36   :  { %984 = vmatpush1.bf16.msra.mxu1 %v10182_v30  ;;  %v11622_v30 = vld [vmem:[%s14557_s3 + $0xf4] ss:$8 sps:$4 sm:$0xff]  }
  0x37   :  { %316 = vmatpush1.bf16.msra.mxu0 %v11199_v12  ;;  %985 = vmatprep.subr.bf16.mxu1 %v10186_v31 }
  0x38   :  { %317 = vmatprep.subr.bf16.mxu0 %v11204_v13 }
  0x3a   :  { %986 = vmatpush1.bf16.msra.mxu1 %v10188_v32  ;;  %v11627_v32 = vld [vmem:[%s14557_s3 + $0xf0] ss:$8 sps:$4 sm:$0xff]  }
  0x3b   :  { %318 = vmatpush1.bf16.msra.mxu0 %v11212_v14  ;;  %987 = vmatprep.subr.bf16.mxu1 %v10192_v33  ;;  %v10179_v33 = vld [vmem:[%s14557_s3 + $0x104] ss:$8 sps:$4 sm:$0xff]  }
  0x3c   :  { %319 = vmatprep.subr.bf16.mxu0 %v11218_v15 }
  0x3e   :  { %988 = vmatpush1.bf16.msra.mxu1 %v10194_v34  ;;  %v10177_v34 = vld [vmem:[%s14557_s3 + $0x100] ss:$8 sps:$4 sm:$0xff]  }
  0x3f   :  { %320 = vmatpush1.bf16.msra.mxu0 %v11224_v16  ;;  %989 = vmatprep.subr.bf16.mxu1 %v10198_v35 }
  0x40   :  { %473 = vmatprep.subr.bf16.mxu0 %v11133_v0 }
  0x42   :  { %338 = vmatmul.mubr.bf16.vlgmr.msra.gmra.mrb[4].mxu0 %v8736_v18  ;;  %990 = vmatpush1.bf16.msra.mxu1 %v10200_v36  ;;  %v11576_v18 = vld [vmem:[%s14557_s3 + $0xb0] ss:$8 sps:$4 sm:$0xff]   ;;  %v8971_v36 = vcombine.low %v14563_v1, %v14563_v1 }
  0x43   :  { %474 = vmatpush1.bf16.msra.mxu0 %v11140_v2  ;;  %505 = vmatprep.mubr.bf16.mxu0 %v14563_v1 }
  0x44   :  { %475 = vmatprep.subr.bf16.mxu0 %v11146_v3  ;;  %991 = vmatprep.subr.bf16.mxu1 %v10204_v37  ;;  %v10185_v37 = vld [vmem:[%s14557_s3 + $0x114] ss:$8 sps:$4 sm:$0xff]  }
  0x46   :  { %992 = vmatpush1.bf16.msra.mxu1 %v10206_v38 }
  0x47   :  { %476 = vmatpush1.bf16.msra.mxu0 %v11152_v4  ;;  %1313 = vmatprep.subr.bf16.mxu1 %v11326_v22  ;;  %v11600_v22 = vld [vmem:[%s14557_s3 + $0xd0] ss:$8 sps:$4 sm:$0xff]  }
  0x48   :  { %477 = vmatprep.subr.bf16.mxu0 %v11158_v5 }
  0x4b   :  { %478 = vmatpush1.bf16.msra.mxu0 %v11164_v6 }
  0x4c   :  { %479 = vmatprep.subr.bf16.mxu0 %v11170_v7 }
  0x4f   :  { %480 = vmatpush1.bf16.msra.mxu0 %v11176_v8 }
  0x50   :  { %481 = vmatprep.subr.bf16.mxu0 %v11181_v9 }
  0x53   :  { %482 = vmatpush1.bf16.msra.mxu0 %v11187_v10 }
  0x54   :  { %483 = vmatprep.subr.bf16.mxu0 %v11192_v11 }
  0x57   :  { %484 = vmatpush1.bf16.msra.mxu0 %v11199_v12 }
  0x58   :  { %485 = vmatprep.subr.bf16.mxu0 %v11204_v13 }
  0x5b   :  { %486 = vmatpush1.bf16.msra.mxu0 %v11212_v14 }
  0x5c   :  { %487 = vmatprep.subr.bf16.mxu0 %v11218_v15 }
  0x5f   :  { %488 = vmatpush1.bf16.msra.mxu0 %v11224_v16 }
  0x60   :  { %809 = vmatprep.subr.bf16.mxu0 %v11133_v0 }
  0x62   :  { %506 = vmatmul.mubr.bf16.vlgmr.msra.gmra.mrb[8].mxu0 %v8754_v19  ;;  %v11581_v19 = vld [vmem:[%s14557_s3 + $0xc4] ss:$8 sps:$4 sm:$0xff]  }
  0x63   :  { %810 = vmatpush1.bf16.msra.mxu0 %v11140_v2  ;;  %841 = vmatprep.mubr.bf16.mxu0 %v14563_v1 }
  0x64   :  { %811 = vmatprep.subr.bf16.mxu0 %v11146_v3 }
  0x67   :  { %812 = vmatpush1.bf16.msra.mxu0 %v11152_v4 }
  0x68   :  { %813 = vmatprep.subr.bf16.mxu0 %v11158_v5 }
  0x6b   :  { %814 = vmatpush1.bf16.msra.mxu0 %v11164_v6 }
  0x6c   :  { %815 = vmatprep.subr.bf16.mxu0 %v11170_v7 }
  0x6f   :  { %816 = vmatpush1.bf16.msra.mxu0 %v11176_v8 }
  0x70   :  { %817 = vmatprep.subr.bf16.mxu0 %v11181_v9 }
  0x73   :  { %818 = vmatpush1.bf16.msra.mxu0 %v11187_v10 }
  0x74   :  { %819 = vmatprep.subr.bf16.mxu0 %v11192_v11 }
  0x77   :  { %820 = vmatpush1.bf16.msra.mxu0 %v11199_v12 }
  0x78   :  { %821 = vmatprep.subr.bf16.mxu0 %v11204_v13 }
  0x7b   :  { %822 = vmatpush1.bf16.msra.mxu0 %v11212_v14 }
  0x7c   :  { %823 = vmatprep.subr.bf16.mxu0 %v11218_v15 }
  0x7f   :  { %824 = vmatpush1.bf16.msra.mxu0 %v11224_v16 }
  0x80   :  { %1145 = vmatprep.subr.bf16.mxu0 %v11133_v0 }
  0x82   :  { %842 = vmatmul.mubr.bf16.vlgmr.msra.gmra.mrb[12].mxu0 %v8790_v20  ;;  %v11588_v20 = vld [vmem:[%s14557_s3 + $0xc0] ss:$8 sps:$4 sm:$0xff]  }
  0x83   :  { %1146 = vmatpush1.bf16.msra.mxu0 %v11140_v2  ;;  %1177 = vmatprep.mubr.bf16.mxu0 %v14563_v1 }
  0x84   :  { %1147 = vmatprep.subr.bf16.mxu0 %v11146_v3 }
  0x87   :  { %1148 = vmatpush1.bf16.msra.mxu0 %v11152_v4 }
  0x88   :  { %1149 = vmatprep.subr.bf16.mxu0 %v11158_v5 }
  0x8b   :  { %1150 = vmatpush1.bf16.msra.mxu0 %v11164_v6 }
  0x8c   :  { %1151 = vmatprep.subr.bf16.mxu0 %v11170_v7 }
  0x8f   :  { %1152 = vmatpush1.bf16.msra.mxu0 %v11176_v8 }
  0x90   :  { %1153 = vmatprep.subr.bf16.mxu0 %v11181_v9 }
  0x93   :  { %1154 = vmatpush1.bf16.msra.mxu0 %v11187_v10 }
  0x94   :  { %1155 = vmatprep.subr.bf16.mxu0 %v11192_v11 }
  0x97   :  { %1156 = vmatpush1.bf16.msra.mxu0 %v11199_v12 }
  0x98   :  { %1157 = vmatprep.subr.bf16.mxu0 %v11204_v13 }
  0x9b   :  { %1158 = vmatpush1.bf16.msra.mxu0 %v11212_v14 }
  0x9c   :  { %1159 = vmatprep.subr.bf16.mxu0 %v11218_v15 }
  0x9f   :  { %1160 = vmatpush1.bf16.msra.mxu0 %v11224_v16 }
  0xa0   :  { %1481 = vmatprep.subr.bf16.mxu0 %v11133_v0 }
  0xa2   :  { %1178 = vmatmul.mubr.bf16.vlgmr.msra.gmra.mrb[16].mxu0 %v8826_v21  ;;  %v11593_v21 = vld [vmem:[%s14557_s3 + $0xd4] ss:$8 sps:$4 sm:$0xff]  }
  0xa3   :  { %1482 = vmatpush1.bf16.msra.mxu0 %v11140_v2  ;;  %1513 = vmatprep.mubr.bf16.mxu0 %v14563_v1 }
  0xa4   :  { %1483 = vmatprep.subr.bf16.mxu0 %v11146_v3 }
  0xa7   :  { %1484 = vmatpush1.bf16.msra.mxu0 %v11152_v4 }
  0xa8   :  { %1485 = vmatprep.subr.bf16.mxu0 %v11158_v5 }
  0xab   :  { %1486 = vmatpush1.bf16.msra.mxu0 %v11164_v6 }
  0xac   :  { %1487 = vmatprep.subr.bf16.mxu0 %v11170_v7 }
  0xaf   :  { %1488 = vmatpush1.bf16.msra.mxu0 %v11176_v8 }
  0xb0   :  { %1489 = vmatprep.subr.bf16.mxu0 %v11181_v9 }
  0xb3   :  { %1490 = vmatpush1.bf16.msra.mxu0 %v11187_v10 }
  0xb4   :  { %1491 = vmatprep.subr.bf16.mxu0 %v11192_v11 }
  0xb7   :  { %1492 = vmatpush1.bf16.msra.mxu0 %v11199_v12 }
  0xb8   :  { %1493 = vmatprep.subr.bf16.mxu0 %v11204_v13 }
  0xbb   :  { %1494 = vmatpush1.bf16.msra.mxu0 %v11212_v14 }
  0xbc   :  { %1495 = vmatprep.subr.bf16.mxu0 %v11218_v15 }
  0xbf   :  { %1496 = vmatpush1.bf16.msra.mxu0 %v11224_v16 }
  0xc0   :  { %1817 = vmatprep.subr.bf16.mxu0 %v11133_v0 }
  0xc2   :  { %1514 = vmatmul.mubr.bf16.vlgmr.msra.gmra.mrb[20].mxu0 %v8862_v26 }
  0xc3   :  { %1818 = vmatpush1.bf16.msra.mxu0 %v11140_v2  ;;  %1849 = vmatprep.mubr.bf16.mxu0 %v14563_v1 }
  0xc4   :  { %1819 = vmatprep.subr.bf16.mxu0 %v11146_v3 }
  0xc7   :  { %1820 = vmatpush1.bf16.msra.mxu0 %v11152_v4 }
  0xc8   :  { %1821 = vmatprep.subr.bf16.mxu0 %v11158_v5 }
  0xcb   :  { %1822 = vmatpush1.bf16.msra.mxu0 %v11164_v6 }
  0xcc   :  { %1823 = vmatprep.subr.bf16.mxu0 %v11170_v7 }
  0xcf   :  { %1824 = vmatpush1.bf16.msra.mxu0 %v11176_v8 }
  0xd0   :  { %1825 = vmatprep.subr.bf16.mxu0 %v11181_v9 }
  0xd3   :  { %1826 = vmatpush1.bf16.msra.mxu0 %v11187_v10 }
  0xd4   :  { %1827 = vmatprep.subr.bf16.mxu0 %v11192_v11 }
  0xd7   :  { %1828 = vmatpush1.bf16.msra.mxu0 %v11199_v12 }
  0xd8   :  { %1829 = vmatprep.subr.bf16.mxu0 %v11204_v13 }
  0xdb   :  { %1830 = vmatpush1.bf16.msra.mxu0 %v11212_v14 }
  0xdc   :  { %1831 = vmatprep.subr.bf16.mxu0 %v11218_v15 }
  0xdf   :  { %1832 = vmatpush1.bf16.msra.mxu0 %v11224_v16 }
  0xe0   :  { %2153 = vmatprep.subr.bf16.mxu0 %v11133_v0 }
  0xe2   :  { %1850 = vmatmul.mubr.bf16.vlgmr.msra.gmra.mrb[24].mxu0 %v8898_v40  ;;  %v10191_v40 = vld [vmem:[%s14557_s3 + $0x124] ss:$8 sps:$4 sm:$0xff]  }
  0xe3   :  { %2154 = vmatpush1.bf16.msra.mxu0 %v11140_v2  ;;  %2185 = vmatprep.mubr.bf16.mxu0 %v14563_v1  ;;  %v11506_v2 = vshrl.u32 %v47_v59, 7 }
  0xe4   :  { %2155 = vmatprep.subr.bf16.mxu0 %v11146_v3 }
  0xe7   :  { %2156 = vmatpush1.bf16.msra.mxu0 %v11152_v4  ;;  %v11512_v4 = vld [vmem:[%s14557_s3 + $0x74] ss:$8 sps:$4 sm:$0xff]  }
  0xe8   :  { %2157 = vmatprep.subr.bf16.mxu0 %v11158_v5  ;;  %v11517_v5 = vld [vmem:[%s14557_s3 + $0x70] ss:$8 sps:$4 sm:$0xff]  }
  0xeb   :  { %2158 = vmatpush1.bf16.msra.mxu0 %v11164_v6  ;;  %v11522_v6 = vld [vmem:[%s14558_s2] sm:$0x3] }
  0xec   :  { %2159 = vmatprep.subr.bf16.mxu0 %v11170_v7  ;;  %v11526_v7 = vsub.s32 1, %v11506_v2 }
  0xef   :  { %2160 = vmatpush1.bf16.msra.mxu0 %v11176_v8  ;;  %v11532_v8 = vld [vmem:[%s14557_s3 + $0x84] ss:$8 sps:$4 sm:$0xff]  }
  0xf0   :  { %2161 = vmatprep.subr.bf16.mxu0 %v11181_v9  ;;  %v11537_v9 = vld [vmem:[%s14557_s3 + $0x80] ss:$8 sps:$4 sm:$0xff]  }
  0xf3   :  { %2162 = vmatpush1.bf16.msra.mxu0 %v11187_v10  ;;  %v54_v10 = vrot.slane %v11522_v6, %v11526_v7 }
  0xf4   :  { %2163 = vmatprep.subr.bf16.mxu0 %v11192_v11  ;;  %v11546_v11 = vld [vmem:[%s14557_s3 + $0x94] ss:$8 sps:$4 sm:$0xff]  }
  0xf5   :  { %v11419_v41 = vpop.f32.mrb[0].mxu0 }
  0xf6   :  { %v173_v42 = vpop.f32.mrb[1].mxu0 }
  0xf7   :  { %v175_v43 = vpop.f32.mrb[2].mxu0  ;;  %2164 = vmatpush1.bf16.msra.mxu0 %v11199_v12  ;;  %v11551_v12 = vld [vmem:[%s14557_s3 + $0x90] ss:$8 sps:$4 sm:$0xff]  }
  0xf8   :  { %v176_v44 = vpop.f32.mrb[3].mxu0  ;;  %2165 = vmatprep.subr.bf16.mxu0 %v11204_v13  ;;  %v174_v13 = vadd.f32 %v173_v42, %v54_v10  ;;  %v10189_v42 = vld [vmem:[%s14557_s3 + $0x120] ss:$8 sps:$4 sm:$0xff]   ;;  %v10197_v43 = vld [vmem:[%s14557_s3 + $0x134] ss:$8 sps:$4 sm:$0xff]  }
  0xf9   :  { %v10195_v44 = vld [vmem:[%s14557_s3 + $0x130] ss:$8 sps:$4 sm:$0xff]   ;;  %v10210_v10 = vld [vmem:[%s14557_s3 + $0x160] ss:$8 sps:$4 sm:$0xff]  }
  0xfb   :  { %2166 = vmatpush1.bf16.msra.mxu0 %v11212_v14  ;;  %v11558_v14 = vld [vmem:[%s14557_s3 + $0xa4] ss:$8 sps:$4 sm:$0xff]  }
  0xfc   :  { %2167 = vmatprep.subr.bf16.mxu0 %v11218_v15  ;;  %v11563_v15 = vld [vmem:[%s14557_s3 + $0xa0] ss:$8 sps:$4 sm:$0xff]  }
  0xff   :  { %2168 = vmatpush1.bf16.msra.mxu0 %v11224_v16  ;;  %v179_v16 = vmul.f32 0.5, %v174_v13 }
 0x100   :  { %2999 = vmatprep.subr.bf16.mxu0 %v10122_v45  ;;  %v10203_v45 = vld [vmem:[%s14557_s3 + $0x144] ss:$8 sps:$4 sm:$0xff]  }
 0x101   :  { %10986 = vtanh.f32 %v179_v16  ;;  %v10215_v16 = vld [vmem:[%s14557_s3 + $0x174] ss:$8 sps:$4 sm:$0xff]  }
 0x102   :  { %2186 = vmatmul.mubr.bf16.vlgmr.msra.gmra.mrb[28].mxu0 %v8934_v46  ;;  %v10201_v46 = vld [vmem:[%s14557_s3 + $0x140] ss:$8 sps:$4 sm:$0xff]  }
 0x103   :  { %3000 = vmatpush1.bf16.msra.mxu0 %v10120_v47  ;;  %3031 = vmatprep.mubr.bf16.mxu0 %v8972_v48  ;;  %v10209_v47 = vld [vmem:[%s14557_s3 + $0x154] ss:$8 sps:$4 sm:$0xff]   ;;  %v10207_v48 = vld [vmem:[%s14557_s3 + $0x150] ss:$8 sps:$4 sm:$0xff]  }
 0x104   :  { %3001 = vmatprep.subr.bf16.mxu0 %v10125_v49  ;;  %v10212_v49 = vld [vmem:[%s14557_s3 + $0x164] ss:$8 sps:$4 sm:$0xff]  }
 0x107   :  { %3002 = vmatpush1.bf16.msra.mxu0 %v10123_v50 }
 0x108   :  { %3003 = vmatprep.subr.bf16.mxu0 %v11447_v51 }
 0x10b   :  { %3004 = vmatpush1.bf16.msra.mxu0 %v11452_v52  ;;  %v10987_v26 = vpop.eup %10986 }
 0x10c   :  { %3005 = vmatprep.subr.bf16.mxu0 %v11458_v53  ;;  %v183_v31 = vmul.f32 0.5, %v10987_v26  ;;  %v11070_v26 = vld [vmem:[%s14555_s1] ss:$8 sps:$4 sm:$0xff]  }
 0x10e   :  { %v185_v35 = vadd.f32 0.5, %v183_v31  ;;  %v10213_v31 = vld [vmem:[%s14557_s3 + $0x170] ss:$8 sps:$4 sm:$0xff]  }
 0x10f   :  { %3006 = vmatpush1.bf16.msra.mxu0 %v11464_v54 }
 0x110   :  { %3007 = vmatprep.subr.bf16.mxu0 %v11469_v55  ;;  %v9973_v38 = vpack.c.bf16 %v185_v35, %v185_v35  ;;  %v11073_v35 = vld [vmem:[%s14555_s1 + $0x24] ss:$8 sps:$4 sm:$0xff]  }
 0x113   :  { %3008 = vmatpush1.bf16.msra.mxu0 %v11476_v56 }
 0x114   :  { %3009 = vmatprep.subr.bf16.mxu0 %v11481_v57 }
 0x115   :  { %v11496_v61 = vpop.f32.mrb[4].mxu0 }
 0x116   :  { %v11503_v63 = vpop.f32.mrb[5].mxu0 }
 0x117   :  { %v343_v0 = vpop.f32.mrb[6].mxu0  ;;  %3010 = vmatpush1.bf16.msra.mxu0 %v11488_v58 }
 0x118   :  { %v344_v3 = vpop.f32.mrb[7].mxu0  ;;  %3011 = vmatprep.subr.bf16.mxu0 %v11494_v60  ;;  %v8808_v0 = vld [vmem:[%s14556_s0 + $0x14] sm:$0xf] }
 0x119   :  { %1010 = vmatmul.mubr.bf16.vlgmr.msra.gmra.mrb[4].mxu1 %v8808_v0  ;;  %v11078_v0 = vld [vmem:[%s14555_s1 + $0x40] ss:$8 sps:$4 sm:$0xff]  }
 0x11a   :  { %1314 = vmatpush1.bf16.msra.mxu1 %v11070_v26  ;;  %1345 = vmatprep.mubr.bf16.mxu1 %v14563_v1  ;;  %v11081_v26 = vld [vmem:[%s14555_s1 + $0x64] ss:$8 sps:$4 sm:$0xff]  }
 0x11b   :  { %3012 = vmatpush1.bf16.msra.mxu0 %v11501_v62 }
 0x11c   :  { %3013 = vmatprep.subr.bf16.mxu0 %v11512_v4 }
 0x11f   :  { %3014 = vmatpush1.bf16.msra.mxu0 %v11517_v5 }
 0x120   :  { %3015 = vmatprep.subr.bf16.mxu0 %v11532_v8 }
 0x123   :  { %3016 = vmatpush1.bf16.msra.mxu0 %v11537_v9 }
 0x124   :  { %3017 = vmatprep.subr.bf16.mxu0 %v11546_v11 }
 0x127   :  { %3018 = vmatpush1.bf16.msra.mxu0 %v11551_v12 }
 0x128   :  { %3019 = vmatprep.subr.bf16.mxu0 %v11558_v14 }
 0x12b   :  { %3020 = vmatpush1.bf16.msra.mxu0 %v11563_v15 }
 0x12c   :  { %3021 = vmatprep.subr.bf16.mxu0 %v11570_v17 }
 0x12f   :  { %3022 = vmatpush1.bf16.msra.mxu0 %v11576_v18 }
 0x130   :  { %3023 = vmatprep.subr.bf16.mxu0 %v11581_v19 }
 0x133   :  { %3024 = vmatpush1.bf16.msra.mxu0 %v11588_v20 }
 0x134   :  { %3025 = vmatprep.subr.bf16.mxu0 %v11593_v21 }
 0x135   :  { %v11608_v24 = vpop.f32.mrb[8].mxu0 }
 0x136   :  { %v11615_v27 = vpop.f32.mrb[9].mxu0 }
 0x137   :  { %v511_v28 = vpop.f32.mrb[10].mxu0  ;;  %3026 = vmatpush1.bf16.msra.mxu0 %v11600_v22 }
 0x138   :  { %v512_v29 = vpop.f32.mrb[11].mxu0  ;;  %3027 = vmatprep.subr.bf16.mxu0 %v11606_v23  ;;  %v11071_v28 = vld [vmem:[%s14555_s1 + $0x14] ss:$8 sps:$4 sm:$0xff]  }
 0x139   :  { %1315 = vmatprep.subr.bf16.mxu1 %v11071_v28  ;;  %v11694_v29 = vsub.s32 0, %v11506_v2  ;;  %v11708_v2 = vld [vmem:[%s14558_s2] sm:$0x3] }
 0x13a   :  { %v10228_v28 = vld [vmem:[%s14557_s3 + $0x1c0] ss:$8 sps:$4 sm:$0xff]  }
 0x13b   :  { %3028 = vmatpush1.bf16.msra.mxu0 %v11613_v25 }
 0x13c   :  { %3029 = vmatprep.subr.bf16.mxu0 %v11622_v30 }
 0x13f   :  { %3030 = vmatpush1.bf16.msra.mxu0 %v11627_v32 }
 0x140   :  { %3040 = vmatprep.subr.bf16.mxu0 %v10179_v33  ;;  %v10218_v33 = vld [vmem:[%s14557_s3 + $0x184] ss:$8 sps:$4 sm:$0xff]  }
 0x142   :  { %3032 = vmatmul.mubr.bf16.vlgmr.msra.gmra.mrb[32].mxu0 %v8971_v36  ;;  %v50_v36 = vrot.slane %v11522_v6, %v11694_v29  ;;  %v11075_v6 = vld [vmem:[%s14555_s1 + $0x34] ss:$8 sps:$4 sm:$0xff]  }
 0x143   :  { %3041 = vmatpush1.bf16.msra.mxu0 %v10177_v34  ;;  %3072 = vmatprep.mubr.bf16.mxu0 %v9973_v38  ;;  %v11072_v34 = vld [vmem:[%s14555_s1 + $0x10] ss:$8 sps:$4 sm:$0xff]   ;;  %v222_v38 = vrot.slane %v11708_v2, %v11526_v7 }
 0x144   :  { %3042 = vmatprep.subr.bf16.mxu0 %v10185_v37  ;;  %1316 = vmatpush1.bf16.msra.mxu1 %v11072_v34  ;;  %v10216_v37 = vld [vmem:[%s14557_s3 + $0x180] ss:$8 sps:$4 sm:$0xff]   ;;  %v11083_v34 = vld [vmem:[%s14555_s1 + $0x74] ss:$8 sps:$4 sm:$0xff]  }
 0x145   :  { %1317 = vmatprep.subr.bf16.mxu1 %v11073_v35  ;;  %v10231_v35 = vld [vmem:[%s14557_s3 + $0x1d0] ss:$8 sps:$4 sm:$0xff]  }
 0x147   :  { %3043 = vmatpush1.bf16.msra.mxu0 %v10183_v39  ;;  %v10221_v39 = vld [vmem:[%s14557_s3 + $0x194] ss:$8 sps:$4 sm:$0xff]  }
 0x148   :  { %3044 = vmatprep.subr.bf16.mxu0 %v10191_v40  ;;  %v11074_v40 = vld [vmem:[%s14555_s1 + $0x20] ss:$8 sps:$4 sm:$0xff]  }
 0x149   :  { %1318 = vmatpush1.bf16.msra.mxu1 %v11074_v40 }
 0x14a   :  { %1319 = vmatprep.subr.bf16.mxu1 %v11075_v6 }
 0x14b   :  { %3045 = vmatpush1.bf16.msra.mxu0 %v10189_v42  ;;  %v172_v42 = vadd.f32 %v11419_v41, %v50_v36  ;;  %v11077_v41 = vld [vmem:[%s14555_s1 + $0x44] ss:$8 sps:$4 sm:$0xff]  }
 0x14c   :  { %3046 = vmatprep.subr.bf16.mxu0 %v10197_v43  ;;  %v10219_v43 = vld [vmem:[%s14557_s3 + $0x190] ss:$8 sps:$4 sm:$0xff]   ;;  %v10236_v36 = vld [vmem:[%s14557_s3 + $0x1e4] ss:$8 sps:$4 sm:$0xff]  }
 0x14f   :  { %3047 = vmatpush1.bf16.msra.mxu0 %v10195_v44  ;;  %v342_v44 = vadd.f32 %v11503_v63, %v222_v38  ;;  %v10222_v63 = vld [vmem:[%s14557_s3 + $0x1a0] ss:$8 sps:$4 sm:$0xff]  }
 0x150   :  { %3048 = vmatprep.subr.bf16.mxu0 %v10203_v45  ;;  %v10224_v45 = vld [vmem:[%s14557_s3 + $0x1a4] ss:$8 sps:$4 sm:$0xff]  }
 0x153   :  { %3049 = vmatpush1.bf16.msra.mxu0 %v10201_v46  ;;  %v11076_v46 = vld [vmem:[%s14555_s1 + $0x30] ss:$8 sps:$4 sm:$0xff]  }
 0x154   :  { %3050 = vmatprep.subr.bf16.mxu0 %v10209_v47  ;;  %1320 = vmatpush1.bf16.msra.mxu1 %v11076_v46  ;;  %v178_v47 = vmul.f32 0.5, %v172_v42  ;;  %v10239_v46 = vld [vmem:[%s14557_s3 + $0x1f4] ss:$8 sps:$4 sm:$0xff]  }
 0x155   :  { %v11673_v50 = vpop.f32.mrb[12].mxu0  ;;  %1321 = vmatprep.subr.bf16.mxu1 %v11077_v41 }
 0x156   :  { %v11675_v59 = vpop.f32.mrb[13].mxu0  ;;  %10988 = vtanh.f32 %v178_v47  ;;  %v10237_v47 = vld [vmem:[%s14557_s3 + $0x1f0] ss:$8 sps:$4 sm:$0xff]  }
 0x157   :  { %v847_v3 = vpop.f32.mrb[14].mxu0  ;;  %3051 = vmatpush1.bf16.msra.mxu0 %v10207_v48  ;;  %v347_v48 = vmul.f32 0.5, %v342_v44 }
 0x158   :  { %v848_v13 = vpop.f32.mrb[15].mxu0  ;;  %3052 = vmatprep.subr.bf16.mxu0 %v10212_v49  ;;  %v10227_v49 = vld [vmem:[%s14557_s3 + $0x1b4] ss:$8 sps:$4 sm:$0xff]   ;;  %1322 = vmatpush1.bf16.msra.mxu1 %v11078_v0  ;;  %v10240_v0 = vld [vmem:[%s14557_s3 + $0x200] ss:$8 sps:$4 sm:$0xff]  }
 0x159   :  { %v11079_v3 = vld [vmem:[%s14555_s1 + $0x54] ss:$8 sps:$4 sm:$0xff]   ;;  %10990 = vtanh.f32 %v347_v48  ;;  %v10230_v13 = vld [vmem:[%s14557_s3 + $0x1c4] ss:$8 sps:$4 sm:$0xff]  }
 0x15a   :  { %1323 = vmatprep.subr.bf16.mxu1 %v11079_v3  ;;  %v10242_v48 = vld [vmem:[%s14557_s3 + $0x204] ss:$8 sps:$4 sm:$0xff]  }
 0x15b   :  { %3053 = vmatpush1.bf16.msra.mxu0 %v10210_v10  ;;  %v10225_v10 = vld [vmem:[%s14557_s3 + $0x1b0] ss:$8 sps:$4 sm:$0xff]  }
 0x15c   :  { %3054 = vmatprep.subr.bf16.mxu0 %v10215_v16  ;;  %v11080_v16 = vld [vmem:[%s14555_s1 + $0x50] ss:$8 sps:$4 sm:$0xff]  }
 0x15d   :  { %1324 = vmatpush1.bf16.msra.mxu1 %v11080_v16  ;;  %v10243_v16 = vld [vmem:[%s14557_s3 + $0x210] ss:$8 sps:$4 sm:$0xff]  }
 0x15e   :  { %1325 = vmatprep.subr.bf16.mxu1 %v11081_v26  ;;  %v10248_v26 = vld [vmem:[%s14557_s3 + $0x224] ss:$8 sps:$4 sm:$0xff]  }
 0x15f   :  { %3055 = vmatpush1.bf16.msra.mxu0 %v10213_v31  ;;  %v10233_v31 = vld [vmem:[%s14557_s3 + $0x1d4] ss:$8 sps:$4 sm:$0xff]  }
 0x160   :  { %3056 = vmatprep.subr.bf16.mxu0 %v10218_v33  ;;  %v11082_v33 = vld [vmem:[%s14555_s1 + $0x60] ss:$8 sps:$4 sm:$0xff]   ;;  %v10989_v38 = vpop.eup %10988 }
 0x161   :  { %1326 = vmatpush1.bf16.msra.mxu1 %v11082_v33  ;;  %v182_v44 = vmul.f32 0.5, %v10989_v38  ;;  %v10249_v33 = vld [vmem:[%s14557_s3 + $0x230] ss:$8 sps:$4 sm:$0xff]   ;;  %v11845_v38 = vld [vmem:[%s14555_s1 + $0x4] ss:$8 sps:$4 sm:$0xff]  }
 0x162   :  { %1327 = vmatprep.subr.bf16.mxu1 %v11083_v34  ;;  %v10254_v34 = vld [vmem:[%s14557_s3 + $0x244] ss:$8 sps:$4 sm:$0xff]  }
 0x163   :  { %3057 = vmatpush1.bf16.msra.mxu0 %v10216_v37  ;;  %v11084_v37 = vld [vmem:[%s14555_s1 + $0x70] ss:$8 sps:$4 sm:$0xff]   ;;  %v10991_v40 = vpop.eup %10990 }
 0x164   :  { %3058 = vmatprep.subr.bf16.mxu0 %v10221_v39  ;;  %v351_v41 = vmul.f32 0.5, %v10991_v40  ;;  %v10257_v40 = vld [vmem:[%s14557_s3 + $0x254] ss:$8 sps:$4 sm:$0xff]  }
 0x165   :  { %1328 = vmatpush1.bf16.msra.mxu1 %v11084_v37  ;;  %v11840_v37 = vld [vmem:[%s14555_s1] ss:$8 sps:$4 sm:$0xff]  }
 0x166   :  { %1649 = vmatprep.subr.bf16.mxu1 %v11845_v38 }
 0x167   :  { %3059 = vmatpush1.bf16.msra.mxu0 %v10219_v43  ;;  %v10234_v43 = vld [vmem:[%s14557_s3 + $0x1e0] ss:$8 sps:$4 sm:$0xff]  }
 0x168   :  { %3060 = vmatprep.subr.bf16.mxu0 %v10224_v45 }
 0x16b   :  { %3061 = vmatpush1.bf16.msra.mxu0 %v10222_v63  ;;  %v184_v63 = vadd.f32 0.5, %v182_v44  ;;  %v11864_v44 = vld [vmem:[%s14555_s1 + $0x14] ss:$8 sps:$4 sm:$0xff]  }
 0x16c   :  { %3062 = vmatprep.subr.bf16.mxu0 %v10227_v49  ;;  %v353_v49 = vadd.f32 0.5, %v351_v41 }
 0x16d   :  { %v9972_v3 = vpack.c.bf16 %v184_v63, %v184_v63 }
 0x16f   :  { %3063 = vmatpush1.bf16.msra.mxu0 %v10225_v10  ;;  %v10245_v10 = vld [vmem:[%s14557_s3 + $0x214] ss:$8 sps:$4 sm:$0xff]  }
 0x170   :  { %3064 = vmatprep.subr.bf16.mxu0 %v10230_v13  ;;  %v11810_v13 = vpack.c.bf16 %v353_v49, %v353_v49  ;;  %v11886_v49 = vld [vmem:[%s14555_s1 + $0x24] ss:$8 sps:$4 sm:$0xff]  }
 0x173   :  { %3065 = vmatpush1.bf16.msra.mxu0 %v10228_v28  ;;  %v10246_v28 = vld [vmem:[%s14557_s3 + $0x220] ss:$8 sps:$4 sm:$0xff]  }
 0x174   :  { %3066 = vmatprep.subr.bf16.mxu0 %v10233_v31  ;;  %v10251_v31 = vld [vmem:[%s14557_s3 + $0x234] ss:$8 sps:$4 sm:$0xff]  }
 0x175   :  { %v11788_v39 = vpop.f32.mrb[16].mxu0 }
 0x176   :  { %14624 = vst [vmem:[#allocation3_spill] sm:$0xff] %v11788_v39  ;;  %v11790_v6 = vpop.f32.mrb[17].mxu0  ;;  %v14629_v39 = vmov 0  }
 0x177   :  { %14625 = vst [vmem:[#allocation4_spill] sm:$0xff] %v11790_v6  ;;  %v1183_v42 = vpop.f32.mrb[18].mxu0  ;;  %3067 = vmatpush1.bf16.msra.mxu0 %v10231_v35  ;;  %v10252_v35 = vld [vmem:[%s14557_s3 + $0x240] ss:$8 sps:$4 sm:$0xff]  }
 0x178   :  { %v1184_v45 = vpop.f32.mrb[19].mxu0  ;;  %3068 = vmatprep.subr.bf16.mxu0 %v10236_v36  ;;  %v8844_v36 = vld [vmem:[%s14556_s0 + $0x1c] sm:$0xf]  ;;  %v10255_v42 = vld [vmem:[%s14557_s3 + $0x250] ss:$8 sps:$4 sm:$0xff]  }
 0x179   :  { %1346 = vmatmul.mubr.bf16.vlgmr.msra.gmra.mrb[8].mxu1 %v8844_v36  ;;  %v10260_v45 = vld [vmem:[%s14557_s3 + $0x264] ss:$8 sps:$4 sm:$0xff]   ;;  %v10282_v6 = vld [vmem:[%s14557_s3 + $0x2e0] ss:$8 sps:$4 sm:$0xff]  }
 0x17a   :  { %1681 = vmatprep.mubr.bf16.mxu1 %v14563_v1  ;;  %1650 = vmatpush1.bf16.msra.mxu1 %v11840_v37  ;;  %v10281_v1 = vld [vmem:[%s14557_s3 + $0x2d4] ss:$8 sps:$4 sm:$0xff]  }
 0x17b   :  { %3069 = vmatpush1.bf16.msra.mxu0 %v10234_v43  ;;  %v11859_v43 = vld [vmem:[%s14555_s1 + $0x10] ss:$8 sps:$4 sm:$0xff]   ;;  %1651 = vmatprep.subr.bf16.mxu1 %v11864_v44 }
 0x17c   :  { %3070 = vmatprep.subr.bf16.mxu0 %v10239_v46 }
 0x17e   :  { %1652 = vmatpush1.bf16.msra.mxu1 %v11859_v43 }
 0x17f   :  { %3071 = vmatpush1.bf16.msra.mxu0 %v10237_v47  ;;  %v10258_v47 = vld [vmem:[%s14557_s3 + $0x260] ss:$8 sps:$4 sm:$0xff]   ;;  %1653 = vmatprep.subr.bf16.mxu1 %v11886_v49 }
 0x180   :  { %3081 = vmatprep.subr.bf16.mxu0 %v10242_v48  ;;  %v11881_v48 = vld [vmem:[%s14555_s1 + $0x20] ss:$8 sps:$4 sm:$0xff]  }
 0x182   :  { %3073 = vmatmul.mubr.bf16.vlgmr.msra.gmra.mrb[32].mxu0 %v9972_v3  ;;  %v10263_v3 = vld [vmem:[%s14557_s3 + $0x274] ss:$8 sps:$4 sm:$0xff]   ;;  %1654 = vmatpush1.bf16.msra.mxu1 %v11881_v48 }
 0x183   :  { %3082 = vmatpush1.bf16.msra.mxu0 %v10240_v0  ;;  %3113 = vmatprep.mubr.bf16.mxu0 %v11810_v13 }
 0x184   :  { %3083 = vmatprep.subr.bf16.mxu0 %v10245_v10  ;;  %v10261_v10 = vld [vmem:[%s14557_s3 + $0x270] ss:$8 sps:$4 sm:$0xff]  }
 0x187   :  { %3084 = vmatpush1.bf16.msra.mxu0 %v10243_v16  ;;  %v11899_v16 = vld [vmem:[%s14555_s1 + $0x30] ss:$8 sps:$4 sm:$0xff]  }
 0x188   :  { %3085 = vmatprep.subr.bf16.mxu0 %v10248_v26  ;;  %v11904_v26 = vld [vmem:[%s14555_s1 + $0x34] ss:$8 sps:$4 sm:$0xff]  }
 0x189   :  { %1655 = vmatprep.subr.bf16.mxu1 %v11904_v26 }
 0x18a   :  { %1656 = vmatpush1.bf16.msra.mxu1 %v11899_v16 }
 0x18b   :  { %3086 = vmatpush1.bf16.msra.mxu0 %v10246_v28  ;;  %v10266_v28 = vld [vmem:[%s14557_s3 + $0x284] ss:$8 sps:$4 sm:$0xff]  }
 0x18c   :  { %3087 = vmatprep.subr.bf16.mxu0 %v10251_v31  ;;  %v218_v31 = vrot.slane %v11708_v2, %v11694_v29  ;;  %v10269_v2 = vld [vmem:[%s14557_s3 + $0x294] ss:$8 sps:$4 sm:$0xff]  }
 0x18e   :  { %v340_v36 = vadd.f32 %v11496_v61, %v218_v31  ;;  %v10272_v61 = vld [vmem:[%s14557_s3 + $0x2a4] ss:$8 sps:$4 sm:$0xff]   ;;  %v11970_v31 = vpop.f32.mrb[0].mxu1 }
 0x18f   :  { %3088 = vmatpush1.bf16.msra.mxu0 %v10249_v33  ;;  %v10264_v33 = vld [vmem:[%s14557_s3 + $0x280] ss:$8 sps:$4 sm:$0xff]  }
 0x190   :  { %3089 = vmatprep.subr.bf16.mxu0 %v10254_v34  ;;  %v11919_v34 = vld [vmem:[%s14555_s1 + $0x40] ss:$8 sps:$4 sm:$0xff]  }
 0x193   :  { %3090 = vmatpush1.bf16.msra.mxu0 %v10252_v35  ;;  %v11924_v35 = vld [vmem:[%s14555_s1 + $0x44] ss:$8 sps:$4 sm:$0xff]  }
 0x194   :  { %3091 = vmatprep.subr.bf16.mxu0 %v10257_v40  ;;  %1657 = vmatprep.subr.bf16.mxu1 %v11924_v35  ;;  %v10267_v40 = vld [vmem:[%s14557_s3 + $0x290] ss:$8 sps:$4 sm:$0xff]  }
 0x195   :  { %v11869_v46 = vpop.f32.mrb[20].mxu0  ;;  %1658 = vmatpush1.bf16.msra.mxu1 %v11919_v34 }
 0x196   :  { %14626 = vst [vmem:[#allocation5_spill] sm:$0xff] %v11869_v46  ;;  %v11872_v41 = vpop.f32.mrb[21].mxu0 }
 0x197   :  { %14627 = vst [vmem:[#allocation6_spill] sm:$0xff] %v11872_v41  ;;  %v1519_v63 = vpop.f32.mrb[22].mxu0  ;;  %3092 = vmatpush1.bf16.msra.mxu0 %v10255_v42  ;;  %v11938_v42 = vld [vmem:[%s14555_s1 + $0x50] ss:$8 sps:$4 sm:$0xff]   ;;  %v10287_v41 = vld [vmem:[%s14557_s3 + $0x2f4] ss:$8 sps:$4 sm:$0xff]  }
 0x198   :  { %v1520_v0 = vpop.f32.mrb[23].mxu0  ;;  %3093 = vmatprep.subr.bf16.mxu0 %v10260_v45  ;;  %v11943_v45 = vld [vmem:[%s14555_s1 + $0x54] ss:$8 sps:$4 sm:$0xff]   ;;  %v10270_v63 = vld [vmem:[%s14557_s3 + $0x2a0] ss:$8 sps:$4 sm:$0xff]  }
 0x199   :  { %1659 = vmatprep.subr.bf16.mxu1 %v11943_v45  ;;  %v11956_v0 = vld [vmem:[%s14555_s1 + $0x60] ss:$8 sps:$4 sm:$0xff]  }
 0x19a   :  { %1660 = vmatpush1.bf16.msra.mxu1 %v11938_v42 }
 0x19b   :  { %3094 = vmatpush1.bf16.msra.mxu0 %v10258_v47  ;;  %v346_v47 = vmul.f32 0.5, %v340_v36  ;;  %v10278_v36 = vld [vmem:[%s14557_s3 + $0x2c4] ss:$8 sps:$4 sm:$0xff]  }
 0x19c   :  { %3095 = vmatprep.subr.bf16.mxu0 %v10263_v3  ;;  %v10275_v3 = vld [vmem:[%s14557_s3 + $0x2b4] ss:$8 sps:$4 sm:$0xff]  }
 0x19d   :  { %10992 = vtanh.f32 %v346_v47 }
 0x19f   :  { %3096 = vmatpush1.bf16.msra.mxu0 %v10261_v10  ;;  %v11964_v10 = vld [vmem:[%s14555_s1 + $0x64] ss:$8 sps:$4 sm:$0xff]  }
 0x1a0   :  { %3097 = vmatprep.subr.bf16.mxu0 %v10266_v28  ;;  %v10273_v28 = vld [vmem:[%s14557_s3 + $0x2b0] ss:$8 sps:$4 sm:$0xff]   ;;  %1661 = vmatprep.subr.bf16.mxu1 %v11964_v10 }
 0x1a1   :  { %1662 = vmatpush1.bf16.msra.mxu1 %v11956_v0 }
 0x1a3   :  { %3098 = vmatpush1.bf16.msra.mxu0 %v10264_v33  ;;  %v11976_v33 = vld [vmem:[%s14555_s1 + $0x70] ss:$8 sps:$4 sm:$0xff]  }
 0x1a4   :  { %3099 = vmatprep.subr.bf16.mxu0 %v10269_v2  ;;  %v11981_v2 = vld [vmem:[%s14555_s1 + $0x74] ss:$8 sps:$4 sm:$0xff]  }
 0x1a5   :  { %1663 = vmatprep.subr.bf16.mxu1 %v11981_v2 }
 0x1a6   :  { %1664 = vmatpush1.bf16.msra.mxu1 %v11976_v33 }
 0x1a7   :  { %3100 = vmatpush1.bf16.msra.mxu0 %v10267_v40  ;;  %v11986_v40 = vpop.f32.mrb[1].mxu1  ;;  %1985 = vmatprep.subr.bf16.mxu1 %v11845_v38 }
 0x1a8   :  { %3101 = vmatprep.subr.bf16.mxu0 %v10272_v61  ;;  %v679_v61 = vpop.f32.mrb[2].mxu1 }
 0x1a9   :  { %v680_v47 = vpop.f32.mrb[3].mxu1  ;;  %v10284_v61 = vld [vmem:[%s14557_s3 + $0x2e4] ss:$8 sps:$4 sm:$0xff]  }
 0x1ab   :  { %3102 = vmatpush1.bf16.msra.mxu0 %v10270_v63  ;;  %v10276_v63 = vld [vmem:[%s14557_s3 + $0x2c0] ss:$8 sps:$4 sm:$0xff]  }
 0x1ac   :  { %3103 = vmatprep.subr.bf16.mxu0 %v10275_v3  ;;  %v8880_v3 = vld [vmem:[%s14556_s0 + $0x24] sm:$0xf] }
 0x1ad   :  { %1682 = vmatmul.mubr.bf16.vlgmr.msra.gmra.mrb[12].mxu1 %v8880_v3 }
 0x1ae   :  { %1986 = vmatpush1.bf16.msra.mxu1 %v11840_v37  ;;  %2017 = vmatprep.mubr.bf16.mxu1 %v14629_v39 }
 0x1af   :  { %3104 = vmatpush1.bf16.msra.mxu0 %v10273_v28  ;;  %v10279_v28 = vld [vmem:[%s14557_s3 + $0x2d0] ss:$8 sps:$4 sm:$0xff]   ;;  %1987 = vmatprep.subr.bf16.mxu1 %v11864_v44 }
 0x1b0   :  { %3105 = vmatprep.subr.bf16.mxu0 %v10278_v36  ;;  %v10993_v36 = vpop.eup %10992 }
 0x1b2   :  { %1988 = vmatpush1.bf16.msra.mxu1 %v11859_v43 }
 0x1b3   :  { %3106 = vmatpush1.bf16.msra.mxu0 %v10276_v63  ;;  %1989 = vmatprep.subr.bf16.mxu1 %v11886_v49 }
 0x1b4   :  { %3107 = vmatprep.subr.bf16.mxu0 %v10281_v1  ;;  %v350_v1 = vmul.f32 0.5, %v10993_v36  ;;  %v11088_v36 = vld [vmem:[%s14557_s3 + $0x10] ss:$8 sps:$4 sm:$0xff]  }
 0x1b5   :  { %v12008_v47 = vpop.f32.mrb[24].mxu0 }
 0x1b6   :  { %14628 = vst [vmem:[#allocation7_spill] sm:$0xff] %v12008_v47  ;;  %v12011_v3 = vpop.f32.mrb[25].mxu0  ;;  %1990 = vmatpush1.bf16.msra.mxu1 %v11881_v48 }
 0x1b7   :  { %14630 = vst [vmem:[#allocation8_spill] sm:$0xff] %v12011_v3  ;;  %v1855_v63 = vpop.f32.mrb[26].mxu0  ;;  %3108 = vmatpush1.bf16.msra.mxu0 %v10279_v28  ;;  %v10285_v28 = vld [vmem:[%s14557_s3 + $0x2f0] ss:$8 sps:$4 sm:$0xff]   ;;  %1991 = vmatprep.subr.bf16.mxu1 %v11904_v26 }
 0x1b8   :  { %v1856_v46 = vpop.f32.mrb[27].mxu0  ;;  %3109 = vmatprep.subr.bf16.mxu0 %v10284_v61  ;;  %v352_v63 = vadd.f32 0.5, %v350_v1  ;;  %v11085_v61 = vld [vmem:[%s14557_s3 + $0x4] ss:$8 sps:$4 sm:$0xff]   ;;  %v10443_v1 = vld [vmem:[%s14559_s5 + $0x58] sm:$0xff]  }
 0x1ba   :  { %1992 = vmatpush1.bf16.msra.mxu1 %v11899_v16  ;;  %v12027_v46 = vpack.c.bf16 %v352_v63, %v352_v63 }
 0x1bb   :  { %3110 = vmatpush1.bf16.msra.mxu0 %v10282_v6  ;;  %1993 = vmatprep.subr.bf16.mxu1 %v11924_v35  ;;  %v11086_v6 = vld [vmem:[%s14557_s3] ss:$8 sps:$4 sm:$0xff]  }
 0x1bc   :  { %3111 = vmatprep.subr.bf16.mxu0 %v10287_v41  ;;  %v11087_v41 = vld [vmem:[%s14557_s3 + $0x14] ss:$8 sps:$4 sm:$0xff]  }
 0x1be   :  { %1994 = vmatpush1.bf16.msra.mxu1 %v11919_v34 }
 0x1bf   :  { %3112 = vmatpush1.bf16.msra.mxu0 %v10285_v28  ;;  %1995 = vmatprep.subr.bf16.mxu1 %v11943_v45  ;;  %v10335_v28 = vld [vmem:[%s14557_s3 + $0x94] ss:$8 sps:$4 sm:$0xff]  }
 0x1c0   :  { %3903 = vmatprep.subr.bf16.mxu0 %v11085_v61  ;;  %v10341_v61 = vld [vmem:[%s14557_s3 + $0xa4] ss:$8 sps:$4 sm:$0xff]  }
 0x1c2   :  { %3114 = vmatmul.mubr.bf16.vlgmr.msra.gmra.mrb[32].mxu0 %v12027_v46  ;;  %1996 = vmatpush1.bf16.msra.mxu1 %v11938_v42 }
 0x1c3   :  { %3904 = vmatpush1.bf16.msra.mxu0 %v11086_v6  ;;  %3935 = vmatprep.mubr.bf16.mxu0 %v11810_v13  ;;  %v10305_v13 = vld [vmem:[%s14557_s3 + $0x44] ss:$8 sps:$4 sm:$0xff]  }
 0x1c4   :  { %3905 = vmatprep.subr.bf16.mxu0 %v11087_v41  ;;  %1997 = vmatprep.subr.bf16.mxu1 %v11964_v10  ;;  %v10447_v41 = vld [vmem:[%s14559_s5 + $0x60] sm:$0xff]  }
 0x1c6   :  { %1998 = vmatpush1.bf16.msra.mxu1 %v11956_v0 }
 0x1c7   :  { %3906 = vmatpush1.bf16.msra.mxu0 %v11088_v36  ;;  %1999 = vmatprep.subr.bf16.mxu1 %v11981_v2  ;;  %v10339_v36 = vld [vmem:[%s14557_s3 + $0xa0] ss:$8 sps:$4 sm:$0xff]  }
 0x1c8   :  { %3907 = vmatprep.subr.bf16.mxu0 %v11447_v51  ;;  %v8916_v51 = vld [vmem:[%s14556_s0 + $0x2c] sm:$0xf] }
 0x1ca   :  { %2000 = vmatpush1.bf16.msra.mxu1 %v11976_v33 }
 0x1cb   :  { %3908 = vmatpush1.bf16.msra.mxu0 %v11452_v52  ;;  %2321 = vmatprep.subr.bf16.mxu1 %v11845_v38  ;;  %v10303_v38 = vld [vmem:[%s14557_s3 + $0x40] ss:$8 sps:$4 sm:$0xff]  }
 0x1cc   :  { %3909 = vmatprep.subr.bf16.mxu0 %v11458_v53 }
 0x1cd   :  { %2018 = vmatmul.mubr.bf16.vlgmr.msra.gmra.mrb[16].mxu1 %v8916_v51  ;;  %v10347_v51 = vld [vmem:[%s14557_s3 + $0xb4] ss:$8 sps:$4 sm:$0xff]  }
 0x1ce   :  { %2322 = vmatpush1.bf16.msra.mxu1 %v11840_v37  ;;  %2353 = vmatprep.mubr.bf16.mxu1 %v14629_v39  ;;  %v10423_v37 = vld [vmem:[%s14559_s5 + $0x30] sm:$0xff]  }
 0x1cf   :  { %3910 = vmatpush1.bf16.msra.mxu0 %v11464_v54  ;;  %2323 = vmatprep.subr.bf16.mxu1 %v11864_v44  ;;  %v10427_v44 = vld [vmem:[%s14559_s5 + $0x38] sm:$0xff]  }
 0x1d0   :  { %3911 = vmatprep.subr.bf16.mxu0 %v11469_v55 }
 0x1d2   :  { %2324 = vmatpush1.bf16.msra.mxu1 %v11859_v43  ;;  %v10311_v43 = vld [vmem:[%s14557_s3 + $0x54] ss:$8 sps:$4 sm:$0xff]  }
 0x1d3   :  { %3912 = vmatpush1.bf16.msra.mxu0 %v11476_v56  ;;  %2325 = vmatprep.subr.bf16.mxu1 %v11886_v49  ;;  %v12077_v56 = vld [vmem:[%s14558_s2] sm:$0x3] }
 0x1d4   :  { %3913 = vmatprep.subr.bf16.mxu0 %v11481_v57  ;;  %v558_v57 = vrot.slane %v12077_v56, %v11526_v7  ;;  %v10431_v49 = vld [vmem:[%s14559_s5 + $0x40] sm:$0xff]  }
 0x1d5   :  { %v12063_v52 = vpop.f32.mrb[28].mxu0 }
 0x1d6   :  { %14631 = vst [vmem:[#allocation9_spill] sm:$0xff] %v12063_v52  ;;  %v12067_v53 = vpop.f32.mrb[29].mxu0  ;;  %2326 = vmatpush1.bf16.msra.mxu1 %v11881_v48  ;;  %v10309_v48 = vld [vmem:[%s14557_s3 + $0x50] ss:$8 sps:$4 sm:$0xff]  }
 0x1d7   :  { %14632 = vst [vmem:[#allocation10_spill] sm:$0xff] %v12067_v53  ;;  %v2191_v54 = vpop.f32.mrb[30].mxu0  ;;  %3914 = vmatpush1.bf16.msra.mxu0 %v11488_v58  ;;  %2327 = vmatprep.subr.bf16.mxu1 %v11904_v26  ;;  %v678_v58 = vadd.f32 %v11986_v40, %v558_v57  ;;  %v10315_v26 = vld [vmem:[%s14557_s3 + $0x60] ss:$8 sps:$4 sm:$0xff]   ;;  %v10350_v57 = vld [vmem:[%s14557_s3 + $0xc4] ss:$8 sps:$4 sm:$0xff]  }
 0x1d8   :  { %v2192_v55 = vpop.f32.mrb[31].mxu0  ;;  %3915 = vmatprep.subr.bf16.mxu0 %v11494_v60  ;;  %v12580_v53 = vld [vmem:[%s14557_s3 + $0x250] ss:$8 sps:$4 sm:$0xff]  }
 0x1d9   :  { %v683_v60 = vmul.f32 0.5, %v678_v58  ;;  %v10362_v55 = vld [vmem:[%s14557_s3 + $0x104] ss:$8 sps:$4 sm:$0xff]   ;;  %14639 = vst [vmem:[#allocation17_spill] sm:$0xff] %v12580_v53 }
 0x1da   :  { %2328 = vmatpush1.bf16.msra.mxu1 %v11899_v16  ;;  %v10317_v16 = vld [vmem:[%s14557_s3 + $0x64] ss:$8 sps:$4 sm:$0xff]  }
 0x1db   :  { %3916 = vmatpush1.bf16.msra.mxu0 %v11501_v62  ;;  %2329 = vmatprep.subr.bf16.mxu1 %v11924_v35  ;;  %10994 = vtanh.f32 %v683_v60  ;;  %v8952_v62 = vld [vmem:[%s14556_s0 + $0x34] sm:$0xf] }
 0x1dc   :  { %3917 = vmatprep.subr.bf16.mxu0 %v11512_v4  ;;  %v10399_v4 = vld [vmem:[%s14559_s5] sm:$0xff]   ;;  %v10323_v35 = vld [vmem:[%s14557_s3 + $0x74] ss:$8 sps:$4 sm:$0xff]  }
 0x1de   :  { %2330 = vmatpush1.bf16.msra.mxu1 %v11919_v34  ;;  %v10435_v34 = vld [vmem:[%s14559_s5 + $0x48] sm:$0xff]  }
 0x1df   :  { %3918 = vmatpush1.bf16.msra.mxu0 %v11517_v5  ;;  %2331 = vmatprep.subr.bf16.mxu1 %v11943_v45  ;;  %v12209_v45 = vld [vmem:[%s14558_s2] sm:$0x3] }
 0x1e0   :  { %3919 = vmatprep.subr.bf16.mxu0 %v11532_v8  ;;  %v726_v40 = vrot.slane %v12209_v45, %v11526_v7 }
 0x1e2   :  { %2332 = vmatpush1.bf16.msra.mxu1 %v11938_v42  ;;  %v10321_v42 = vld [vmem:[%s14557_s3 + $0x70] ss:$8 sps:$4 sm:$0xff]   ;;  %v846_v6 = vadd.f32 %v11675_v59, %v726_v40  ;;  %v10451_v59 = vld [vmem:[%s14559_s5 + $0x68] sm:$0xff]  }
 0x1e3   :  { %3920 = vmatpush1.bf16.msra.mxu0 %v11537_v9  ;;  %2333 = vmatprep.subr.bf16.mxu1 %v11964_v10  ;;  %v10403_v9 = vld [vmem:[%s14559_s5 + $0x8] sm:$0xff]  }
 0x1e4   :  { %3921 = vmatprep.subr.bf16.mxu0 %v11546_v11  ;;  %v10290_v11 = vld [vmem:[%s14557_s3 + $0x4] ss:$8 sps:$4 sm:$0xff]   ;;  %v851_v54 = vmul.f32 0.5, %v846_v6 }
 0x1e5   :  { %v10995_v5 = vpop.eup %10994  ;;  %v10329_v10 = vld [vmem:[%s14557_s3 + $0x84] ss:$8 sps:$4 sm:$0xff]  }
 0x1e6   :  { %2334 = vmatpush1.bf16.msra.mxu1 %v11956_v0  ;;  %v687_v8 = vmul.f32 0.5, %v10995_v5  ;;  %v10439_v0 = vld [vmem:[%s14559_s5 + $0x50] sm:$0xff]   ;;  %v10348_v5 = vld [vmem:[%s14557_s3 + $0xc0] ss:$8 sps:$4 sm:$0xff]  }
 0x1e7   :  { %3922 = vmatpush1.bf16.msra.mxu0 %v11551_v12  ;;  %2335 = vmatprep.subr.bf16.mxu1 %v11981_v2  ;;  %v10327_v2 = vld [vmem:[%s14557_s3 + $0x80] ss:$8 sps:$4 sm:$0xff]  }
 0x1e8   :  { %3923 = vmatprep.subr.bf16.mxu0 %v11558_v14  ;;  %v689_v12 = vadd.f32 0.5, %v687_v8  ;;  %v10407_v14 = vld [vmem:[%s14559_s5 + $0x10] sm:$0xff]  }
 0x1e9   :  { %v10353_v8 = vld [vmem:[%s14557_s3 + $0xd4] ss:$8 sps:$4 sm:$0xff]  }
 0x1ea   :  { %2336 = vmatpush1.bf16.msra.mxu1 %v11976_v33  ;;  %v554_v33 = vrot.slane %v12077_v56, %v11694_v29  ;;  %v10345_v56 = vld [vmem:[%s14557_s3 + $0xb0] ss:$8 sps:$4 sm:$0xff]  }
 0x1eb   :  { %3924 = vmatpush1.bf16.msra.mxu0 %v11563_v15  ;;  %3249 = vmatprep.subr.bf16.mxu1 %v14629_v39  ;;  %v10288_v15 = vld [vmem:[%s14557_s3] ss:$8 sps:$4 sm:$0xff]  }
 0x1ec   :  { %3925 = vmatprep.subr.bf16.mxu0 %v11570_v17  ;;  %v12133_v17 = vpack.c.bf16 %v689_v12, %v689_v12  ;;  %v676_v63 = vadd.f32 %v11970_v31, %v554_v33  ;;  %v12263_v58 = vpop.f32.mrb[4].mxu1  ;;  %v10356_v12 = vld [vmem:[%s14557_s3 + $0xe4] ss:$8 sps:$4 sm:$0xff]   ;;  %v12382_v33 = vld [vmem:[%s14558_s2] sm:$0x3] }
 0x1ed   :  { %2354 = vmatmul.mubr.bf16.vlgmr.msra.gmra.mrb[20].mxu1 %v8952_v62  ;;  %v12265_v60 = vpop.f32.mrb[5].mxu1  ;;  %v894_v40 = vrot.slane %v12382_v33, %v11526_v7 }
 0x1ee   :  { %3250 = vmatpush1.bf16.msra.mxu1 %v10399_v4  ;;  %v682_v31 = vmul.f32 0.5, %v676_v63  ;;  %v1015_v62 = vpop.f32.mrb[6].mxu1  ;;  %v12404_v63 = vld [vmem:[%s14557_s3 + $0x194] ss:$8 sps:$4 sm:$0xff]  }
 0x1ef   :  { %3926 = vmatpush1.bf16.msra.mxu0 %v11576_v18  ;;  %3251 = vmatprep.subr.bf16.mxu1 %v14629_v39  ;;  %v10411_v18 = vld [vmem:[%s14559_s5 + $0x18] sm:$0xff]   ;;  %v1016_v4 = vpop.f32.mrb[7].mxu1 }
 0x1f0   :  { %3927 = vmatprep.subr.bf16.mxu0 %v11581_v19  ;;  %v10293_v19 = vld [vmem:[%s14557_s3 + $0x14] ss:$8 sps:$4 sm:$0xff]   ;;  %10996 = vtanh.f32 %v682_v31  ;;  %v12464_v4 = vld [vmem:[%s14557_s3 + $0x1d0] ss:$8 sps:$4 sm:$0xff]  }
 0x1f1   :  { %10998 = vtanh.f32 %v851_v54  ;;  %v12458_v62 = vld [vmem:[%s14557_s3 + $0x1d4] ss:$8 sps:$4 sm:$0xff]  }
 0x1f2   :  { %3252 = vmatpush1.bf16.msra.mxu1 %v10403_v9  ;;  %v10351_v9 = vld [vmem:[%s14557_s3 + $0xd0] ss:$8 sps:$4 sm:$0xff]  }
 0x1f3   :  { %3928 = vmatpush1.bf16.msra.mxu0 %v11588_v20  ;;  %3253 = vmatprep.subr.bf16.mxu1 %v14629_v39  ;;  %v10291_v20 = vld [vmem:[%s14557_s3 + $0x10] ss:$8 sps:$4 sm:$0xff]  }
 0x1f4   :  { %3929 = vmatprep.subr.bf16.mxu0 %v11593_v21  ;;  %v10296_v21 = vld [vmem:[%s14557_s3 + $0x24] ss:$8 sps:$4 sm:$0xff]  }
 0x1f6   :  { %3254 = vmatpush1.bf16.msra.mxu1 %v10407_v14 }
 0x1f7   :  { %3930 = vmatpush1.bf16.msra.mxu0 %v11600_v22  ;;  %3255 = vmatprep.subr.bf16.mxu1 %v14629_v39  ;;  %v10415_v22 = vld [vmem:[%s14559_s5 + $0x20] sm:$0xff]  }
 0x1f8   :  { %3931 = vmatprep.subr.bf16.mxu0 %v11606_v23  ;;  %v10294_v23 = vld [vmem:[%s14557_s3 + $0x20] ss:$8 sps:$4 sm:$0xff]  }
 0x1fa   :  { %3256 = vmatpush1.bf16.msra.mxu1 %v10411_v18 }
 0x1fb   :  { %3932 = vmatpush1.bf16.msra.mxu0 %v11613_v25  ;;  %3257 = vmatprep.subr.bf16.mxu1 %v14629_v39  ;;  %v10299_v25 = vld [vmem:[%s14557_s3 + $0x34] ss:$8 sps:$4 sm:$0xff]  }
 0x1fc   :  { %3933 = vmatprep.subr.bf16.mxu0 %v11622_v30  ;;  %v10419_v30 = vld [vmem:[%s14559_s5 + $0x28] sm:$0xff]  }
 0x1fe   :  { %3258 = vmatpush1.bf16.msra.mxu1 %v10415_v22  ;;  %v10357_v22 = vld [vmem:[%s14557_s3 + $0xf0] ss:$8 sps:$4 sm:$0xff]  }
 0x1ff   :  { %3934 = vmatpush1.bf16.msra.mxu0 %v11627_v32  ;;  %3259 = vmatprep.subr.bf16.mxu1 %v14629_v39  ;;  %v10297_v32 = vld [vmem:[%s14557_s3 + $0x30] ss:$8 sps:$4 sm:$0xff]  }
 0x200   :  { %4807 = vmatprep.subr.bf16.mxu0 %v10290_v11  ;;  %v10997_v11 = vpop.eup %10996 }
 0x201   :  { %v686_v14 = vmul.f32 0.5, %v10997_v11  ;;  %v10999_v18 = vpop.eup %10998  ;;  %v12476_v11 = vld [vmem:[%s14557_s3 + $0x1e0] ss:$8 sps:$4 sm:$0xff]  }
 0x202   :  { %3936 = vmatmul.mubr.bf16.vlgmr.msra.gmra.mrb[36].mxu0 %v12027_v46  ;;  %3260 = vmatpush1.bf16.msra.mxu1 %v10419_v30  ;;  %v10333_v46 = vld [vmem:[%s14557_s3 + $0x90] ss:$8 sps:$4 sm:$0xff]   ;;  %v12293_v30 = vld [vmem:[%s14557_s3 + $0x100] ss:$8 sps:$4 sm:$0xff]  }
 0x203   :  { %4808 = vmatpush1.bf16.msra.mxu0 %v10288_v15  ;;  %4839 = vmatprep.mubr.bf16.mxu0 %v12133_v17  ;;  %v10354_v15 = vld [vmem:[%s14557_s3 + $0xe0] ss:$8 sps:$4 sm:$0xff]  }
 0x204   :  { %4809 = vmatprep.subr.bf16.mxu0 %v10293_v19  ;;  %3261 = vmatprep.subr.bf16.mxu1 %v14629_v39  ;;  %v10359_v19 = vld [vmem:[%s14557_s3 + $0xf4] ss:$8 sps:$4 sm:$0xff]  }
 0x206   :  { %3262 = vmatpush1.bf16.msra.mxu1 %v10423_v37  ;;  %v12303_v37 = vld [vmem:[%s14557_s3 + $0x110] ss:$8 sps:$4 sm:$0xff]  }
 0x207   :  { %4810 = vmatpush1.bf16.msra.mxu0 %v10291_v20  ;;  %3263 = vmatprep.subr.bf16.mxu1 %v14629_v39  ;;  %v855_v20 = vmul.f32 0.5, %v10999_v18  ;;  %v12488_v18 = vld [vmem:[%s14557_s3 + $0x1f0] ss:$8 sps:$4 sm:$0xff]  }
 0x208   :  { %4811 = vmatprep.subr.bf16.mxu0 %v10296_v21  ;;  %v688_v21 = vadd.f32 0.5, %v686_v14 }
 0x20a   :  { %3264 = vmatpush1.bf16.msra.mxu1 %v10427_v44  ;;  %v12321_v44 = vld [vmem:[%s14557_s3 + $0x134] ss:$8 sps:$4 sm:$0xff]  }
 0x20b   :  { %4812 = vmatpush1.bf16.msra.mxu0 %v10294_v23  ;;  %3265 = vmatprep.subr.bf16.mxu1 %v14629_v39  ;;  %v857_v23 = vadd.f32 0.5, %v855_v20 }
 0x20c   :  { %4813 = vmatprep.subr.bf16.mxu0 %v10299_v25  ;;  %v12288_v25 = vpack.c.bf16 %v688_v21, %v688_v21  ;;  %v12494_v21 = vld [vmem:[%s14557_s3 + $0x204] ss:$8 sps:$4 sm:$0xff]  }
 0x20e   :  { %3266 = vmatpush1.bf16.msra.mxu1 %v10431_v49  ;;  %14633 = vst [vmem:[#allocation11_spill] sm:$0xff] %v12288_v25  ;;  %v12335_v49 = vld [vmem:[%s14557_s3 + $0x144] ss:$8 sps:$4 sm:$0xff]  }
 0x20f   :  { %4814 = vmatpush1.bf16.msra.mxu0 %v10297_v32  ;;  %3267 = vmatprep.subr.bf16.mxu1 %v14629_v39  ;;  %v12298_v32 = vld [vmem:[%s14557_s3 + $0x114] ss:$8 sps:$4 sm:$0xff]  }
 0x210   :  { %4815 = vmatprep.subr.bf16.mxu0 %v10305_v13  ;;  %v9981_v13 = vpack.c.bf16 %v857_v23, %v857_v23 }
 0x212   :  { %3268 = vmatpush1.bf16.msra.mxu1 %v10435_v34  ;;  %v12353_v34 = vld [vmem:[%s14557_s3 + $0x150] ss:$8 sps:$4 sm:$0xff]  }
 0x213   :  { %4816 = vmatpush1.bf16.msra.mxu0 %v10303_v38  ;;  %3269 = vmatprep.subr.bf16.mxu1 %v14629_v39  ;;  %v12309_v38 = vld [vmem:[%s14557_s3 + $0x124] ss:$8 sps:$4 sm:$0xff]  }
 0x214   :  { %4817 = vmatprep.subr.bf16.mxu0 %v10311_v43  ;;  %v12316_v43 = vld [vmem:[%s14557_s3 + $0x120] ss:$8 sps:$4 sm:$0xff]  }
 0x216   :  { %3270 = vmatpush1.bf16.msra.mxu1 %v10439_v0  ;;  %v12371_v0 = vld [vmem:[%s14557_s3 + $0x174] ss:$8 sps:$4 sm:$0xff]  }
 0x217   :  { %4818 = vmatpush1.bf16.msra.mxu0 %v10309_v48  ;;  %3271 = vmatprep.subr.bf16.mxu1 %v14629_v39  ;;  %v12329_v48 = vld [vmem:[%s14557_s3 + $0x130] ss:$8 sps:$4 sm:$0xff]  }
 0x218   :  { %4819 = vmatprep.subr.bf16.mxu0 %v10317_v16  ;;  %v12341_v16 = vld [vmem:[%s14557_s3 + $0x140] ss:$8 sps:$4 sm:$0xff]  }
 0x21a   :  { %3272 = vmatpush1.bf16.msra.mxu1 %v10443_v1  ;;  %v722_v1 = vrot.slane %v12209_v45, %v11694_v29  ;;  %v12412_v45 = vld [vmem:[%s14557_s3 + $0x190] ss:$8 sps:$4 sm:$0xff]  }
 0x21b   :  { %4820 = vmatpush1.bf16.msra.mxu0 %v10315_v26  ;;  %3273 = vmatprep.subr.bf16.mxu1 %v14629_v39  ;;  %v12347_v26 = vld [vmem:[%s14557_s3 + $0x154] ss:$8 sps:$4 sm:$0xff]  }
 0x21c   :  { %4821 = vmatprep.subr.bf16.mxu0 %v10323_v35  ;;  %v12359_v35 = vld [vmem:[%s14557_s3 + $0x164] ss:$8 sps:$4 sm:$0xff]  }
 0x21e   :  { %3274 = vmatpush1.bf16.msra.mxu1 %v10447_v41  ;;  %v12420_v41 = vld [vmem:[%s14557_s3 + $0x1a4] ss:$8 sps:$4 sm:$0xff]  }
 0x21f   :  { %4822 = vmatpush1.bf16.msra.mxu0 %v10321_v42  ;;  %3275 = vmatprep.subr.bf16.mxu1 %v14629_v39  ;;  %v12365_v42 = vld [vmem:[%s14557_s3 + $0x160] ss:$8 sps:$4 sm:$0xff]  }
 0x220   :  { %4823 = vmatprep.subr.bf16.mxu0 %v10329_v10  ;;  %v12377_v10 = vld [vmem:[%s14557_s3 + $0x170] ss:$8 sps:$4 sm:$0xff]  }
 0x222   :  { %3276 = vmatpush1.bf16.msra.mxu1 %v10451_v59  ;;  %v12434_v59 = vld [vmem:[%s14557_s3 + $0x1b4] ss:$8 sps:$4 sm:$0xff]  }
 0x223   :  { %4824 = vmatpush1.bf16.msra.mxu0 %v10327_v2  ;;  %3944 = vmatprep.subr.bf16.mxu1 %v10362_v55  ;;  %v12388_v2 = vld [vmem:[%s14557_s3 + $0x184] ss:$8 sps:$4 sm:$0xff]  }
 0x224   :  { %4825 = vmatprep.subr.bf16.mxu0 %v10335_v28  ;;  %v12398_v28 = vld [vmem:[%s14557_s3 + $0x180] ss:$8 sps:$4 sm:$0xff]  }
 0x227   :  { %4826 = vmatpush1.bf16.msra.mxu0 %v10333_v46  ;;  %v1014_v46 = vadd.f32 %v12265_v60, %v894_v40  ;;  %v12452_v60 = vld [vmem:[%s14557_s3 + $0x1c0] ss:$8 sps:$4 sm:$0xff]   ;;  %v12508_v40 = vld [vmem:[%s14557_s3 + $0x214] ss:$8 sps:$4 sm:$0xff]  }
 0x228   :  { %4827 = vmatprep.subr.bf16.mxu0 %v10341_v61  ;;  %v844_v61 = vadd.f32 %v11673_v50, %v722_v1  ;;  %v12514_v1 = vld [vmem:[%s14557_s3 + $0x210] ss:$8 sps:$4 sm:$0xff]  }
 0x229   :  { %v1019_v31 = vmul.f32 0.5, %v1014_v46  ;;  %v12521_v46 = vld [vmem:[%s14557_s3 + $0x224] ss:$8 sps:$4 sm:$0xff]  }
 0x22a   :  { %v850_v50 = vmul.f32 0.5, %v844_v61 }
 0x22b   :  { %4828 = vmatpush1.bf16.msra.mxu0 %v10339_v36  ;;  %11000 = vtanh.f32 %v1019_v31 }
 0x22c   :  { %4829 = vmatprep.subr.bf16.mxu0 %v10347_v51  ;;  %v12428_v51 = vld [vmem:[%s14557_s3 + $0x1a0] ss:$8 sps:$4 sm:$0xff]   ;;  %11002 = vtanh.f32 %v850_v50 }
 0x22d   :  { %v12531_v50 = vld [vmem:[%s14557_s3 + $0x220] ss:$8 sps:$4 sm:$0xff]  }
 0x22f   :  { %4830 = vmatpush1.bf16.msra.mxu0 %v10345_v56  ;;  %v12440_v56 = vld [vmem:[%s14557_s3 + $0x1b0] ss:$8 sps:$4 sm:$0xff]  }
 0x230   :  { %4831 = vmatprep.subr.bf16.mxu0 %v10350_v57  ;;  %v12446_v57 = vld [vmem:[%s14557_s3 + $0x1c4] ss:$8 sps:$4 sm:$0xff]  }
 0x233   :  { %4832 = vmatpush1.bf16.msra.mxu0 %v10348_v5 }
 0x234   :  { %4833 = vmatprep.subr.bf16.mxu0 %v10353_v8  ;;  %v12470_v8 = vld [vmem:[%s14557_s3 + $0x1e4] ss:$8 sps:$4 sm:$0xff]  }
 0x235   :  { %v11001_v5 = vpop.eup %11000 }
 0x237   :  { %4834 = vmatpush1.bf16.msra.mxu0 %v10351_v9  ;;  %v11003_v9 = vpop.eup %11002 }
 0x238   :  { %4835 = vmatprep.subr.bf16.mxu0 %v10356_v12  ;;  %v1023_v12 = vmul.f32 0.5, %v11001_v5  ;;  %v854_v14 = vmul.f32 0.5, %v11003_v9  ;;  %v12542_v5 = vld [vmem:[%s14557_s3 + $0x234] ss:$8 sps:$4 sm:$0xff]  }
 0x23a   :  { %v856_v20 = vadd.f32 0.5, %v854_v14  ;;  %v12550_v14 = vld [vmem:[%s14557_s3 + $0x230] ss:$8 sps:$4 sm:$0xff]  }
 0x23b   :  { %4836 = vmatpush1.bf16.msra.mxu0 %v10354_v15  ;;  %v12482_v15 = vld [vmem:[%s14557_s3 + $0x1f4] ss:$8 sps:$4 sm:$0xff]  }
 0x23c   :  { %4837 = vmatprep.subr.bf16.mxu0 %v10359_v19  ;;  %v1025_v19 = vadd.f32 0.5, %v1023_v12 }
 0x23e   :  { %v12502_v23 = vpack.c.bf16 %v1025_v19, %v1025_v19  ;;  %v12556_v19 = vld [vmem:[%s14557_s3 + $0x244] ss:$8 sps:$4 sm:$0xff]  }
 0x23f   :  { %4838 = vmatpush1.bf16.msra.mxu0 %v10357_v22  ;;  %v12500_v22 = vld [vmem:[%s14557_s3 + $0x200] ss:$8 sps:$4 sm:$0xff]  }
 0x240   :  { %4848 = vmatprep.subr.bf16.mxu0 %v10362_v55  ;;  %14634 = vst [vmem:[#allocation12_spill] sm:$0xff] %v12502_v23 }
 0x242   :  { %4840 = vmatmul.mubr.bf16.vlgmr.msra.gmra.mrb[40].mxu0 %v12288_v25 }
 0x243   :  { %4849 = vmatpush1.bf16.msra.mxu0 %v12293_v30  ;;  %4880 = vmatprep.mubr.bf16.mxu0 %v9981_v13  ;;  %v9980_v13 = vpack.c.bf16 %v856_v20, %v856_v20 }
 0x244   :  { %4850 = vmatprep.subr.bf16.mxu0 %v12298_v32 }
 0x247   :  { %4851 = vmatpush1.bf16.msra.mxu0 %v12303_v37 }
 0x248   :  { %4852 = vmatprep.subr.bf16.mxu0 %v12309_v38 }
 0x24b   :  { %4853 = vmatpush1.bf16.msra.mxu0 %v12316_v43 }
 0x24c   :  { %4854 = vmatprep.subr.bf16.mxu0 %v12321_v44  ;;  %v12414_v6 = vpop.f32.mrb[8].mxu1 }
 0x24d   :  { %v12422_v36 = vpop.f32.mrb[9].mxu1 }
 0x24e   :  { %v1351_v54 = vpop.f32.mrb[10].mxu1 }
 0x24f   :  { %4855 = vmatpush1.bf16.msra.mxu0 %v12329_v48  ;;  %v1352_v55 = vpop.f32.mrb[11].mxu1 }
 0x250   :  { %4856 = vmatprep.subr.bf16.mxu0 %v12335_v49  ;;  %v12536_v55 = vld [vmem:[%s14558_s2] sm:$0x3] }
 0x251   :  { %v390_v12 = vrot.slane %v12536_v55, %v11526_v7 }
 0x253   :  { %4857 = vmatpush1.bf16.msra.mxu0 %v12341_v16  ;;  %v510_v20 = vadd.f32 %v11615_v27, %v390_v12 }
 0x254   :  { %4858 = vmatprep.subr.bf16.mxu0 %v12347_v26 }
 0x255   :  { %v515_v12 = vmul.f32 0.5, %v510_v20 }
 0x257   :  { %4859 = vmatpush1.bf16.msra.mxu0 %v12353_v34  ;;  %11004 = vtanh.f32 %v515_v12 }
 0x258   :  { %4860 = vmatprep.subr.bf16.mxu0 %v12359_v35 }
 0x25b   :  { %4861 = vmatpush1.bf16.msra.mxu0 %v12365_v42 }
 0x25c   :  { %4862 = vmatprep.subr.bf16.mxu0 %v12371_v0 }
 0x25f   :  { %4863 = vmatpush1.bf16.msra.mxu0 %v12377_v10 }
 0x260   :  { %4864 = vmatprep.subr.bf16.mxu0 %v12388_v2 }
 0x261   :  { %v11005_v12 = vpop.eup %11004 }
 0x263   :  { %4865 = vmatpush1.bf16.msra.mxu0 %v12398_v28 }
 0x264   :  { %4866 = vmatprep.subr.bf16.mxu0 %v12404_v63 }
 0x267   :  { %4867 = vmatpush1.bf16.msra.mxu0 %v12412_v45 }
 0x268   :  { %4868 = vmatprep.subr.bf16.mxu0 %v12420_v41 }
 0x26b   :  { %4869 = vmatpush1.bf16.msra.mxu0 %v12428_v51 }
 0x26c   :  { %4870 = vmatprep.subr.bf16.mxu0 %v12434_v59 }
 0x26f   :  { %4871 = vmatpush1.bf16.msra.mxu0 %v12440_v56 }
 0x270   :  { %4872 = vmatprep.subr.bf16.mxu0 %v12446_v57 }
 0x273   :  { %4873 = vmatpush1.bf16.msra.mxu0 %v12452_v60 }
 0x274   :  { %4874 = vmatprep.subr.bf16.mxu0 %v12458_v62 }
 0x277   :  { %4875 = vmatpush1.bf16.msra.mxu0 %v12464_v4 }
 0x278   :  { %4876 = vmatprep.subr.bf16.mxu0 %v12470_v8 }
 0x27b   :  { %4877 = vmatpush1.bf16.msra.mxu0 %v12476_v11 }
 0x27c   :  { %4878 = vmatprep.subr.bf16.mxu0 %v12482_v15 }
 0x27f   :  { %4879 = vmatpush1.bf16.msra.mxu0 %v12488_v18 }
 0x280   :  { %4889 = vmatprep.subr.bf16.mxu0 %v12494_v21  ;;  %v12523_v61 = vpop.f32.mrb[12].mxu1 }
 0x281   :  { %14635 = vst [vmem:[#allocation13_spill] sm:$0xff] %v12523_v61  ;;  %v12525_v31 = vpop.f32.mrb[13].mxu1 }
 0x282   :  { %4881 = vmatmul.mubr.bf16.vlgmr.msra.gmra.mrb[40].mxu0 %v9980_v13  ;;  %14636 = vst [vmem:[#allocation14_spill] sm:$0xff] %v12525_v31  ;;  %v1687_v54 = vpop.f32.mrb[14].mxu1  ;;  %v12563_v13 = vld [vmem:[%s14557_s3 + $0x240] ss:$8 sps:$4 sm:$0xff]  }
 0x283   :  { %4890 = vmatpush1.bf16.msra.mxu0 %v12500_v22  ;;  %4921 = vmatprep.mubr.bf16.mxu0 %v12502_v23  ;;  %v1688_v9 = vpop.f32.mrb[15].mxu1  ;;  %14637 = vst [vmem:[#allocation15_spill] sm:$0xff] %v12563_v13  ;;  %v2486_v54 = vld [vmem:[%s14560_s4] sm:$0x3]  ;;  %v12586_v23 = vld [vmem:[%s14557_s3 + $0x264] ss:$8 sps:$4 sm:$0xff]  }
 0x284   :  { %4891 = vmatprep.subr.bf16.mxu0 %v12508_v40  ;;  %v12572_v9 = vld [vmem:[%s14557_s3 + $0x254] ss:$8 sps:$4 sm:$0xff]   ;;  %v2491_v27 = vrot.slane %v2486_v54, %v11694_v29  ;;  %v2495_v52 = vrot.slane %v2486_v54, %v11526_v7  ;;  %14640 = vst [vmem:[#allocation18_spill] sm:$0xff] %v12586_v23  ;;  %v12592_v54 = vld [vmem:[%s14557_s3 + $0x260] ss:$8 sps:$4 sm:$0xff]  }
 0x285   :  { %14638 = vst [vmem:[#allocation16_spill] sm:$0xff] %v12572_v9  ;;  %14641 = vst [vmem:[#allocation19_spill] sm:$0xff] %v12592_v54 }
 0x287   :  { %4892 = vmatpush1.bf16.msra.mxu0 %v12514_v1 }
 0x288   :  { %4893 = vmatprep.subr.bf16.mxu0 %v12521_v46 }
 0x28b   :  { %4894 = vmatpush1.bf16.msra.mxu0 %v12531_v50 }
 0x28c   :  { %4895 = vmatprep.subr.bf16.mxu0 %v12542_v5 }
 0x28f   :  { %4896 = vmatpush1.bf16.msra.mxu0 %v12550_v14 }
 0x290   :  { %4897 = vmatprep.subr.bf16.mxu0 %v12556_v19 }
 0x293   :  { %4898 = vmatpush1.bf16.msra.mxu0 %v12563_v13 }
 0x294   :  { %4899 = vmatprep.subr.bf16.mxu0 %v12572_v9  ;;  %v12598_v9 = vld [vmem:[%s14557_s3 + $0x274] ss:$8 sps:$4 sm:$0xff]  }
 0x295   :  { %v3115_v47 = vpop.f32.mrb[32].mxu0  ;;  %14642 = vst [vmem:[#allocation20_spill] sm:$0xff] %v12598_v9 }
 0x296   :  { %v10000_v3 = vadd.f32 %v3115_v47, %v2491_v27  ;;  %v3117_v61 = vpop.f32.mrb[33].mxu0  ;;  %v12631_v27 = vld [vmem:[%s14557_s3 + $0x294] ss:$8 sps:$4 sm:$0xff]  }
 0x297   :  { %v10001_v20 = vadd.f32 %v3117_v61, %v2495_v52  ;;  %v3119_v25 = vpop.f32.mrb[34].mxu0  ;;  %4900 = vmatpush1.bf16.msra.mxu0 %v12580_v53  ;;  %v12604_v52 = vld [vmem:[%s14557_s3 + $0x270] ss:$8 sps:$4 sm:$0xff]   ;;  %v12623_v61 = vld [vmem:[%s14557_s3 + $0x280] ss:$8 sps:$4 sm:$0xff]   ;;  %14646 = vst [vmem:[#allocation24_spill] sm:$0xff] %v12631_v27 }
 0x298   :  { %v3122_v39 = vmul.f32 0.5, %v10000_v3  ;;  %v3120_v31 = vpop.f32.mrb[35].mxu0  ;;  %4901 = vmatprep.subr.bf16.mxu0 %v12586_v23  ;;  %14643 = vst [vmem:[#allocation21_spill] sm:$0xff] %v12604_v52  ;;  %v12610_v3 = vld [vmem:[%s14557_s3 + $0x284] ss:$8 sps:$4 sm:$0xff]   ;;  %14645 = vst [vmem:[#allocation23_spill] sm:$0xff] %v12623_v61 }
 0x299   :  { %v3123_v47 = vmul.f32 0.5, %v10001_v20  ;;  %14644 = vst [vmem:[#allocation22_spill] sm:$0xff] %v12610_v3  ;;  %v12615_v25 = vld [vmem:[%s14558_s2] sm:$0x3]  ;;  %v12638_v20 = vld [vmem:[%s14557_s3 + $0x290] ss:$8 sps:$4 sm:$0xff]  }
 0x29a   :  { %11006 = vtanh.f32 %v3122_v39  ;;  %v890_v39 = vrot.slane %v12382_v33, %v11694_v29  ;;  %v1230_v31 = vrot.slane %v12615_v25, %v11526_v7 }
 0x29b   :  { %11008 = vtanh.f32 %v3123_v47  ;;  %4902 = vmatpush1.bf16.msra.mxu0 %v12592_v54 }
 0x29c   :  { %4903 = vmatprep.subr.bf16.mxu0 %v12598_v9  ;;  %v1012_v33 = vadd.f32 %v12263_v58, %v890_v39  ;;  %v1350_v47 = vadd.f32 %v12422_v36, %v1230_v31  ;;  %v519_v9 = vmul.f32 0.5, %v11005_v12  ;;  %v12653_v36 = vld [vmem:[%s14557_s3 + $0x2a0] ss:$8 sps:$4 sm:$0xff]  }
 0x29e   :  { %v1018_v39 = vmul.f32 0.5, %v1012_v33  ;;  %v1355_v31 = vmul.f32 0.5, %v1350_v47  ;;  %v521_v13 = vadd.f32 0.5, %v519_v9  ;;  %v12674_v47 = vld [vmem:[%s14557_s3 + $0x2c4] ss:$8 sps:$4 sm:$0xff]  }
 0x29f   :  { %4904 = vmatpush1.bf16.msra.mxu0 %v12604_v52 }
 0x2a0   :  { %4905 = vmatprep.subr.bf16.mxu0 %v12610_v3  ;;  %v12645_v3 = vld [vmem:[%s14557_s3 + $0x2a4] ss:$8 sps:$4 sm:$0xff]   ;;  %v12647_v23 = vpop.f32.mrb[16].mxu1  ;;  %11010 = vtanh.f32 %v1018_v39  ;;  %v9977_v9 = vpack.c.bf16 %v521_v13, %v521_v13  ;;  %v12688_v13 = vld [vmem:[%s14557_s3 + $0x2d4] ss:$8 sps:$4 sm:$0xff]  }
 0x2a1   :  { %14647 = vst [vmem:[#allocation25_spill] sm:$0xff] %v12647_v23  ;;  %v12655_v12 = vpop.f32.mrb[17].mxu1  ;;  %11012 = vtanh.f32 %v1355_v31 }
 0x2a3   :  { %4906 = vmatpush1.bf16.msra.mxu0 %v12623_v61 }
 0x2a4   :  { %v11007_v52 = vpop.eup %11006  ;;  %4907 = vmatprep.subr.bf16.mxu0 %v12631_v27 }
 0x2a5   :  { %v11009_v54 = vpop.eup %11008  ;;  %v3126_v58 = vmul.f32 0.5, %v11007_v52  ;;  %v2023_v52 = vpop.f32.mrb[18].mxu1 }
 0x2a6   :  { %v3127_v61 = vmul.f32 0.5, %v11009_v54  ;;  %v12661_v54 = vld [vmem:[%s14557_s3 + $0x2b4] ss:$8 sps:$4 sm:$0xff]   ;;  %v2024_v33 = vpop.f32.mrb[19].mxu1 }
 0x2a7   :  { %v3128_v53 = vadd.f32 0.5, %v3126_v58  ;;  %4908 = vmatpush1.bf16.msra.mxu0 %v12638_v20 }
 0x2a8   :  { %v3129_v27 = vadd.f32 0.5, %v3127_v61  ;;  %4909 = vmatprep.subr.bf16.mxu0 %v12645_v3  ;;  %v12667_v61 = vld [vmem:[%s14557_s3 + $0x2b0] ss:$8 sps:$4 sm:$0xff]  }
 0x2a9   :  { %v3130_v23 = vpack.c.bf16 %v3128_v53, %v3128_v53  ;;  %v12682_v53 = vld [vmem:[%s14557_s3 + $0x2c0] ss:$8 sps:$4 sm:$0xff]  }
 0x2aa   :  { %v3131_v58 = vpack.c.bf16 %v3129_v27, %v3129_v27 }
 0x2ab   :  { %4910 = vmatpush1.bf16.msra.mxu0 %v12653_v36 }
 0x2ac   :  { %9087 = vmatprep.mubr.msk.bf16.mxu1 %vm3245_vm0, %v3131_v58  ;;  %4911 = vmatprep.subr.bf16.mxu0 %v12661_v54 }
 0x2ad   :  { %3282 = vmatmul.mubr.bf16.vlgmr.msra.gmra.mrb[24].mxu1 %v3130_v23  ;;  %v12702_v23 = vld [vmem:[%s14557_s3 + $0x2e4] ss:$8 sps:$4 sm:$0xff]  }
 0x2ae   :  { %3945 = vmatpush1.bf16.msra.mxu1 %v12293_v30  ;;  %3976 = vmatprep.mubr.bf16.mxu1 %v9977_v9  ;;  %v11011_v30 = vpop.eup %11010 }
 0x2af   :  { %4912 = vmatpush1.bf16.msra.mxu0 %v12667_v61  ;;  %3946 = vmatprep.subr.bf16.mxu1 %v12298_v32  ;;  %v12696_v32 = vld [vmem:[%s14557_s3 + $0x2d0] ss:$8 sps:$4 sm:$0xff]   ;;  %v11013_v27 = vpop.eup %11012  ;;  %v1022_v39 = vmul.f32 0.5, %v11011_v30 }
 0x2b0   :  { %4913 = vmatprep.subr.bf16.mxu0 %v12674_v47  ;;  %v1359_v31 = vmul.f32 0.5, %v11013_v27  ;;  %v10481_v27 = vld [vmem:[%s14557_s3 + $0x34] ss:$8 sps:$4 sm:$0xff]  }
 0x2b1   :  { %v1024_v52 = vadd.f32 0.5, %v1022_v39 }
 0x2b2   :  { %3947 = vmatpush1.bf16.msra.mxu1 %v12303_v37  ;;  %v12710_v37 = vld [vmem:[%s14557_s3 + $0x2e0] ss:$8 sps:$4 sm:$0xff]   ;;  %v1361_v33 = vadd.f32 0.5, %v1359_v31 }
 0x2b3   :  { %4914 = vmatpush1.bf16.msra.mxu0 %v12682_v53  ;;  %3948 = vmatprep.subr.bf16.mxu1 %v12309_v38  ;;  %v12716_v38 = vld [vmem:[%s14557_s3 + $0x2f4] ss:$8 sps:$4 sm:$0xff]   ;;  %v12730_v58 = vpack.c.bf16 %v1024_v52, %v1024_v52  ;;  %v10484_v52 = vld [vmem:[%s14557_s3 + $0x44] ss:$8 sps:$4 sm:$0xff]  }
 0x2b4   :  { %4915 = vmatprep.subr.bf16.mxu0 %v12688_v13  ;;  %v12741_v9 = vpack.c.bf16 %v1361_v33, %v1361_v33 }
 0x2b5   :  { %14648 = vst [vmem:[#allocation26_spill] sm:$0xff] %v12730_v58 }
 0x2b6   :  { %3949 = vmatpush1.bf16.msra.mxu1 %v12316_v43  ;;  %v12724_v43 = vld [vmem:[%s14557_s3 + $0x2f0] ss:$8 sps:$4 sm:$0xff]   ;;  %14649 = vst [vmem:[#allocation27_spill] sm:$0xff] %v12741_v9 }
 0x2b7   :  { %4916 = vmatpush1.bf16.msra.mxu0 %v12696_v32  ;;  %3950 = vmatprep.subr.bf16.mxu1 %v12321_v44  ;;  %v10472_v44 = vld [vmem:[%s14557_s3 + $0x4] ss:$8 sps:$4 sm:$0xff]  }
 0x2b8   :  { %4917 = vmatprep.subr.bf16.mxu0 %v12702_v23 }
 0x2ba   :  { %3951 = vmatpush1.bf16.msra.mxu1 %v12329_v48  ;;  %v10470_v48 = vld [vmem:[%s14557_s3] ss:$8 sps:$4 sm:$0xff]  }
 0x2bb   :  { %4918 = vmatpush1.bf16.msra.mxu0 %v12710_v37  ;;  %3952 = vmatprep.subr.bf16.mxu1 %v12335_v49  ;;  %v10475_v49 = vld [vmem:[%s14557_s3 + $0x14] ss:$8 sps:$4 sm:$0xff]  }
 0x2bc   :  { %4919 = vmatprep.subr.bf16.mxu0 %v12716_v38 }
 0x2be   :  { %3953 = vmatpush1.bf16.msra.mxu1 %v12341_v16  ;;  %v10473_v16 = vld [vmem:[%s14557_s3 + $0x10] ss:$8 sps:$4 sm:$0xff]  }
 0x2bf   :  { %4920 = vmatpush1.bf16.msra.mxu0 %v12724_v43  ;;  %3954 = vmatprep.subr.bf16.mxu1 %v12347_v26  ;;  %v10478_v26 = vld [vmem:[%s14557_s3 + $0x24] ss:$8 sps:$4 sm:$0xff]  }
 0x2c0   :  { %6615 = vmatprep.subr.bf16.mxu0 %v10472_v44  ;;  %v12754_v30 = vpop.f32.mrb[20].mxu1 }
 0x2c1   :  { %14650 = vst [vmem:[#allocation28_spill] sm:$0xff] %v12754_v30 }
 0x2c2   :  { %3955 = vmatpush1.bf16.msra.mxu1 %v12353_v34  ;;  %4922 = vmatmul.mubr.bf16.vlgmr.msra.gmra.mrb[40].mxu0 %v12730_v58  ;;  %v10476_v34 = vld [vmem:[%s14557_s3 + $0x20] ss:$8 sps:$4 sm:$0xff]  }
 0x2c3   :  { %6616 = vmatpush1.bf16.msra.mxu0 %v10470_v48  ;;  %3956 = vmatprep.subr.bf16.mxu1 %v12359_v35  ;;  %v12760_v35 = vpop.f32.mrb[21].mxu1 }
 0x2c4   :  { %6617 = vmatprep.subr.bf16.mxu0 %v10475_v49  ;;  %6647 = vmatprep.mubr.bf16.mxu0 %v12741_v9  ;;  %14651 = vst [vmem:[#allocation29_spill] sm:$0xff] %v12760_v35  ;;  %v2359_v39 = vpop.f32.mrb[22].mxu1  ;;  %v12809_v49 = vld [vmem:[%s14557_s3 + $0x74] ss:$8 sps:$4 sm:$0xff]   ;;  %v13172_v9 = vld [vmem:[%s14557_s3 + $0x1f0] ss:$8 sps:$4 sm:$0xff]  }
 0x2c5   :  { %v2360_v31 = vpop.f32.mrb[23].mxu1  ;;  %v14654_v39 = vld [vmem:[#allocation6_spill] sm:$0xff] }
 0x2c6   :  { %3957 = vmatpush1.bf16.msra.mxu1 %v12365_v42  ;;  %v386_v42 = vrot.slane %v12536_v55, %v11694_v29  ;;  %v13166_v35 = vld [vmem:[%s14557_s3 + $0x1f4] ss:$8 sps:$4 sm:$0xff]  }
 0x2c7   :  { %6618 = vmatpush1.bf16.msra.mxu0 %v10473_v16  ;;  %3958 = vmatprep.subr.bf16.mxu1 %v12371_v0  ;;  %v10479_v0 = vld [vmem:[%s14557_s3 + $0x30] ss:$8 sps:$4 sm:$0xff]   ;;  %v1226_v16 = vrot.slane %v12615_v25, %v11694_v29 }
 0x2c8   :  { %6619 = vmatprep.subr.bf16.mxu0 %v10478_v26  ;;  %v508_v44 = vadd.f32 %v11608_v24, %v386_v42  ;;  %v10485_v24 = vld [vmem:[%s14557_s3 + $0x50] ss:$8 sps:$4 sm:$0xff]  }
 0x2c9   :  { %v1348_v25 = vadd.f32 %v12414_v6, %v1226_v16  ;;  %v12870_v6 = vld [vmem:[%s14557_s3 + $0xa0] ss:$8 sps:$4 sm:$0xff]  }
 0x2ca   :  { %3959 = vmatpush1.bf16.msra.mxu1 %v12377_v10  ;;  %v10482_v10 = vld [vmem:[%s14557_s3 + $0x40] ss:$8 sps:$4 sm:$0xff]   ;;  %v514_v55 = vmul.f32 0.5, %v508_v44  ;;  %v12890_v44 = vld [vmem:[%s14557_s3 + $0xc4] ss:$8 sps:$4 sm:$0xff]  }
 0x2cb   :  { %6620 = vmatpush1.bf16.msra.mxu0 %v10476_v34  ;;  %3960 = vmatprep.subr.bf16.mxu1 %v12388_v2  ;;  %v10487_v2 = vld [vmem:[%s14557_s3 + $0x54] ss:$8 sps:$4 sm:$0xff]  }
 0x2cc   :  { %6621 = vmatprep.subr.bf16.mxu0 %v10481_v27  ;;  %11014 = vtanh.f32 %v514_v55  ;;  %v12855_v27 = vld [vmem:[%s14557_s3 + $0x90] ss:$8 sps:$4 sm:$0xff]  }
 0x2ce   :  { %3961 = vmatpush1.bf16.msra.mxu1 %v12398_v28  ;;  %v12792_v28 = vld [vmem:[%s14557_s3 + $0x64] ss:$8 sps:$4 sm:$0xff]  }
 0x2cf   :  { %6622 = vmatpush1.bf16.msra.mxu0 %v10479_v0  ;;  %3962 = vmatprep.subr.bf16.mxu1 %v12404_v63 }
 0x2d0   :  { %6623 = vmatprep.subr.bf16.mxu0 %v10484_v52  ;;  %v12876_v52 = vld [vmem:[%s14557_s3 + $0xb4] ss:$8 sps:$4 sm:$0xff]  }
 0x2d2   :  { %3963 = vmatpush1.bf16.msra.mxu1 %v12412_v45 }
 0x2d3   :  { %6624 = vmatpush1.bf16.msra.mxu0 %v10482_v10  ;;  %3964 = vmatprep.subr.bf16.mxu1 %v12420_v41  ;;  %v12803_v41 = vld [vmem:[%s14557_s3 + $0x60] ss:$8 sps:$4 sm:$0xff]  }
 0x2d4   :  { %6625 = vmatprep.subr.bf16.mxu0 %v10487_v2  ;;  %v12933_v2 = vld [vmem:[%s14557_s3 + $0xf4] ss:$8 sps:$4 sm:$0xff]  }
 0x2d5   :  { %v12794_v63 = vpop.f32.mrb[36].mxu0 }
 0x2d6   :  { %14652 = vst [vmem:[#allocation30_spill] sm:$0xff] %v12794_v63  ;;  %3965 = vmatpush1.bf16.msra.mxu1 %v12428_v51  ;;  %v12797_v33 = vpop.f32.mrb[37].mxu0  ;;  %v12817_v51 = vld [vmem:[%s14557_s3 + $0x70] ss:$8 sps:$4 sm:$0xff]   ;;  %v11015_v26 = vpop.eup %11014 }
 0x2d7   :  { %14653 = vst [vmem:[#allocation31_spill] sm:$0xff] %v12797_v33  ;;  %v3941_v45 = vpop.f32.mrb[38].mxu0  ;;  %6626 = vmatpush1.bf16.msra.mxu0 %v10485_v24  ;;  %3966 = vmatprep.subr.bf16.mxu1 %v12434_v59  ;;  %v12823_v59 = vld [vmem:[%s14557_s3 + $0x84] ss:$8 sps:$4 sm:$0xff]  }
 0x2d8   :  { %v3942_v48 = vpop.f32.mrb[39].mxu0  ;;  %6627 = vmatprep.subr.bf16.mxu0 %v12792_v28  ;;  %v12947_v24 = vld [vmem:[%s14557_s3 + $0x104] ss:$8 sps:$4 sm:$0xff]  }
 0x2d9   :  { %v14655_v48 = vld [vmem:[#allocation15_spill] sm:$0xff] }
 0x2da   :  { %3967 = vmatpush1.bf16.msra.mxu1 %v12440_v56  ;;  %v12828_v56 = vld [vmem:[%s14558_s2] sm:$0x3]  ;;  %14670 = vst [vmem:[#allocation15_spill] sm:$0xff] %v13166_v35 }
 0x2db   :  { %6628 = vmatpush1.bf16.msra.mxu0 %v12803_v41  ;;  %3968 = vmatprep.subr.bf16.mxu1 %v12446_v57  ;;  %v12836_v57 = vld [vmem:[%s14557_s3 + $0x80] ss:$8 sps:$4 sm:$0xff]   ;;  %v1398_v34 = vrot.slane %v12828_v56, %v11526_v7 }
 0x2dc   :  { %6629 = vmatprep.subr.bf16.mxu0 %v12809_v49 }
 0x2dd   :  { %v1518_v31 = vadd.f32 %v14654_v39, %v1398_v34  ;;  %v14659_v39 = vld [vmem:[#allocation18_spill] sm:$0xff] }
 0x2de   :  { %3969 = vmatpush1.bf16.msra.mxu1 %v12452_v60  ;;  %v12846_v60 = vld [vmem:[%s14557_s3 + $0x94] ss:$8 sps:$4 sm:$0xff]  }
 0x2df   :  { %6630 = vmatpush1.bf16.msra.mxu0 %v12817_v51  ;;  %3970 = vmatprep.subr.bf16.mxu1 %v12458_v62  ;;  %v518_v62 = vmul.f32 0.5, %v11015_v26  ;;  %v1523_v0 = vmul.f32 0.5, %v1518_v31  ;;  %v12963_v26 = vld [vmem:[%s14557_s3 + $0x114] ss:$8 sps:$4 sm:$0xff]   ;;  %v12978_v31 = vld [vmem:[%s14557_s3 + $0x124] ss:$8 sps:$4 sm:$0xff]  }
 0x2e0   :  { %6631 = vmatprep.subr.bf16.mxu0 %v12823_v59 }
 0x2e1   :  { %v520_v42 = vadd.f32 0.5, %v518_v62  ;;  %v14658_v62 = vld [vmem:[#allocation17_spill] sm:$0xff] }
 0x2e2   :  { %3971 = vmatpush1.bf16.msra.mxu1 %v12464_v4  ;;  %v12862_v4 = vld [vmem:[%s14557_s3 + $0xa4] ss:$8 sps:$4 sm:$0xff]  }
 0x2e3   :  { %6632 = vmatpush1.bf16.msra.mxu0 %v12836_v57  ;;  %3972 = vmatprep.subr.bf16.mxu1 %v12470_v8  ;;  %v1354_v8 = vmul.f32 0.5, %v1348_v25  ;;  %v12971_v25 = vld [vmem:[%s14557_s3 + $0x110] ss:$8 sps:$4 sm:$0xff]  }
 0x2e4   :  { %6633 = vmatprep.subr.bf16.mxu0 %v12846_v60 }
 0x2e5   :  { %11016 = vtanh.f32 %v1354_v8  ;;  %v14661_v8 = vld [vmem:[#allocation20_spill] sm:$0xff] }
 0x2e6   :  { %3973 = vmatpush1.bf16.msra.mxu1 %v12476_v11  ;;  %v9976_v11 = vpack.c.bf16 %v520_v42, %v520_v42  ;;  %11018 = vtanh.f32 %v1523_v0  ;;  %v14660_v42 = vld [vmem:[#allocation19_spill] sm:$0xff] }
 0x2e7   :  { %6634 = vmatpush1.bf16.msra.mxu0 %v12855_v27  ;;  %3974 = vmatprep.subr.bf16.mxu1 %v12482_v15  ;;  %v12884_v15 = vld [vmem:[%s14557_s3 + $0xb0] ss:$8 sps:$4 sm:$0xff]   ;;  %v12986_v0 = vld [vmem:[%s14557_s3 + $0x120] ss:$8 sps:$4 sm:$0xff]  }
 0x2e8   :  { %6635 = vmatprep.subr.bf16.mxu0 %v12862_v4 }
 0x2ea   :  { %3975 = vmatpush1.bf16.msra.mxu1 %v12488_v18  ;;  %v12899_v18 = vld [vmem:[%s14557_s3 + $0xc0] ss:$8 sps:$4 sm:$0xff]  }
 0x2eb   :  { %6636 = vmatpush1.bf16.msra.mxu0 %v12870_v6  ;;  %3985 = vmatprep.subr.bf16.mxu1 %v12494_v21  ;;  %v12905_v21 = vld [vmem:[%s14557_s3 + $0xd4] ss:$8 sps:$4 sm:$0xff]  }
 0x2ec   :  { %6637 = vmatprep.subr.bf16.mxu0 %v12876_v52 }
 0x2ed   :  { %3977 = vmatmul.mubr.bf16.vlgmr.msra.gmra.mrb[28].mxu1 %v9976_v11  ;;  %v12992_v11 = vld [vmem:[%s14557_s3 + $0x134] ss:$8 sps:$4 sm:$0xff]  }
 0x2ee   :  { %3986 = vmatpush1.bf16.msra.mxu1 %v12500_v22  ;;  %4017 = vmatprep.mubr.bf16.mxu1 %v12133_v17  ;;  %v12913_v17 = vld [vmem:[%s14557_s3 + $0xd0] ss:$8 sps:$4 sm:$0xff]   ;;  %v12919_v22 = vld [vmem:[%s14557_s3 + $0xe4] ss:$8 sps:$4 sm:$0xff]  }
 0x2ef   :  { %6638 = vmatpush1.bf16.msra.mxu0 %v12884_v15  ;;  %3987 = vmatprep.subr.bf16.mxu1 %v12508_v40  ;;  %v11017_v40 = vpop.eup %11016 }
 0x2f0   :  { %6639 = vmatprep.subr.bf16.mxu0 %v12890_v44  ;;  %v11019_v10 = vpop.eup %11018 }
 0x2f1   :  { %v1527_v55 = vmul.f32 0.5, %v11019_v10  ;;  %v14663_v10 = vld [vmem:[#allocation22_spill] sm:$0xff] }
 0x2f2   :  { %3988 = vmatpush1.bf16.msra.mxu1 %v12514_v1  ;;  %v12927_v1 = vld [vmem:[%s14557_s3 + $0xe0] ss:$8 sps:$4 sm:$0xff]  }
 0x2f3   :  { %6640 = vmatpush1.bf16.msra.mxu0 %v12899_v18  ;;  %3989 = vmatprep.subr.bf16.mxu1 %v12521_v46  ;;  %v1358_v46 = vmul.f32 0.5, %v11017_v40  ;;  %v1529_v45 = vadd.f32 0.5, %v1527_v55  ;;  %v14662_v40 = vld [vmem:[#allocation21_spill] sm:$0xff]  ;;  %v13006_v55 = vld [vmem:[%s14557_s3 + $0x144] ss:$8 sps:$4 sm:$0xff]  }
 0x2f4   :  { %6641 = vmatprep.subr.bf16.mxu0 %v12905_v21 }
 0x2f5   :  { %v9989_v34 = vpack.c.bf16 %v1529_v45, %v1529_v45  ;;  %v14665_v45 = vld [vmem:[#allocation24_spill] sm:$0xff] }
 0x2f6   :  { %3990 = vmatpush1.bf16.msra.mxu1 %v12531_v50  ;;  %v12941_v50 = vld [vmem:[%s14557_s3 + $0xf0] ss:$8 sps:$4 sm:$0xff]  }
 0x2f7   :  { %6642 = vmatpush1.bf16.msra.mxu0 %v12913_v17  ;;  %3991 = vmatprep.subr.bf16.mxu1 %v12542_v5  ;;  %v1360_v5 = vadd.f32 0.5, %v1358_v46  ;;  %v13000_v46 = vld [vmem:[%s14557_s3 + $0x130] ss:$8 sps:$4 sm:$0xff]  }
 0x2f8   :  { %6643 = vmatprep.subr.bf16.mxu0 %v12919_v22 }
 0x2f9   :  { %v12957_v16 = vpack.c.bf16 %v1360_v5, %v1360_v5  ;;  %v14664_v5 = vld [vmem:[#allocation23_spill] sm:$0xff] }
 0x2fa   :  { %3992 = vmatpush1.bf16.msra.mxu1 %v12550_v14  ;;  %v14656_v14 = vld [vmem:[#allocation16_spill] sm:$0xff] }
 0x2fb   :  { %6644 = vmatpush1.bf16.msra.mxu0 %v12927_v1  ;;  %3993 = vmatprep.subr.bf16.mxu1 %v12556_v19  ;;  %v12955_v19 = vld [vmem:[%s14557_s3 + $0x100] ss:$8 sps:$4 sm:$0xff]   ;;  %14657 = vst [vmem:[#allocation6_spill] sm:$0xff] %v12957_v16 }
 0x2fc   :  { %6645 = vmatprep.subr.bf16.mxu0 %v12933_v2 }
 0x2fe   :  { %3994 = vmatpush1.bf16.msra.mxu1 %v14655_v48  ;;  %v13014_v48 = vld [vmem:[%s14557_s3 + $0x140] ss:$8 sps:$4 sm:$0xff]  }
 0x2ff   :  { %6646 = vmatpush1.bf16.msra.mxu0 %v12941_v50  ;;  %3995 = vmatprep.subr.bf16.mxu1 %v14656_v14  ;;  %v13020_v14 = vld [vmem:[%s14557_s3 + $0x154] ss:$8 sps:$4 sm:$0xff]  }
 0x300   :  { %6656 = vmatprep.subr.bf16.mxu0 %v12947_v24 }
 0x302   :  { %3996 = vmatpush1.bf16.msra.mxu1 %v14658_v62  ;;  %6648 = vmatmul.mubr.bf16.vlgmr.msra.gmra.mrb[44].mxu0 %v12957_v16  ;;  %v13034_v62 = vld [vmem:[%s14557_s3 + $0x164] ss:$8 sps:$4 sm:$0xff]  }
 0x303   :  { %6657 = vmatpush1.bf16.msra.mxu0 %v12955_v19  ;;  %6688 = vmatprep.mubr.bf16.mxu0 %v9989_v34  ;;  %v13028_v34 = vld [vmem:[%s14557_s3 + $0x150] ss:$8 sps:$4 sm:$0xff]  }
 0x304   :  { %3997 = vmatprep.subr.bf16.mxu1 %v14659_v39  ;;  %6658 = vmatprep.subr.bf16.mxu0 %v12963_v26  ;;  %v13077_v39 = vld [vmem:[%s14557_s3 + $0x180] ss:$8 sps:$4 sm:$0xff]  }
 0x306   :  { %3998 = vmatpush1.bf16.msra.mxu1 %v14660_v42 }
 0x307   :  { %6659 = vmatpush1.bf16.msra.mxu0 %v12971_v25  ;;  %3999 = vmatprep.subr.bf16.mxu1 %v14661_v8 }
 0x308   :  { %6660 = vmatprep.subr.bf16.mxu0 %v12978_v31 }
 0x30a   :  { %4000 = vmatpush1.bf16.msra.mxu1 %v14662_v40  ;;  %v14667_v40 = vld [vmem:[#allocation14_spill] sm:$0xff] }
 0x30b   :  { %6661 = vmatpush1.bf16.msra.mxu0 %v12986_v0  ;;  %4001 = vmatprep.subr.bf16.mxu1 %v14663_v10 }
 0x30c   :  { %6662 = vmatprep.subr.bf16.mxu0 %v12992_v11 }
 0x30e   :  { %4002 = vmatpush1.bf16.msra.mxu1 %v14664_v5  ;;  %v13101_v5 = vld [vmem:[%s14557_s3 + $0x1a4] ss:$8 sps:$4 sm:$0xff]  }
 0x30f   :  { %6663 = vmatpush1.bf16.msra.mxu0 %v13000_v46  ;;  %4003 = vmatprep.subr.bf16.mxu1 %v14665_v45 }
 0x310   :  { %6664 = vmatprep.subr.bf16.mxu0 %v13006_v55 }
 0x312   :  { %4004 = vmatpush1.bf16.msra.mxu1 %v12638_v20  ;;  %v13048_v20 = vld [vmem:[%s14557_s3 + $0x174] ss:$8 sps:$4 sm:$0xff]  }
 0x313   :  { %6665 = vmatpush1.bf16.msra.mxu0 %v13014_v48  ;;  %4005 = vmatprep.subr.bf16.mxu1 %v12645_v3  ;;  %v13042_v3 = vld [vmem:[%s14557_s3 + $0x160] ss:$8 sps:$4 sm:$0xff]  }
 0x314   :  { %6666 = vmatprep.subr.bf16.mxu0 %v13020_v14 }
 0x316   :  { %4006 = vmatpush1.bf16.msra.mxu1 %v12653_v36  ;;  %v13056_v36 = vld [vmem:[%s14557_s3 + $0x170] ss:$8 sps:$4 sm:$0xff]  }
 0x317   :  { %6667 = vmatpush1.bf16.msra.mxu0 %v13028_v34  ;;  %4007 = vmatprep.subr.bf16.mxu1 %v12661_v54  ;;  %v13062_v54 = vld [vmem:[%s14557_s3 + $0x184] ss:$8 sps:$4 sm:$0xff]  }
 0x318   :  { %6668 = vmatprep.subr.bf16.mxu0 %v13034_v62 }
 0x31a   :  { %4008 = vmatpush1.bf16.msra.mxu1 %v12667_v61  ;;  %v13067_v61 = vld [vmem:[%s14558_s2] sm:$0x3] }
 0x31b   :  { %6669 = vmatpush1.bf16.msra.mxu0 %v13042_v3  ;;  %4009 = vmatprep.subr.bf16.mxu1 %v12674_v47  ;;  %v1394_v47 = vrot.slane %v12828_v56, %v11694_v29  ;;  %v1566_v42 = vrot.slane %v13067_v61, %v11526_v7  ;;  %v14666_v56 = vld [vmem:[#allocation5_spill] sm:$0xff] }
 0x31c   :  { %6670 = vmatprep.subr.bf16.mxu0 %v13048_v20 }
 0x31d   :  { %v1516_v8 = vadd.f32 %v14666_v56, %v1394_v47  ;;  %v1686_v10 = vadd.f32 %v14667_v40, %v1566_v42  ;;  %v13115_v47 = vld [vmem:[%s14557_s3 + $0x1b4] ss:$8 sps:$4 sm:$0xff]   ;;  %v13129_v42 = vld [vmem:[%s14557_s3 + $0x1c4] ss:$8 sps:$4 sm:$0xff]   ;;  %v13148_v40 = vld [vmem:[%s14557_s3 + $0x1d0] ss:$8 sps:$4 sm:$0xff]  }
 0x31e   :  { %4010 = vmatpush1.bf16.msra.mxu1 %v12682_v53  ;;  %v13085_v53 = vld [vmem:[%s14557_s3 + $0x194] ss:$8 sps:$4 sm:$0xff]   ;;  %v14669_v56 = vld [vmem:[#allocation11_spill] sm:$0xff] }
 0x31f   :  { %6671 = vmatpush1.bf16.msra.mxu0 %v13056_v36  ;;  %4011 = vmatprep.subr.bf16.mxu1 %v12688_v13  ;;  %v13094_v13 = vld [vmem:[%s14557_s3 + $0x190] ss:$8 sps:$4 sm:$0xff]   ;;  %v1691_v45 = vmul.f32 0.5, %v1686_v10  ;;  %v13154_v10 = vld [vmem:[%s14557_s3 + $0x1e4] ss:$8 sps:$4 sm:$0xff]  }
 0x320   :  { %6672 = vmatprep.subr.bf16.mxu0 %v13062_v54 }
 0x322   :  { %4012 = vmatpush1.bf16.msra.mxu1 %v12696_v32  ;;  %v1522_v32 = vmul.f32 0.5, %v1516_v8  ;;  %v13142_v8 = vld [vmem:[%s14557_s3 + $0x1d4] ss:$8 sps:$4 sm:$0xff]  }
 0x323   :  { %6673 = vmatpush1.bf16.msra.mxu0 %v13077_v39  ;;  %4013 = vmatprep.subr.bf16.mxu1 %v12702_v23  ;;  %v13109_v23 = vld [vmem:[%s14557_s3 + $0x1a0] ss:$8 sps:$4 sm:$0xff]  }
 0x324   :  { %6674 = vmatprep.subr.bf16.mxu0 %v13085_v53  ;;  %11020 = vtanh.f32 %v1522_v32 }
 0x325   :  { %11022 = vtanh.f32 %v1691_v45 }
 0x326   :  { %4014 = vmatpush1.bf16.msra.mxu1 %v12710_v37  ;;  %v13122_v37 = vld [vmem:[%s14557_s3 + $0x1b0] ss:$8 sps:$4 sm:$0xff]  }
 0x327   :  { %6675 = vmatpush1.bf16.msra.mxu0 %v13094_v13  ;;  %4015 = vmatprep.subr.bf16.mxu1 %v12716_v38  ;;  %v14668_v38 = vmov 0  }
 0x328   :  { %6676 = vmatprep.subr.bf16.mxu0 %v13101_v5 }
 0x32a   :  { %4016 = vmatpush1.bf16.msra.mxu1 %v12724_v43  ;;  %v13136_v43 = vld [vmem:[%s14557_s3 + $0x1c0] ss:$8 sps:$4 sm:$0xff]  }
 0x32b   :  { %6677 = vmatpush1.bf16.msra.mxu0 %v13109_v23  ;;  %4153 = vmatprep.subr.bf16.mxu1 %v14668_v38 }
 0x32c   :  { %6678 = vmatprep.subr.bf16.mxu0 %v13115_v47 }
 0x32d   :  { %4018 = vmatmul.mubr.bf16.vlgmr.msra.gmra.mrb[28].mxu1 %v14669_v56  ;;  %v13160_v56 = vld [vmem:[%s14557_s3 + $0x1e0] ss:$8 sps:$4 sm:$0xff]  }
 0x32e   :  { %v11021_v32 = vpop.eup %11020 }
 0x32f   :  { %6679 = vmatpush1.bf16.msra.mxu0 %v13122_v37  ;;  %v11023_v45 = vpop.eup %11022  ;;  %v1526_v30 = vmul.f32 0.5, %v11021_v32  ;;  %v13178_v32 = vld [vmem:[%s14557_s3 + $0x204] ss:$8 sps:$4 sm:$0xff]  }
 0x330   :  { %6680 = vmatprep.subr.bf16.mxu0 %v13129_v42  ;;  %v1695_v16 = vmul.f32 0.5, %v11023_v45  ;;  %14671 = vst [vmem:[#allocation16_spill] sm:$0xff] %v13178_v32  ;;  %v13184_v45 = vld [vmem:[%s14557_s3 + $0x200] ss:$8 sps:$4 sm:$0xff]  }
 0x331   :  { %v1528_v58 = vadd.f32 0.5, %v1526_v30  ;;  %14672 = vst [vmem:[#allocation17_spill] sm:$0xff] %v13184_v45  ;;  %v13190_v30 = vld [vmem:[%s14557_s3 + $0x214] ss:$8 sps:$4 sm:$0xff]  }
 0x332   :  { %v1697_v33 = vadd.f32 0.5, %v1695_v16  ;;  %14673 = vst [vmem:[#allocation18_spill] sm:$0xff] %v13190_v30  ;;  %v13199_v16 = vld [vmem:[%s14557_s3 + $0x210] ss:$8 sps:$4 sm:$0xff]  }
 0x333   :  { %6681 = vmatpush1.bf16.msra.mxu0 %v13136_v43  ;;  %v9988_v63 = vpack.c.bf16 %v1528_v58, %v1528_v58  ;;  %14674 = vst [vmem:[#allocation19_spill] sm:$0xff] %v13199_v16  ;;  %v13205_v58 = vld [vmem:[%s14557_s3 + $0x224] ss:$8 sps:$4 sm:$0xff]  }
 0x334   :  { %6682 = vmatprep.subr.bf16.mxu0 %v13142_v8  ;;  %14675 = vst [vmem:[#allocation20_spill] sm:$0xff] %v13205_v58 }
 0x337   :  { %6683 = vmatpush1.bf16.msra.mxu0 %v13148_v40 }
 0x338   :  { %6684 = vmatprep.subr.bf16.mxu0 %v13154_v10 }
 0x33b   :  { %6685 = vmatpush1.bf16.msra.mxu0 %v13160_v56 }
 0x33c   :  { %6686 = vmatprep.subr.bf16.mxu0 %v13166_v35  ;;  %v13192_v35 = vpack.c.bf16 %v1697_v33, %v1697_v33  ;;  %v13217_v33 = vld [vmem:[%s14557_s3 + $0x234] ss:$8 sps:$4 sm:$0xff]  }
 0x33d   :  { %14677 = vst [vmem:[#allocation22_spill] sm:$0xff] %v13217_v33 }
 0x33f   :  { %6687 = vmatpush1.bf16.msra.mxu0 %v13172_v9 }
 0x340   :  { %6697 = vmatprep.subr.bf16.mxu0 %v13178_v32  ;;  %v13305_v32 = vld [vmem:[%s14557_s3 + $0x290] ss:$8 sps:$4 sm:$0xff]  }
 0x342   :  { %6689 = vmatmul.mubr.bf16.vlgmr.msra.gmra.mrb[44].mxu0 %v9988_v63  ;;  %v13211_v63 = vld [vmem:[%s14557_s3 + $0x220] ss:$8 sps:$4 sm:$0xff]  }
 0x343   :  { %6698 = vmatpush1.bf16.msra.mxu0 %v13184_v45  ;;  %6729 = vmatprep.mubr.bf16.mxu0 %v13192_v35  ;;  %14676 = vst [vmem:[#allocation21_spill] sm:$0xff] %v13211_v63  ;;  %v13288_v45 = vld [vmem:[%s14557_s3 + $0x280] ss:$8 sps:$4 sm:$0xff]  }
 0x344   :  { %6699 = vmatprep.subr.bf16.mxu0 %v13190_v30  ;;  %v13223_v30 = vld [vmem:[%s14557_s3 + $0x230] ss:$8 sps:$4 sm:$0xff]   ;;  %14688 = vst [vmem:[#allocation37_spill] sm:$0xff] %v13288_v45 }
 0x345   :  { %14678 = vst [vmem:[#allocation23_spill] sm:$0xff] %v13223_v30 }
 0x347   :  { %6700 = vmatpush1.bf16.msra.mxu0 %v13199_v16  ;;  %v13229_v16 = vld [vmem:[%s14557_s3 + $0x244] ss:$8 sps:$4 sm:$0xff]  }
 0x348   :  { %6701 = vmatprep.subr.bf16.mxu0 %v13205_v58  ;;  %14679 = vst [vmem:[#allocation24_spill] sm:$0xff] %v13229_v16  ;;  %v13235_v58 = vld [vmem:[%s14557_s3 + $0x240] ss:$8 sps:$4 sm:$0xff]  }
 0x349   :  { %14680 = vst [vmem:[#allocation5_spill] sm:$0xff] %v13235_v58 }
 0x34b   :  { %6702 = vmatpush1.bf16.msra.mxu0 %v13211_v63  ;;  %v13241_v63 = vld [vmem:[%s14557_s3 + $0x254] ss:$8 sps:$4 sm:$0xff]  }
 0x34c   :  { %6703 = vmatprep.subr.bf16.mxu0 %v13217_v33  ;;  %14681 = vst [vmem:[#allocation14_spill] sm:$0xff] %v13241_v63  ;;  %v13247_v33 = vld [vmem:[%s14557_s3 + $0x250] ss:$8 sps:$4 sm:$0xff]  }
 0x34d   :  { %14682 = vst [vmem:[#allocation11_spill] sm:$0xff] %v13247_v33 }
 0x34f   :  { %6704 = vmatpush1.bf16.msra.mxu0 %v13223_v30  ;;  %v13253_v30 = vld [vmem:[%s14557_s3 + $0x264] ss:$8 sps:$4 sm:$0xff]  }
 0x350   :  { %6705 = vmatprep.subr.bf16.mxu0 %v13229_v16  ;;  %14683 = vst [vmem:[#allocation32_spill] sm:$0xff] %v13253_v30  ;;  %v13259_v16 = vld [vmem:[%s14557_s3 + $0x260] ss:$8 sps:$4 sm:$0xff]  }
 0x351   :  { %14684 = vst [vmem:[#allocation33_spill] sm:$0xff] %v13259_v16 }
 0x353   :  { %6706 = vmatpush1.bf16.msra.mxu0 %v13235_v58  ;;  %v13265_v58 = vld [vmem:[%s14557_s3 + $0x274] ss:$8 sps:$4 sm:$0xff]  }
 0x354   :  { %6707 = vmatprep.subr.bf16.mxu0 %v13241_v63  ;;  %14685 = vst [vmem:[#allocation34_spill] sm:$0xff] %v13265_v58  ;;  %v13271_v63 = vld [vmem:[%s14557_s3 + $0x270] ss:$8 sps:$4 sm:$0xff]  }
 0x355   :  { %14686 = vst [vmem:[#allocation35_spill] sm:$0xff] %v13271_v63 }
 0x357   :  { %6708 = vmatpush1.bf16.msra.mxu0 %v13247_v33  ;;  %v13277_v33 = vld [vmem:[%s14557_s3 + $0x284] ss:$8 sps:$4 sm:$0xff]  }
 0x358   :  { %6709 = vmatprep.subr.bf16.mxu0 %v13253_v30  ;;  %14687 = vst [vmem:[#allocation36_spill] sm:$0xff] %v13277_v33  ;;  %v10632_v30 = vld [vmem:[%s14559_s5 + $0x70] sm:$0xff]  }
 0x359   :  { %4154 = vmatpush1.bf16.msra.mxu1 %v10632_v30  ;;  %v14690_v30 = vld [vmem:[#allocation13_spill] sm:$0xff] }
 0x35a   :  { %4155 = vmatprep.subr.bf16.mxu1 %v14668_v38  ;;  %14691 = vst [vmem:[#allocation13_spill] sm:$0xff] %v13305_v32 }
 0x35b   :  { %6710 = vmatpush1.bf16.msra.mxu0 %v13259_v16  ;;  %v1562_v16 = vrot.slane %v13067_v61, %v11694_v29  ;;  %v10633_v61 = vld [vmem:[%s14559_s5 + $0x78] sm:$0xff]  }
 0x35c   :  { %6711 = vmatprep.subr.bf16.mxu0 %v13265_v58  ;;  %v13295_v58 = vld [vmem:[%s14557_s3 + $0x294] ss:$8 sps:$4 sm:$0xff]  }
 0x35d   :  { %14689 = vst [vmem:[#allocation38_spill] sm:$0xff] %v13295_v58  ;;  %4156 = vmatpush1.bf16.msra.mxu1 %v10633_v61 }
 0x35e   :  { %4157 = vmatprep.subr.bf16.mxu1 %v14668_v38 }
 0x35f   :  { %6712 = vmatpush1.bf16.msra.mxu0 %v13271_v63  ;;  %v1684_v63 = vadd.f32 %v14690_v30, %v1562_v16  ;;  %v10634_v16 = vld [vmem:[%s14559_s5 + $0x80] sm:$0xff]  }
 0x360   :  { %6713 = vmatprep.subr.bf16.mxu0 %v13277_v33  ;;  %v13312_v33 = vld [vmem:[%s14557_s3 + $0x2a4] ss:$8 sps:$4 sm:$0xff]   ;;  %v13321_v30 = vld [vmem:[%s14557_s3 + $0x2a0] ss:$8 sps:$4 sm:$0xff]  }
 0x361   :  { %14692 = vst [vmem:[#allocation39_spill] sm:$0xff] %v13312_v33  ;;  %4158 = vmatpush1.bf16.msra.mxu1 %v10634_v16  ;;  %v1690_v61 = vmul.f32 0.5, %v1684_v63  ;;  %14693 = vst [vmem:[#allocation40_spill] sm:$0xff] %v13321_v30  ;;  %v10635_v63 = vld [vmem:[%s14559_s5 + $0x88] sm:$0xff]   ;;  %v13337_v16 = vld [vmem:[%s14557_s3 + $0x2b0] ss:$8 sps:$4 sm:$0xff]  }
 0x362   :  { %4159 = vmatprep.subr.bf16.mxu1 %v14668_v38  ;;  %14695 = vst [vmem:[#allocation42_spill] sm:$0xff] %v13337_v16 }
 0x363   :  { %6714 = vmatpush1.bf16.msra.mxu0 %v13288_v45  ;;  %11024 = vtanh.f32 %v1690_v61  ;;  %v10636_v61 = vld [vmem:[%s14559_s5 + $0x90] sm:$0xff]  }
 0x364   :  { %6715 = vmatprep.subr.bf16.mxu0 %v13295_v58  ;;  %v13328_v58 = vld [vmem:[%s14557_s3 + $0x2b4] ss:$8 sps:$4 sm:$0xff]  }
 0x365   :  { %14694 = vst [vmem:[#allocation41_spill] sm:$0xff] %v13328_v58  ;;  %4160 = vmatpush1.bf16.msra.mxu1 %v10635_v63  ;;  %v13353_v63 = vld [vmem:[%s14557_s3 + $0x2c0] ss:$8 sps:$4 sm:$0xff]  }
 0x366   :  { %4161 = vmatprep.subr.bf16.mxu1 %v14668_v38  ;;  %14697 = vst [vmem:[#allocation44_spill] sm:$0xff] %v13353_v63 }
 0x367   :  { %6716 = vmatpush1.bf16.msra.mxu0 %v13305_v32  ;;  %v13392_v32 = vld [vmem:[%s14557_s3 + $0x2f4] ss:$8 sps:$4 sm:$0xff]  }
 0x368   :  { %6717 = vmatprep.subr.bf16.mxu0 %v13312_v33  ;;  %v13344_v33 = vld [vmem:[%s14557_s3 + $0x2c4] ss:$8 sps:$4 sm:$0xff]   ;;  %14702 = vst [vmem:[#allocation49_spill] sm:$0xff] %v13392_v32 }
 0x369   :  { %14696 = vst [vmem:[#allocation43_spill] sm:$0xff] %v13344_v33  ;;  %4162 = vmatpush1.bf16.msra.mxu1 %v10636_v61  ;;  %v10637_v61 = vld [vmem:[%s14559_s5 + $0x98] sm:$0xff]  }
 0x36a   :  { %4163 = vmatprep.subr.bf16.mxu1 %v14668_v38 }
 0x36b   :  { %6718 = vmatpush1.bf16.msra.mxu0 %v13321_v30 }
 0x36c   :  { %6719 = vmatprep.subr.bf16.mxu0 %v13328_v58  ;;  %v13360_v58 = vld [vmem:[%s14557_s3 + $0x2d4] ss:$8 sps:$4 sm:$0xff]  }
 0x36d   :  { %14698 = vst [vmem:[#allocation45_spill] sm:$0xff] %v13360_v58  ;;  %4164 = vmatpush1.bf16.msra.mxu1 %v10637_v61  ;;  %v10638_v61 = vld [vmem:[%s14559_s5 + $0xa0] sm:$0xff]   ;;  %v11025_v30 = vpop.eup %11024 }
 0x36e   :  { %4165 = vmatprep.subr.bf16.mxu1 %v14668_v38 }
 0x36f   :  { %6720 = vmatpush1.bf16.msra.mxu0 %v13337_v16  ;;  %v13369_v16 = vld [vmem:[%s14557_s3 + $0x2d0] ss:$8 sps:$4 sm:$0xff]  }
 0x370   :  { %6721 = vmatprep.subr.bf16.mxu0 %v13344_v33  ;;  %14699 = vst [vmem:[#allocation46_spill] sm:$0xff] %v13369_v16  ;;  %v13376_v33 = vld [vmem:[%s14557_s3 + $0x2e4] ss:$8 sps:$4 sm:$0xff]  }
 0x371   :  { %14700 = vst [vmem:[#allocation47_spill] sm:$0xff] %v13376_v33  ;;  %4166 = vmatpush1.bf16.msra.mxu1 %v10638_v61  ;;  %v10639_v61 = vld [vmem:[%s14559_s5 + $0xa8] sm:$0xff]  }
 0x372   :  { %4167 = vmatprep.subr.bf16.mxu1 %v14668_v38 }
 0x373   :  { %6722 = vmatpush1.bf16.msra.mxu0 %v13353_v63  ;;  %v13385_v63 = vld [vmem:[%s14557_s3 + $0x2e0] ss:$8 sps:$4 sm:$0xff]  }
 0x374   :  { %6723 = vmatprep.subr.bf16.mxu0 %v13360_v58  ;;  %14701 = vst [vmem:[#allocation48_spill] sm:$0xff] %v13385_v63  ;;  %v1694_v58 = vmul.f32 0.5, %v11025_v30 }
 0x375   :  { %4168 = vmatpush1.bf16.msra.mxu1 %v10639_v61  ;;  %v10640_v61 = vld [vmem:[%s14559_s5 + $0xb0] sm:$0xff]  }
 0x376   :  { %4169 = vmatprep.subr.bf16.mxu1 %v14668_v38  ;;  %v1696_v30 = vadd.f32 0.5, %v1694_v58  ;;  %v13425_v58 = vld [vmem:[%s14557_s3 + $0x14] ss:$8 sps:$4 sm:$0xff]  }
 0x377   :  { %6724 = vmatpush1.bf16.msra.mxu0 %v13369_v16  ;;  %v13401_v16 = vld [vmem:[%s14557_s3 + $0x2f0] ss:$8 sps:$4 sm:$0xff]   ;;  %14706 = vst [vmem:[#allocation53_spill] sm:$0xff] %v13425_v58 }
 0x378   :  { %6725 = vmatprep.subr.bf16.mxu0 %v13376_v33  ;;  %14703 = vst [vmem:[#allocation50_spill] sm:$0xff] %v13401_v16  ;;  %v13408_v33 = vld [vmem:[%s14557_s3 + $0x4] ss:$8 sps:$4 sm:$0xff]   ;;  %v13419_v45 = vpack.c.bf16 %v1696_v30, %v1696_v30  ;;  %v13437_v30 = vld [vmem:[%s14557_s3 + $0x10] ss:$8 sps:$4 sm:$0xff]  }
 0x379   :  { %14704 = vst [vmem:[#allocation51_spill] sm:$0xff] %v13408_v33  ;;  %4170 = vmatpush1.bf16.msra.mxu1 %v10640_v61  ;;  %14707 = vst [vmem:[#allocation54_spill] sm:$0xff] %v13437_v30  ;;  %v13443_v61 = vld [vmem:[%s14557_s3 + $0x24] ss:$8 sps:$4 sm:$0xff]  }
 0x37a   :  { %4171 = vmatprep.subr.bf16.mxu1 %v14668_v38  ;;  %14708 = vst [vmem:[#allocation55_spill] sm:$0xff] %v13443_v61 }
 0x37b   :  { %6726 = vmatpush1.bf16.msra.mxu0 %v13385_v63  ;;  %v13417_v63 = vld [vmem:[%s14557_s3] ss:$8 sps:$4 sm:$0xff]  }
 0x37c   :  { %6727 = vmatprep.subr.bf16.mxu0 %v13392_v32  ;;  %14705 = vst [vmem:[#allocation52_spill] sm:$0xff] %v13417_v63 }
 0x37f   :  { %6728 = vmatpush1.bf16.msra.mxu0 %v13401_v16  ;;  %v10641_v16 = vld [vmem:[%s14559_s5 + $0xb8] sm:$0xff]  }
 0x380   :  { %7519 = vmatprep.subr.bf16.mxu0 %v13408_v33  ;;  %4172 = vmatpush1.bf16.msra.mxu1 %v10641_v16  ;;  %v10643_v16 = vld [vmem:[%s14559_s5 + $0xc8] sm:$0xff]  }
 0x381   :  { %4173 = vmatprep.subr.bf16.mxu1 %v14668_v38 }
 0x382   :  { %6730 = vmatmul.mubr.bf16.vlgmr.msra.gmra.mrb[44].mxu0 %v13419_v45 }
 0x383   :  { %7520 = vmatpush1.bf16.msra.mxu0 %v13417_v63  ;;  %7551 = vmatprep.mubr.bf16.mxu0 %v13192_v35  ;;  %v10642_v63 = vld [vmem:[%s14559_s5 + $0xc0] sm:$0xff]  }
 0x384   :  { %7521 = vmatprep.subr.bf16.mxu0 %v13425_v58  ;;  %v13453_v35 = vld [vmem:[%s14557_s3 + $0x20] ss:$8 sps:$4 sm:$0xff]   ;;  %v13459_v58 = vld [vmem:[%s14557_s3 + $0x34] ss:$8 sps:$4 sm:$0xff]   ;;  %4174 = vmatpush1.bf16.msra.mxu1 %v10642_v63 }
 0x385   :  { %14709 = vst [vmem:[#allocation56_spill] sm:$0xff] %v13453_v35  ;;  %14710 = vst [vmem:[#allocation57_spill] sm:$0xff] %v13459_v58  ;;  %4175 = vmatprep.subr.bf16.mxu1 %v14668_v38  ;;  %v10644_v63 = vld [vmem:[%s14559_s5 + $0xd0] sm:$0xff]  }
 0x387   :  { %7522 = vmatpush1.bf16.msra.mxu0 %v13437_v30  ;;  %v13469_v30 = vld [vmem:[%s14557_s3 + $0x30] ss:$8 sps:$4 sm:$0xff]  }
 0x388   :  { %7523 = vmatprep.subr.bf16.mxu0 %v13443_v61  ;;  %14711 = vst [vmem:[#allocation58_spill] sm:$0xff] %v13469_v30  ;;  %v13475_v61 = vld [vmem:[%s14557_s3 + $0x44] ss:$8 sps:$4 sm:$0xff]   ;;  %4176 = vmatpush1.bf16.msra.mxu1 %v10643_v16  ;;  %v10645_v16 = vld [vmem:[%s14559_s5 + $0xd8] sm:$0xff]  }
 0x389   :  { %14712 = vst [vmem:[#allocation59_spill] sm:$0xff] %v13475_v61  ;;  %4177 = vmatprep.subr.bf16.mxu1 %v14668_v38 }
 0x38b   :  { %7524 = vmatpush1.bf16.msra.mxu0 %v13453_v35  ;;  %v13485_v35 = vld [vmem:[%s14557_s3 + $0x40] ss:$8 sps:$4 sm:$0xff]  }
 0x38c   :  { %7525 = vmatprep.subr.bf16.mxu0 %v13459_v58  ;;  %v13491_v58 = vld [vmem:[%s14557_s3 + $0x54] ss:$8 sps:$4 sm:$0xff]   ;;  %4178 = vmatpush1.bf16.msra.mxu1 %v10644_v63 }
 0x38d   :  { %14713 = vst [vmem:[#allocation60_spill] sm:$0xff] %v13491_v58  ;;  %4179 = vmatprep.subr.bf16.mxu1 %v14668_v38 }
 0x38f   :  { %7526 = vmatpush1.bf16.msra.mxu0 %v13469_v30  ;;  %v13501_v30 = vld [vmem:[%s14557_s3 + $0x50] ss:$8 sps:$4 sm:$0xff]  }
 0x390   :  { %7527 = vmatprep.subr.bf16.mxu0 %v13475_v61  ;;  %4180 = vmatpush1.bf16.msra.mxu1 %v10645_v16  ;;  %v1725_v16 = vld [vmem:[%s14558_s2] sm:$0x3] }
 0x391   :  { %5057 = vmatprep.subr.bf16.mxu1 %v14668_v38 }
 0x393   :  { %7528 = vmatpush1.bf16.msra.mxu0 %v13485_v35 }
 0x394   :  { %7529 = vmatprep.subr.bf16.mxu0 %v13491_v58  ;;  %v1734_v58 = vrot.slane %v1725_v16, %v11526_v7 }
 0x395   :  { %v13504_v61 = vpop.f32.mrb[40].mxu0 }
 0x396   :  { %v13507_v63 = vpop.f32.mrb[41].mxu0 }
 0x397   :  { %v4927_v33 = vpop.f32.mrb[42].mxu0  ;;  %7530 = vmatpush1.bf16.msra.mxu0 %v13501_v30 }
 0x398   :  { %v4928_v32 = vpop.f32.mrb[43].mxu0  ;;  %7531 = vmatprep.subr.bf16.mxu0 %v12792_v28  ;;  %v14714_v33 = vld [vmem:[#allocation8_spill] sm:$0xff] }
 0x399   :  { %v1854_v32 = vadd.f32 %v14714_v33, %v1734_v58 }
 0x39b   :  { %7532 = vmatpush1.bf16.msra.mxu0 %v12803_v41  ;;  %v1859_v28 = vmul.f32 0.5, %v1854_v32 }
 0x39c   :  { %7533 = vmatprep.subr.bf16.mxu0 %v12809_v49 }
 0x39d   :  { %11026 = vtanh.f32 %v1859_v28 }
 0x39f   :  { %7534 = vmatpush1.bf16.msra.mxu0 %v12817_v51 }
 0x3a0   :  { %7535 = vmatprep.subr.bf16.mxu0 %v12823_v59 }
 0x3a3   :  { %7536 = vmatpush1.bf16.msra.mxu0 %v12836_v57  ;;  %v13554_v57 = vld [vmem:[%s14558_s2] sm:$0x3] }
 0x3a4   :  { %7537 = vmatprep.subr.bf16.mxu0 %v12846_v60  ;;  %v1730_v60 = vrot.slane %v1725_v16, %v11694_v29 }
 0x3a7   :  { %7538 = vmatpush1.bf16.msra.mxu0 %v12855_v27  ;;  %v11027_v41 = vpop.eup %11026  ;;  %v1902_v27 = vrot.slane %v13554_v57, %v11526_v7 }
 0x3a8   :  { %7539 = vmatprep.subr.bf16.mxu0 %v12862_v4  ;;  %v1863_v49 = vmul.f32 0.5, %v11027_v41  ;;  %v14715_v4 = vld [vmem:[#allocation7_spill] sm:$0xff]  ;;  %v14728_v41 = vld [vmem:[#allocation5_spill] sm:$0xff] }
 0x3aa   :  { %v1865_v51 = vadd.f32 0.5, %v1863_v49  ;;  %v14729_v49 = vld [vmem:[#allocation14_spill] sm:$0xff] }
 0x3ab   :  { %7540 = vmatpush1.bf16.msra.mxu0 %v12870_v6  ;;  %v1852_v6 = vadd.f32 %v14715_v4, %v1730_v60  ;;  %v14730_v4 = vld [vmem:[#allocation11_spill] sm:$0xff] }
 0x3ac   :  { %7541 = vmatprep.subr.bf16.mxu0 %v12876_v52  ;;  %v9993_v59 = vpack.c.bf16 %v1865_v51, %v1865_v51  ;;  %v2022_v52 = vadd.f32 %v12655_v12, %v1902_v27  ;;  %v13574_v12 = vld [vmem:[%s14560_s4] sm:$0x3] }
 0x3af   :  { %7542 = vmatpush1.bf16.msra.mxu0 %v12884_v15  ;;  %v1858_v15 = vmul.f32 0.5, %v1852_v6  ;;  %v14731_v6 = vld [vmem:[#allocation32_spill] sm:$0xff] }
 0x3b0   :  { %7543 = vmatprep.subr.bf16.mxu0 %v12890_v44  ;;  %v2027_v44 = vmul.f32 0.5, %v2022_v52  ;;  %v10647_v52 = vld [vmem:[%s14559_s5 + $0xe8] sm:$0xff]  }
 0x3b1   :  { %11028 = vtanh.f32 %v1858_v15  ;;  %v14732_v15 = vld [vmem:[#allocation33_spill] sm:$0xff] }
 0x3b2   :  { %11030 = vtanh.f32 %v2027_v44  ;;  %v14733_v44 = vld [vmem:[#allocation34_spill] sm:$0xff] }
 0x3b3   :  { %7544 = vmatpush1.bf16.msra.mxu0 %v12899_v18 }
 0x3b4   :  { %7545 = vmatprep.subr.bf16.mxu0 %v12905_v21 }
 0x3b7   :  { %7546 = vmatpush1.bf16.msra.mxu0 %v12913_v17  ;;  %v4303_v17 = vrot.slane %v13574_v12, %v11526_v7 }
 0x3b8   :  { %7547 = vmatprep.subr.bf16.mxu0 %v12919_v22 }
 0x3bb   :  { %7548 = vmatpush1.bf16.msra.mxu0 %v12927_v1  ;;  %v11029_v18 = vpop.eup %11028  ;;  %v3390_v1 = vld [vmem:[%s14560_s4] sm:$0x3] }
 0x3bc   :  { %7549 = vmatprep.subr.bf16.mxu0 %v12933_v2  ;;  %v11031_v21 = vpop.eup %11030  ;;  %v1862_v22 = vmul.f32 0.5, %v11029_v18  ;;  %v10648_v18 = vld [vmem:[%s14559_s5 + $0xf0] sm:$0xff]  }
 0x3bd   :  { %v2031_v2 = vmul.f32 0.5, %v11031_v21  ;;  %v1898_v21 = vrot.slane %v13554_v57, %v11694_v29  ;;  %v10650_v57 = vld [vmem:[%s14559_s5 + $0x100] sm:$0xff]  }
 0x3bf   :  { %7550 = vmatpush1.bf16.msra.mxu0 %v12941_v50  ;;  %v10010_v50 = vadd.f32 %v13507_v63, %v4303_v17  ;;  %v14727_v63 = vld [vmem:[#allocation24_spill] sm:$0xff]  ;;  %v14734_v17 = vld [vmem:[#allocation35_spill] sm:$0xff] }
 0x3c0   :  { %7560 = vmatprep.subr.bf16.mxu0 %v12947_v24  ;;  %v3395_v24 = vrot.slane %v3390_v1, %v11694_v29 }
 0x3c2   :  { %7552 = vmatmul.mubr.bf16.vlgmr.msra.gmra.mrb[48].mxu0 %v13419_v45 }
 0x3c3   :  { %7561 = vmatpush1.bf16.msra.mxu0 %v12955_v19  ;;  %7592 = vmatprep.mubr.bf16.mxu0 %v9993_v59  ;;  %v1864_v19 = vadd.f32 0.5, %v1862_v22  ;;  %v10646_v59 = vld [vmem:[%s14559_s5 + $0xe0] sm:$0xff]   ;;  %v14735_v22 = vld [vmem:[#allocation36_spill] sm:$0xff] }
 0x3c4   :  { %7562 = vmatprep.subr.bf16.mxu0 %v12963_v26  ;;  %v3399_v26 = vrot.slane %v3390_v1, %v11526_v7  ;;  %v10649_v1 = vld [vmem:[%s14559_s5 + $0xf8] sm:$0xff]  }
 0x3c7   :  { %7563 = vmatpush1.bf16.msra.mxu0 %v12971_v25  ;;  %v14716_v25 = vld [vmem:[#allocation15_spill] sm:$0xff] }
 0x3c8   :  { %7564 = vmatprep.subr.bf16.mxu0 %v12978_v31  ;;  %v2033_v31 = vadd.f32 0.5, %v2031_v2  ;;  %v14736_v2 = vld [vmem:[#allocation25_spill] sm:$0xff] }
 0x3cb   :  { %7565 = vmatpush1.bf16.msra.mxu0 %v12986_v0  ;;  %v4931_v0 = vmul.f32 0.5, %v10010_v50  ;;  %v2020_v50 = vadd.f32 %v14736_v2, %v1898_v21  ;;  %v10662_v21 = vld [vmem:[%s14557_s3 + $0x64] ss:$8 sps:$4 sm:$0xff]   ;;  %v10666_v2 = vld [vmem:[%s14557_s3 + $0x80] ss:$8 sps:$4 sm:$0xff]  }
 0x3cc   :  { %7566 = vmatprep.subr.bf16.mxu0 %v12992_v11  ;;  %v14717_v11 = vld [vmem:[#allocation30_spill] sm:$0xff] }
 0x3cd   :  { %11032 = vtanh.f32 %v4931_v0  ;;  %v10651_v0 = vld [vmem:[%s14559_s5 + $0x108] sm:$0xff]  }
 0x3cf   :  { %7567 = vmatpush1.bf16.msra.mxu0 %v13000_v46  ;;  %v3938_v46 = vadd.f32 %v14717_v11, %v3395_v24  ;;  %v14737_v24 = vld [vmem:[#allocation37_spill] sm:$0xff]  ;;  %v14741_v11 = vld [vmem:[#allocation40_spill] sm:$0xff] }
 0x3d0   :  { %7568 = vmatprep.subr.bf16.mxu0 %v13006_v55  ;;  %v9992_v55 = vpack.c.bf16 %v1864_v19, %v1864_v19  ;;  %v14738_v19 = vld [vmem:[#allocation38_spill] sm:$0xff] }
 0x3d3   :  { %7569 = vmatpush1.bf16.msra.mxu0 %v13014_v48  ;;  %v14718_v48 = vld [vmem:[#allocation31_spill] sm:$0xff] }
 0x3d4   :  { %7570 = vmatprep.subr.bf16.mxu0 %v13020_v14  ;;  %v3940_v14 = vadd.f32 %v14718_v48, %v3399_v26  ;;  %v2026_v26 = vmul.f32 0.5, %v2020_v50  ;;  %v10652_v48 = vld [vmem:[%s14559_s5 + $0x110] sm:$0xff]  }
 0x3d7   :  { %7571 = vmatpush1.bf16.msra.mxu0 %v13028_v34 }
 0x3d8   :  { %7572 = vmatprep.subr.bf16.mxu0 %v13034_v62  ;;  %v14719_v62 = vld [vmem:[#allocation16_spill] sm:$0xff] }
 0x3db   :  { %7573 = vmatpush1.bf16.msra.mxu0 %v13042_v3 }
 0x3dc   :  { %7574 = vmatprep.subr.bf16.mxu0 %v13048_v20 }
 0x3df   :  { %7575 = vmatpush1.bf16.msra.mxu0 %v13056_v36  ;;  %v13594_v36 = vpack.c.bf16 %v2033_v31, %v2033_v31  ;;  %v14740_v31 = vld [vmem:[#allocation39_spill] sm:$0xff] }
 0x3e0   :  { %7576 = vmatprep.subr.bf16.mxu0 %v13062_v54 }
 0x3e3   :  { %7577 = vmatpush1.bf16.msra.mxu0 %v13077_v39 }
 0x3e4   :  { %7578 = vmatprep.subr.bf16.mxu0 %v13085_v53 }
 0x3e7   :  { %7579 = vmatpush1.bf16.msra.mxu0 %v13094_v13 }
 0x3e8   :  { %7580 = vmatprep.subr.bf16.mxu0 %v13101_v5  ;;  %v14720_v5 = vld [vmem:[#allocation17_spill] sm:$0xff] }
 0x3eb   :  { %7581 = vmatpush1.bf16.msra.mxu0 %v13109_v23  ;;  %v14721_v23 = vld [vmem:[#allocation18_spill] sm:$0xff] }
 0x3ec   :  { %7582 = vmatprep.subr.bf16.mxu0 %v13115_v47  ;;  %v14722_v47 = vld [vmem:[#allocation19_spill] sm:$0xff] }
 0x3ef   :  { %7583 = vmatpush1.bf16.msra.mxu0 %v13122_v37  ;;  %v14723_v37 = vld [vmem:[#allocation20_spill] sm:$0xff] }
 0x3f0   :  { %7584 = vmatprep.subr.bf16.mxu0 %v13129_v42  ;;  %v14724_v42 = vld [vmem:[#allocation21_spill] sm:$0xff] }
 0x3f3   :  { %7585 = vmatpush1.bf16.msra.mxu0 %v13136_v43  ;;  %v11033_v43 = vpop.eup %11032 }
 0x3f4   :  { %7586 = vmatprep.subr.bf16.mxu0 %v13142_v8  ;;  %v14725_v8 = vld [vmem:[#allocation22_spill] sm:$0xff] }
 0x3f7   :  { %7587 = vmatpush1.bf16.msra.mxu0 %v13148_v40 }
 0x3f8   :  { %7588 = vmatprep.subr.bf16.mxu0 %v13154_v10  ;;  %v4935_v10 = vmul.f32 0.5, %v11033_v43  ;;  %v14751_v43 = vld [vmem:[#allocation50_spill] sm:$0xff] }
 0x3fa   :  { %v4937_v32 = vadd.f32 0.5, %v4935_v10 }
 0x3fb   :  { %7589 = vmatpush1.bf16.msra.mxu0 %v13160_v56  ;;  %v14726_v56 = vld [vmem:[#allocation23_spill] sm:$0xff] }
 0x3fc   :  { %7590 = vmatprep.subr.bf16.mxu0 %v14716_v25  ;;  %v4939_v27 = vpack.c.bf16 %v4937_v32, %v4937_v32  ;;  %v14739_v25 = vld [vmem:[#allocation13_spill] sm:$0xff]  ;;  %v14753_v32 = vld [vmem:[#allocation52_spill] sm:$0xff] }
 0x3ff   :  { %7591 = vmatpush1.bf16.msra.mxu0 %v13172_v9 }
 0x400   :  { %v4019_v34 = vpop.f32.mrb[28].mxu1  ;;  %7601 = vmatprep.subr.bf16.mxu0 %v14719_v62 }
 0x401   :  { %v10006_v3 = vadd.f32 %v4019_v34, %v3938_v46  ;;  %v4021_v20 = vpop.f32.mrb[29].mxu1  ;;  %v14742_v46 = vld [vmem:[#allocation41_spill] sm:$0xff]  ;;  %v14744_v34 = vld [vmem:[#allocation43_spill] sm:$0xff] }
 0x402   :  { %v10008_v54 = vadd.f32 %v4021_v20, %v3940_v14  ;;  %v4023_v39 = vpop.f32.mrb[30].mxu1  ;;  %7593 = vmatmul.mubr.bf16.vlgmr.msra.gmra.mrb[48].mxu0 %v9992_v55  ;;  %v4299_v55 = vrot.slane %v13574_v12, %v11694_v29  ;;  %v14743_v14 = vld [vmem:[#allocation42_spill] sm:$0xff]  ;;  %v14745_v12 = vld [vmem:[#allocation44_spill] sm:$0xff]  ;;  %v14746_v20 = vld [vmem:[#allocation45_spill] sm:$0xff] }
 0x403   :  { %v4026_v53 = vmul.f32 0.5, %v10006_v3  ;;  %v4024_v13 = vpop.f32.mrb[31].mxu1  ;;  %7602 = vmatpush1.bf16.msra.mxu0 %v14720_v5  ;;  %7633 = vmatprep.mubr.bf16.mxu0 %v13594_v36  ;;  %v10653_v3 = vld [vmem:[%s14559_s5 + $0x118] sm:$0xff]   ;;  %v14748_v5 = vld [vmem:[#allocation47_spill] sm:$0xff] }
 0x404   :  { %v4027_v9 = vmul.f32 0.5, %v10008_v54  ;;  %7603 = vmatprep.subr.bf16.mxu0 %v14721_v23  ;;  %v10009_v62 = vadd.f32 %v13504_v61, %v4299_v55  ;;  %v14747_v61 = vld [vmem:[#allocation46_spill] sm:$0xff]  ;;  %v14749_v23 = vld [vmem:[#allocation48_spill] sm:$0xff] }
 0x405   :  { %11034 = vtanh.f32 %v4026_v53  ;;  %v10654_v53 = vld [vmem:[%s14559_s5 + $0x120] sm:$0xff]  }
 0x406   :  { %11036 = vtanh.f32 %v4027_v9  ;;  %v4930_v39 = vmul.f32 0.5, %v10009_v62  ;;  %v10655_v9 = vld [vmem:[%s14559_s5 + $0x128] sm:$0xff]  }
 0x407   :  { %7604 = vmatpush1.bf16.msra.mxu0 %v14722_v47  ;;  %11038 = vtanh.f32 %v2026_v26  ;;  %v10680_v55 = vld [vmem:[%s14557_s3 + $0xc4] ss:$8 sps:$4 sm:$0xff]  }
 0x408   :  { %7605 = vmatprep.subr.bf16.mxu0 %v14723_v37  ;;  %11040 = vtanh.f32 %v4930_v39  ;;  %v14750_v37 = vld [vmem:[#allocation49_spill] sm:$0xff]  ;;  %v10686_v62 = vld [vmem:[%s14557_s3 + $0xe4] ss:$8 sps:$4 sm:$0xff]  }
 0x409   :  { %v10687_v39 = vld [vmem:[%s14557_s3 + $0xf0] ss:$8 sps:$4 sm:$0xff]  }
 0x40b   :  { %7606 = vmatpush1.bf16.msra.mxu0 %v14724_v42  ;;  %v10656_v42 = vld [vmem:[%s14559_s5 + $0x130] sm:$0xff]  }
 0x40c   :  { %7607 = vmatprep.subr.bf16.mxu0 %v14725_v8 }
 0x40f   :  { %v11035_v40 = vpop.eup %11034  ;;  %7608 = vmatpush1.bf16.msra.mxu0 %v14726_v56  ;;  %v10658_v56 = vld [vmem:[%s14559_s5 + $0x140] sm:$0xff]  }
 0x410   :  { %v11037_v45 = vpop.eup %11036  ;;  %v4030_v58 = vmul.f32 0.5, %v11035_v40  ;;  %7609 = vmatprep.subr.bf16.mxu0 %v14727_v63  ;;  %v10657_v40 = vld [vmem:[%s14559_s5 + $0x138] sm:$0xff]  }
 0x411   :  { %v4031_v16 = vmul.f32 0.5, %v11037_v45  ;;  %v11039_v54 = vpop.eup %11038 }
 0x412   :  { %v4032_v33 = vadd.f32 0.5, %v4030_v58  ;;  %v2030_v13 = vmul.f32 0.5, %v11039_v54  ;;  %v11041_v10 = vpop.eup %11040  ;;  %v10659_v58 = vld [vmem:[%s14559_s5 + $0x148] sm:$0xff]  }
 0x413   :  { %v4033_v28 = vadd.f32 0.5, %v4031_v16  ;;  %7610 = vmatpush1.bf16.msra.mxu0 %v14728_v41  ;;  %v4934_v45 = vmul.f32 0.5, %v11041_v10  ;;  %v14755_v41 = vld [vmem:[#allocation53_spill] sm:$0xff]  ;;  %v10704_v10 = vld [vmem:[%s14557_s3 + $0x144] ss:$8 sps:$4 sm:$0xff]  }
 0x414   :  { %7611 = vmatprep.subr.bf16.mxu0 %v14729_v49  ;;  %v4034_v60 = vpack.c.bf16 %v4032_v33, %v4032_v33  ;;  %v2032_v47 = vadd.f32 0.5, %v2030_v13  ;;  %v14752_v33 = vld [vmem:[#allocation51_spill] sm:$0xff]  ;;  %v14756_v49 = vld [vmem:[#allocation54_spill] sm:$0xff] }
 0x415   :  { %v4035_v51 = vpack.c.bf16 %v4033_v28, %v4033_v28  ;;  %v4936_v63 = vadd.f32 0.5, %v4934_v45  ;;  %v14754_v28 = vld [vmem:[#allocation12_spill] sm:$0xff]  ;;  %v10707_v45 = vld [vmem:[%s14557_s3 + $0x154] ss:$8 sps:$4 sm:$0xff]  }
 0x416   :  { %v13679_v8 = vpack.c.bf16 %v2032_v47, %v2032_v47  ;;  %v10690_v13 = vld [vmem:[%s14557_s3 + $0x100] ss:$8 sps:$4 sm:$0xff]   ;;  %v10693_v47 = vld [vmem:[%s14557_s3 + $0x110] ss:$8 sps:$4 sm:$0xff]  }
 0x417   :  { %9232 = vmatprep.mubr.msk.bf16.mxu1 %vm3245_vm0, %v4035_v51  ;;  %7612 = vmatpush1.bf16.msra.mxu0 %v14730_v4  ;;  %v4938_v16 = vpack.c.bf16 %v4936_v63, %v4936_v63  ;;  %v10710_v63 = vld [vmem:[%s14557_s3 + $0x164] ss:$8 sps:$4 sm:$0xff]  }
 0x418   :  { %4186 = vmatmul.mubr.bf16.vlgmr.msra.gmra.mrb[24].mxu1 %v4034_v60  ;;  %7613 = vmatprep.subr.bf16.mxu0 %v14731_v6  ;;  %v14758_v6 = vld [vmem:[#allocation56_spill] sm:$0xff] }
 0x419   :  { %5058 = vmatpush1.bf16.msra.mxu1 %v10646_v59  ;;  %9377 = vmatprep.mubr.msk.bf16.mxu1 %vm3245_vm0, %v4939_v27  ;;  %v14757_v59 = vld [vmem:[#allocation55_spill] sm:$0xff] }
 0x41a   :  { %5059 = vmatprep.subr.bf16.mxu1 %v14668_v38 }
 0x41b   :  { %7614 = vmatpush1.bf16.msra.mxu0 %v14732_v15  ;;  %v14760_v15 = vld [vmem:[#allocation58_spill] sm:$0xff] }
 0x41c   :  { %7615 = vmatprep.subr.bf16.mxu0 %v14733_v44  ;;  %v14761_v44 = vld [vmem:[#allocation59_spill] sm:$0xff] }
 0x41d   :  { %5060 = vmatpush1.bf16.msra.mxu1 %v10647_v52  ;;  %v14759_v52 = vld [vmem:[#allocation57_spill] sm:$0xff] }
 0x41e   :  { %5061 = vmatprep.subr.bf16.mxu1 %v14668_v38 }
 0x41f   :  { %7616 = vmatpush1.bf16.msra.mxu0 %v14734_v17  ;;  %v10660_v17 = vld [vmem:[%s14557_s3 + $0x60] ss:$8 sps:$4 sm:$0xff]  }
 0x420   :  { %7617 = vmatprep.subr.bf16.mxu0 %v14735_v22  ;;  %v10665_v22 = vld [vmem:[%s14557_s3 + $0x74] ss:$8 sps:$4 sm:$0xff]  }
 0x421   :  { %5062 = vmatpush1.bf16.msra.mxu1 %v10648_v18  ;;  %v14762_v18 = vld [vmem:[#allocation60_spill] sm:$0xff] }
 0x422   :  { %5063 = vmatprep.subr.bf16.mxu1 %v14668_v38 }
 0x423   :  { %7618 = vmatpush1.bf16.msra.mxu0 %v14737_v24  ;;  %v10671_v24 = vld [vmem:[%s14557_s3 + $0x94] ss:$8 sps:$4 sm:$0xff]  }
 0x424   :  { %7619 = vmatprep.subr.bf16.mxu0 %v14738_v19  ;;  %v10669_v19 = vld [vmem:[%s14557_s3 + $0x90] ss:$8 sps:$4 sm:$0xff]  }
 0x425   :  { %5064 = vmatpush1.bf16.msra.mxu1 %v10649_v1  ;;  %v10668_v1 = vld [vmem:[%s14557_s3 + $0x84] ss:$8 sps:$4 sm:$0xff]  }
 0x426   :  { %5065 = vmatprep.subr.bf16.mxu1 %v14668_v38 }
 0x427   :  { %7620 = vmatpush1.bf16.msra.mxu0 %v14739_v25  ;;  %v10674_v25 = vld [vmem:[%s14557_s3 + $0xa4] ss:$8 sps:$4 sm:$0xff]  }
 0x428   :  { %7621 = vmatprep.subr.bf16.mxu0 %v14740_v31  ;;  %v10672_v31 = vld [vmem:[%s14557_s3 + $0xa0] ss:$8 sps:$4 sm:$0xff]  }
 0x429   :  { %5066 = vmatpush1.bf16.msra.mxu1 %v10650_v57  ;;  %v14763_v57 = vld [vmem:[#allocation4_spill] sm:$0xff] }
 0x42a   :  { %5067 = vmatprep.subr.bf16.mxu1 %v14668_v38 }
 0x42b   :  { %7622 = vmatpush1.bf16.msra.mxu0 %v14741_v11  ;;  %v10677_v11 = vld [vmem:[%s14557_s3 + $0xb4] ss:$8 sps:$4 sm:$0xff]  }
 0x42c   :  { %7623 = vmatprep.subr.bf16.mxu0 %v14742_v46  ;;  %v10675_v46 = vld [vmem:[%s14557_s3 + $0xb0] ss:$8 sps:$4 sm:$0xff]  }
 0x42d   :  { %5068 = vmatpush1.bf16.msra.mxu1 %v10651_v0 }
 0x42e   :  { %5069 = vmatprep.subr.bf16.mxu1 %v14668_v38 }
 0x42f   :  { %7624 = vmatpush1.bf16.msra.mxu0 %v14743_v14  ;;  %v10683_v14 = vld [vmem:[%s14557_s3 + $0xd4] ss:$8 sps:$4 sm:$0xff]  }
 0x430   :  { %7625 = vmatprep.subr.bf16.mxu0 %v14744_v34  ;;  %v10681_v34 = vld [vmem:[%s14557_s3 + $0xd0] ss:$8 sps:$4 sm:$0xff]  }
 0x431   :  { %5070 = vmatpush1.bf16.msra.mxu1 %v10652_v48  ;;  %v10678_v48 = vld [vmem:[%s14557_s3 + $0xc0] ss:$8 sps:$4 sm:$0xff]  }
 0x432   :  { %5071 = vmatprep.subr.bf16.mxu1 %v14668_v38 }
 0x433   :  { %7626 = vmatpush1.bf16.msra.mxu0 %v14745_v12  ;;  %v10684_v12 = vld [vmem:[%s14557_s3 + $0xe0] ss:$8 sps:$4 sm:$0xff]  }
 0x434   :  { %7627 = vmatprep.subr.bf16.mxu0 %v14746_v20  ;;  %v10689_v20 = vld [vmem:[%s14557_s3 + $0xf4] ss:$8 sps:$4 sm:$0xff]  }
 0x435   :  { %5072 = vmatpush1.bf16.msra.mxu1 %v10653_v3 }
 0x436   :  { %5073 = vmatprep.subr.bf16.mxu1 %v14668_v38 }
 0x437   :  { %7628 = vmatpush1.bf16.msra.mxu0 %v14747_v61 }
 0x438   :  { %7629 = vmatprep.subr.bf16.mxu0 %v14748_v5  ;;  %v10695_v5 = vld [vmem:[%s14557_s3 + $0x114] ss:$8 sps:$4 sm:$0xff]  }
 0x439   :  { %5074 = vmatpush1.bf16.msra.mxu1 %v10654_v53  ;;  %v10692_v53 = vld [vmem:[%s14557_s3 + $0x104] ss:$8 sps:$4 sm:$0xff]  }
 0x43a   :  { %5075 = vmatprep.subr.bf16.mxu1 %v14668_v38 }
 0x43b   :  { %7630 = vmatpush1.bf16.msra.mxu0 %v14749_v23  ;;  %v14764_v23 = vld [vmem:[#allocation26_spill] sm:$0xff] }
 0x43c   :  { %7631 = vmatprep.subr.bf16.mxu0 %v14750_v37  ;;  %v10698_v37 = vld [vmem:[%s14557_s3 + $0x124] ss:$8 sps:$4 sm:$0xff]  }
 0x43d   :  { %5076 = vmatpush1.bf16.msra.mxu1 %v10655_v9 }
 0x43e   :  { %5077 = vmatprep.subr.bf16.mxu1 %v14668_v38 }
 0x43f   :  { %7632 = vmatpush1.bf16.msra.mxu0 %v14751_v43  ;;  %v10701_v43 = vld [vmem:[%s14557_s3 + $0x134] ss:$8 sps:$4 sm:$0xff]  }
 0x441   :  { %5078 = vmatpush1.bf16.msra.mxu1 %v10656_v42  ;;  %v10696_v42 = vld [vmem:[%s14557_s3 + $0x120] ss:$8 sps:$4 sm:$0xff]  }
 0x442   :  { %5079 = vmatprep.subr.bf16.mxu1 %v14668_v38  ;;  %7634 = vmatmul.mubr.bf16.vlgmr.msra.gmra.mrb[48].mxu0 %v13679_v8 }
 0x445   :  { %5080 = vmatpush1.bf16.msra.mxu1 %v10657_v40  ;;  %v10699_v40 = vld [vmem:[%s14557_s3 + $0x130] ss:$8 sps:$4 sm:$0xff]  }
 0x446   :  { %5081 = vmatprep.subr.bf16.mxu1 %v14668_v38 }
 0x449   :  { %5082 = vmatpush1.bf16.msra.mxu1 %v10658_v56  ;;  %v10702_v56 = vld [vmem:[%s14557_s3 + $0x140] ss:$8 sps:$4 sm:$0xff]  }
 0x44a   :  { %5083 = vmatprep.subr.bf16.mxu1 %v14668_v38 }
 0x44d   :  { %5084 = vmatpush1.bf16.msra.mxu1 %v10659_v58  ;;  %v10705_v58 = vld [vmem:[%s14557_s3 + $0x150] ss:$8 sps:$4 sm:$0xff]  }
 0x44e   :  { %5711 = vmatprep.subr.bf16.mxu1 %v14752_v33  ;;  %v10713_v33 = vld [vmem:[%s14557_s3 + $0x174] ss:$8 sps:$4 sm:$0xff]  }
 0x450   :  { %5090 = vmatmul.mubr.bf16.vlgmr.msra.gmra.mrb[24].mxu1 %v4938_v16  ;;  %v10708_v16 = vld [vmem:[%s14557_s3 + $0x160] ss:$8 sps:$4 sm:$0xff]  }
 0x451   :  { %5712 = vmatpush1.bf16.msra.mxu1 %v14753_v32  ;;  %5743 = vmatprep.mubr.bf16.mxu1 %v14754_v28  ;;  %v10711_v32 = vld [vmem:[%s14557_s3 + $0x170] ss:$8 sps:$4 sm:$0xff]   ;;  %v10716_v28 = vld [vmem:[%s14557_s3 + $0x184] ss:$8 sps:$4 sm:$0xff]  }
 0x452   :  { %5713 = vmatprep.subr.bf16.mxu1 %v14755_v41 }
 0x455   :  { %5714 = vmatpush1.bf16.msra.mxu1 %v14756_v49  ;;  %v13699_v51 = vpop.f32.mrb[44].mxu0  ;;  %v10714_v49 = vld [vmem:[%s14557_s3 + $0x180] ss:$8 sps:$4 sm:$0xff]  }
 0x456   :  { %5715 = vmatprep.subr.bf16.mxu1 %v14757_v59  ;;  %v13702_v60 = vpop.f32.mrb[45].mxu0  ;;  %v10719_v59 = vld [vmem:[%s14557_s3 + $0x194] ss:$8 sps:$4 sm:$0xff]  }
 0x457   :  { %v6735_v27 = vpop.f32.mrb[46].mxu0 }
 0x458   :  { %v6736_v4 = vpop.f32.mrb[47].mxu0  ;;  %v14765_v27 = vld [vmem:[#allocation3_spill] sm:$0xff] }
 0x459   :  { %5716 = vmatpush1.bf16.msra.mxu1 %v14758_v6  ;;  %v10717_v6 = vld [vmem:[%s14557_s3 + $0x190] ss:$8 sps:$4 sm:$0xff]  }
 0x45a   :  { %5717 = vmatprep.subr.bf16.mxu1 %v14759_v52  ;;  %v10722_v52 = vld [vmem:[%s14557_s3 + $0x1a4] ss:$8 sps:$4 sm:$0xff]  }
 0x45d   :  { %5718 = vmatpush1.bf16.msra.mxu1 %v14760_v15 }
 0x45e   :  { %5719 = vmatprep.subr.bf16.mxu1 %v14761_v44  ;;  %v10720_v44 = vld [vmem:[%s14557_s3 + $0x1a0] ss:$8 sps:$4 sm:$0xff]  }
 0x461   :  { %5720 = vmatpush1.bf16.msra.mxu1 %v13485_v35  ;;  %v10663_v35 = vld [vmem:[%s14557_s3 + $0x70] ss:$8 sps:$4 sm:$0xff]  }
 0x462   :  { %5721 = vmatprep.subr.bf16.mxu1 %v14762_v18  ;;  %v10725_v18 = vld [vmem:[%s14557_s3 + $0x1b4] ss:$8 sps:$4 sm:$0xff]  }
 0x465   :  { %5722 = vmatpush1.bf16.msra.mxu1 %v13501_v30  ;;  %v13729_v30 = vld [vmem:[%s14558_s2] sm:$0x3] }
 0x466   :  { %5723 = vmatprep.subr.bf16.mxu1 %v10662_v21  ;;  %v1062_v50 = vrot.slane %v13729_v30, %v11526_v7  ;;  %v1058_v41 = vrot.slane %v13729_v30, %v11694_v29  ;;  %v10723_v21 = vld [vmem:[%s14557_s3 + $0x1b0] ss:$8 sps:$4 sm:$0xff]   ;;  %v10734_v30 = vld [vmem:[%s14557_s3 + $0x1e4] ss:$8 sps:$4 sm:$0xff]  }
 0x468   :  { %v1182_v26 = vadd.f32 %v14763_v57, %v1062_v50  ;;  %v1180_v4 = vadd.f32 %v14765_v27, %v1058_v41  ;;  %v10732_v50 = vld [vmem:[%s14557_s3 + $0x1e0] ss:$8 sps:$4 sm:$0xff]   ;;  %v10735_v57 = vld [vmem:[%s14557_s3 + $0x1f0] ss:$8 sps:$4 sm:$0xff]  }
 0x469   :  { %5724 = vmatpush1.bf16.msra.mxu1 %v10660_v17  ;;  %v10728_v17 = vld [vmem:[%s14557_s3 + $0x1c4] ss:$8 sps:$4 sm:$0xff]   ;;  %v14767_v41 = vld [vmem:[#allocation6_spill] sm:$0xff] }
 0x46a   :  { %5725 = vmatprep.subr.bf16.mxu1 %v10665_v22  ;;  %v1187_v0 = vmul.f32 0.5, %v1182_v26  ;;  %v1186_v15 = vmul.f32 0.5, %v1180_v4  ;;  %v10726_v22 = vld [vmem:[%s14557_s3 + $0x1c0] ss:$8 sps:$4 sm:$0xff]  }
 0x46b   :  { %v10788_v27 = vld [vmem:[%s14559_s5 + $0x160] sm:$0xff]  }
 0x46c   :  { %11042 = vtanh.f32 %v1187_v0 }
 0x46d   :  { %5726 = vmatpush1.bf16.msra.mxu1 %v10663_v35  ;;  %11044 = vtanh.f32 %v1186_v15  ;;  %v10731_v35 = vld [vmem:[%s14557_s3 + $0x1d4] ss:$8 sps:$4 sm:$0xff]   ;;  %v10789_v15 = vld [vmem:[%s14559_s5 + $0x168] sm:$0xff]  }
 0x46e   :  { %5727 = vmatprep.subr.bf16.mxu1 %v10668_v1  ;;  %v10729_v1 = vld [vmem:[%s14557_s3 + $0x1d0] ss:$8 sps:$4 sm:$0xff]  }
 0x471   :  { %5728 = vmatpush1.bf16.msra.mxu1 %v10666_v2 }
 0x472   :  { %5729 = vmatprep.subr.bf16.mxu1 %v10671_v24 }
 0x475   :  { %5730 = vmatpush1.bf16.msra.mxu1 %v10669_v19  ;;  %v10737_v19 = vld [vmem:[%s14557_s3 + $0x1f4] ss:$8 sps:$4 sm:$0xff]  }
 0x476   :  { %5731 = vmatprep.subr.bf16.mxu1 %v10674_v25  ;;  %v11043_v3 = vpop.eup %11042  ;;  %v10740_v25 = vld [vmem:[%s14557_s3 + $0x204] ss:$8 sps:$4 sm:$0xff]  }
 0x477   :  { %v1191_v54 = vmul.f32 0.5, %v11043_v3  ;;  %v11045_v2 = vpop.eup %11044  ;;  %v10752_v3 = vld [vmem:[%s14557_s3 + $0x244] ss:$8 sps:$4 sm:$0xff]  }
 0x478   :  { %v1190_v24 = vmul.f32 0.5, %v11045_v2  ;;  %v10798_v2 = vld [vmem:[%s14559_s5 + $0x1b0] sm:$0xff]  }
 0x479   :  { %5732 = vmatpush1.bf16.msra.mxu1 %v10672_v31  ;;  %v1193_v61 = vadd.f32 0.5, %v1191_v54  ;;  %v10738_v31 = vld [vmem:[%s14557_s3 + $0x200] ss:$8 sps:$4 sm:$0xff]   ;;  %v10753_v54 = vld [vmem:[%s14557_s3 + $0x250] ss:$8 sps:$4 sm:$0xff]  }
 0x47a   :  { %5733 = vmatprep.subr.bf16.mxu1 %v10677_v11  ;;  %v1192_v26 = vadd.f32 0.5, %v1190_v24  ;;  %v10743_v11 = vld [vmem:[%s14557_s3 + $0x214] ss:$8 sps:$4 sm:$0xff]   ;;  %v6102_v24 = vld [vmem:[%s14560_s4] sm:$0x3] }
 0x47b   :  { %v9985_v9 = vpack.c.bf16 %v1193_v61, %v1193_v61  ;;  %v10761_v61 = vld [vmem:[%s14557_s3 + $0x274] ss:$8 sps:$4 sm:$0xff]  }
 0x47c   :  { %v9984_v0 = vpack.c.bf16 %v1192_v26, %v1192_v26  ;;  %v5198_v26 = vld [vmem:[%s14560_s4] sm:$0x3] }
 0x47d   :  { %5734 = vmatpush1.bf16.msra.mxu1 %v10675_v46  ;;  %v14766_v46 = vld [vmem:[#allocation27_spill] sm:$0xff] }
 0x47e   :  { %5735 = vmatprep.subr.bf16.mxu1 %v10680_v55  ;;  %v10741_v55 = vld [vmem:[%s14557_s3 + $0x210] ss:$8 sps:$4 sm:$0xff]  }
 0x481   :  { %5736 = vmatpush1.bf16.msra.mxu1 %v10678_v48  ;;  %v10746_v48 = vld [vmem:[%s14557_s3 + $0x224] ss:$8 sps:$4 sm:$0xff]  }
 0x482   :  { %5737 = vmatprep.subr.bf16.mxu1 %v10683_v14  ;;  %v10744_v14 = vld [vmem:[%s14557_s3 + $0x220] ss:$8 sps:$4 sm:$0xff]  }
 0x485   :  { %5738 = vmatpush1.bf16.msra.mxu1 %v10681_v34  ;;  %v10749_v34 = vld [vmem:[%s14557_s3 + $0x234] ss:$8 sps:$4 sm:$0xff]  }
 0x486   :  { %5739 = vmatprep.subr.bf16.mxu1 %v10686_v62  ;;  %v10747_v62 = vld [vmem:[%s14557_s3 + $0x230] ss:$8 sps:$4 sm:$0xff]  }
 0x489   :  { %5740 = vmatpush1.bf16.msra.mxu1 %v10684_v12  ;;  %v10750_v12 = vld [vmem:[%s14557_s3 + $0x240] ss:$8 sps:$4 sm:$0xff]  }
 0x48a   :  { %5741 = vmatprep.subr.bf16.mxu1 %v10689_v20  ;;  %v10755_v20 = vld [vmem:[%s14557_s3 + $0x254] ss:$8 sps:$4 sm:$0xff]  }
 0x48d   :  { %5742 = vmatpush1.bf16.msra.mxu1 %v10687_v39  ;;  %v10758_v39 = vld [vmem:[%s14557_s3 + $0x264] ss:$8 sps:$4 sm:$0xff]  }
 0x48e   :  { %5752 = vmatprep.subr.bf16.mxu1 %v10692_v53  ;;  %v10756_v53 = vld [vmem:[%s14557_s3 + $0x260] ss:$8 sps:$4 sm:$0xff]  }
 0x490   :  { %5744 = vmatmul.mubr.bf16.vlgmr.msra.gmra.mrb[32].mxu1 %v14764_v23  ;;  %v10767_v23 = vld [vmem:[%s14557_s3 + $0x294] ss:$8 sps:$4 sm:$0xff]  }
 0x491   :  { %5753 = vmatpush1.bf16.msra.mxu1 %v10690_v13  ;;  %5784 = vmatprep.mubr.bf16.mxu1 %v9985_v9  ;;  %v10759_v13 = vld [vmem:[%s14557_s3 + $0x270] ss:$8 sps:$4 sm:$0xff]   ;;  %v10762_v9 = vld [vmem:[%s14557_s3 + $0x280] ss:$8 sps:$4 sm:$0xff]  }
 0x492   :  { %5754 = vmatprep.subr.bf16.mxu1 %v10695_v5  ;;  %v10764_v5 = vld [vmem:[%s14557_s3 + $0x284] ss:$8 sps:$4 sm:$0xff]  }
 0x495   :  { %5755 = vmatpush1.bf16.msra.mxu1 %v10693_v47  ;;  %v10765_v47 = vld [vmem:[%s14557_s3 + $0x290] ss:$8 sps:$4 sm:$0xff]  }
 0x496   :  { %5756 = vmatprep.subr.bf16.mxu1 %v10698_v37  ;;  %v10770_v37 = vld [vmem:[%s14557_s3 + $0x2a4] ss:$8 sps:$4 sm:$0xff]  }
 0x499   :  { %5757 = vmatpush1.bf16.msra.mxu1 %v10696_v42  ;;  %v10768_v42 = vld [vmem:[%s14557_s3 + $0x2a0] ss:$8 sps:$4 sm:$0xff]  }
 0x49a   :  { %5758 = vmatprep.subr.bf16.mxu1 %v10701_v43  ;;  %v10773_v43 = vld [vmem:[%s14557_s3 + $0x2b4] ss:$8 sps:$4 sm:$0xff]  }
 0x49d   :  { %5759 = vmatpush1.bf16.msra.mxu1 %v10699_v40  ;;  %v10771_v40 = vld [vmem:[%s14557_s3 + $0x2b0] ss:$8 sps:$4 sm:$0xff]  }
 0x49e   :  { %5760 = vmatprep.subr.bf16.mxu1 %v10704_v10  ;;  %v10776_v10 = vld [vmem:[%s14557_s3 + $0x2c4] ss:$8 sps:$4 sm:$0xff]  }
 0x4a1   :  { %5761 = vmatpush1.bf16.msra.mxu1 %v10702_v56  ;;  %v10774_v56 = vld [vmem:[%s14557_s3 + $0x2c0] ss:$8 sps:$4 sm:$0xff]  }
 0x4a2   :  { %5762 = vmatprep.subr.bf16.mxu1 %v10707_v45  ;;  %v10779_v45 = vld [vmem:[%s14557_s3 + $0x2d4] ss:$8 sps:$4 sm:$0xff]  }
 0x4a5   :  { %5763 = vmatpush1.bf16.msra.mxu1 %v10705_v58  ;;  %v10777_v58 = vld [vmem:[%s14557_s3 + $0x2d0] ss:$8 sps:$4 sm:$0xff]  }
 0x4a6   :  { %5764 = vmatprep.subr.bf16.mxu1 %v10710_v63  ;;  %v10782_v63 = vld [vmem:[%s14557_s3 + $0x2e4] ss:$8 sps:$4 sm:$0xff]  }
 0x4a9   :  { %5765 = vmatpush1.bf16.msra.mxu1 %v10708_v16  ;;  %v10780_v16 = vld [vmem:[%s14557_s3 + $0x2e0] ss:$8 sps:$4 sm:$0xff]  }
 0x4aa   :  { %5766 = vmatprep.subr.bf16.mxu1 %v10713_v33  ;;  %v10785_v33 = vld [vmem:[%s14557_s3 + $0x2f4] ss:$8 sps:$4 sm:$0xff]  }
 0x4ad   :  { %5767 = vmatpush1.bf16.msra.mxu1 %v10711_v32  ;;  %v10783_v32 = vld [vmem:[%s14557_s3 + $0x2f0] ss:$8 sps:$4 sm:$0xff]  }
 0x4ae   :  { %5768 = vmatprep.subr.bf16.mxu1 %v10716_v28  ;;  %v10786_v28 = vld [vmem:[%s14559_s5 + $0x150] sm:$0xff]  }
 0x4b1   :  { %5769 = vmatpush1.bf16.msra.mxu1 %v10714_v49  ;;  %v10787_v49 = vld [vmem:[%s14559_s5 + $0x158] sm:$0xff]  }
 0x4b2   :  { %5770 = vmatprep.subr.bf16.mxu1 %v10719_v59 }
 0x4b5   :  { %5771 = vmatpush1.bf16.msra.mxu1 %v10717_v6 }
 0x4b6   :  { %5772 = vmatprep.subr.bf16.mxu1 %v10722_v52 }
 0x4b9   :  { %5773 = vmatpush1.bf16.msra.mxu1 %v10720_v44  ;;  %v10790_v44 = vld [vmem:[%s14559_s5 + $0x170] sm:$0xff]  }
 0x4ba   :  { %5774 = vmatprep.subr.bf16.mxu1 %v10725_v18  ;;  %v10791_v18 = vld [vmem:[%s14559_s5 + $0x178] sm:$0xff]  }
 0x4bd   :  { %5775 = vmatpush1.bf16.msra.mxu1 %v10723_v21  ;;  %v10792_v21 = vld [vmem:[%s14559_s5 + $0x180] sm:$0xff]  }
 0x4be   :  { %5776 = vmatprep.subr.bf16.mxu1 %v10728_v17  ;;  %v10793_v17 = vld [vmem:[%s14559_s5 + $0x188] sm:$0xff]  }
 0x4c1   :  { %5777 = vmatpush1.bf16.msra.mxu1 %v10726_v22  ;;  %v10794_v22 = vld [vmem:[%s14559_s5 + $0x190] sm:$0xff]  }
 0x4c2   :  { %5778 = vmatprep.subr.bf16.mxu1 %v10731_v35  ;;  %v10795_v35 = vld [vmem:[%s14559_s5 + $0x198] sm:$0xff]  }
 0x4c5   :  { %5779 = vmatpush1.bf16.msra.mxu1 %v10729_v1  ;;  %v10796_v1 = vld [vmem:[%s14559_s5 + $0x1a0] sm:$0xff]  }
 0x4c6   :  { %5780 = vmatprep.subr.bf16.mxu1 %v10734_v30  ;;  %v10797_v30 = vld [vmem:[%s14559_s5 + $0x1a8] sm:$0xff]  }
 0x4c9   :  { %5781 = vmatpush1.bf16.msra.mxu1 %v10732_v50  ;;  %v10799_v50 = vld [vmem:[%s14559_s5 + $0x1b8] sm:$0xff]  }
 0x4ca   :  { %5782 = vmatprep.subr.bf16.mxu1 %v10737_v19  ;;  %v6111_v19 = vrot.slane %v6102_v24, %v11526_v7 }
 0x4cd   :  { %5783 = vmatpush1.bf16.msra.mxu1 %v10735_v57  ;;  %v10014_v57 = vadd.f32 %v13702_v60, %v6111_v19  ;;  %v10817_v19 = vld [vmem:[%s14559_s5 + $0x248] sm:$0xff]  }
 0x4ce   :  { %5793 = vmatprep.subr.bf16.mxu1 %v10740_v25  ;;  %v5203_v25 = vrot.slane %v5198_v26, %v11694_v29 }
 0x4d0   :  { %5785 = vmatmul.mubr.bf16.vlgmr.msra.gmra.mrb[32].mxu1 %v9984_v0  ;;  %v5207_v0 = vrot.slane %v5198_v26, %v11526_v7  ;;  %v10819_v26 = vld [vmem:[%s14559_s5 + $0x258] sm:$0xff]  }
 0x4d1   :  { %5794 = vmatpush1.bf16.msra.mxu1 %v10738_v31  ;;  %5825 = vmatprep.mubr.bf16.mxu1 %v14766_v46  ;;  %v6739_v31 = vmul.f32 0.5, %v10014_v57  ;;  %v10818_v57 = vld [vmem:[%s14559_s5 + $0x250] sm:$0xff]  }
 0x4d2   :  { %5795 = vmatprep.subr.bf16.mxu1 %v10743_v11 }
 0x4d3   :  { %11046 = vtanh.f32 %v6739_v31  ;;  %v10820_v31 = vld [vmem:[%s14559_s5 + $0x260] sm:$0xff]  }
 0x4d5   :  { %5796 = vmatpush1.bf16.msra.mxu1 %v10741_v55 }
 0x4d6   :  { %5797 = vmatprep.subr.bf16.mxu1 %v10746_v48 }
 0x4d9   :  { %5798 = vmatpush1.bf16.msra.mxu1 %v10744_v14 }
 0x4da   :  { %5799 = vmatprep.subr.bf16.mxu1 %v10749_v34 }
 0x4dd   :  { %5800 = vmatpush1.bf16.msra.mxu1 %v10747_v62  ;;  %v11047_v60 = vpop.eup %11046 }
 0x4de   :  { %5801 = vmatprep.subr.bf16.mxu1 %v10752_v3 }
 0x4e1   :  { %5802 = vmatpush1.bf16.msra.mxu1 %v10750_v12 }
 0x4e2   :  { %5803 = vmatprep.subr.bf16.mxu1 %v10755_v20  ;;  %v6743_v20 = vmul.f32 0.5, %v11047_v60  ;;  %v10827_v60 = vld [vmem:[%s14559_s5 + $0x298] sm:$0xff]  }
 0x4e5   :  { %5804 = vmatpush1.bf16.msra.mxu1 %v10753_v54 }
 0x4e6   :  { %5805 = vmatprep.subr.bf16.mxu1 %v10758_v39 }
 0x4e9   :  { %5806 = vmatpush1.bf16.msra.mxu1 %v10756_v53 }
 0x4ea   :  { %5807 = vmatprep.subr.bf16.mxu1 %v10761_v61 }
 0x4ed   :  { %5808 = vmatpush1.bf16.msra.mxu1 %v10759_v13  ;;  %v6745_v13 = vadd.f32 0.5, %v6743_v20  ;;  %v10830_v20 = vld [vmem:[%s14557_s3 + $0x4] ss:$8 sps:$4 sm:$0xff]  }
 0x4ee   :  { %5809 = vmatprep.subr.bf16.mxu1 %v10764_v5 }
 0x4f1   :  { %5810 = vmatpush1.bf16.msra.mxu1 %v10762_v9 }
 0x4f2   :  { %5811 = vmatprep.subr.bf16.mxu1 %v10767_v23  ;;  %v10800_v23 = vld [vmem:[%s14559_s5 + $0x1c0] sm:$0xff]  }
 0x4f5   :  { %5812 = vmatpush1.bf16.msra.mxu1 %v10765_v47 }
 0x4f6   :  { %5813 = vmatprep.subr.bf16.mxu1 %v10770_v37  ;;  %v6747_v37 = vpack.c.bf16 %v6745_v13, %v6745_v13  ;;  %v10836_v13 = vld [vmem:[%s14557_s3 + $0x24] ss:$8 sps:$4 sm:$0xff]  }
 0x4f9   :  { %5814 = vmatpush1.bf16.msra.mxu1 %v10768_v42  ;;  %v10801_v42 = vld [vmem:[%s14559_s5 + $0x1c8] sm:$0xff]  }
 0x4fa   :  { %5815 = vmatprep.subr.bf16.mxu1 %v10773_v43  ;;  %v10802_v43 = vld [vmem:[%s14559_s5 + $0x1d0] sm:$0xff]  }
 0x4fd   :  { %5816 = vmatpush1.bf16.msra.mxu1 %v10771_v40  ;;  %v10803_v40 = vld [vmem:[%s14559_s5 + $0x1d8] sm:$0xff]  }
 0x4fe   :  { %5817 = vmatprep.subr.bf16.mxu1 %v10776_v10  ;;  %v10804_v10 = vld [vmem:[%s14559_s5 + $0x1e0] sm:$0xff]  }
 0x501   :  { %5818 = vmatpush1.bf16.msra.mxu1 %v10774_v56  ;;  %v10805_v56 = vld [vmem:[%s14559_s5 + $0x1e8] sm:$0xff]  }
 0x502   :  { %5819 = vmatprep.subr.bf16.mxu1 %v10779_v45  ;;  %v14076_v45 = vld [vmem:[%s14560_s4] sm:$0x3] }
 0x505   :  { %5820 = vmatpush1.bf16.msra.mxu1 %v10777_v58  ;;  %v6107_v58 = vrot.slane %v6102_v24, %v11694_v29  ;;  %v10816_v24 = vld [vmem:[%s14559_s5 + $0x240] sm:$0xff]  }
 0x506   :  { %5821 = vmatprep.subr.bf16.mxu1 %v10782_v63  ;;  %v10806_v63 = vld [vmem:[%s14559_s5 + $0x1f0] sm:$0xff]  }
 0x509   :  { %5822 = vmatpush1.bf16.msra.mxu1 %v10780_v16  ;;  %v7015_v16 = vrot.slane %v14076_v45, %v11526_v7 }
 0x50a   :  { %5823 = vmatprep.subr.bf16.mxu1 %v10785_v33  ;;  %v10013_v33 = vadd.f32 %v13699_v51, %v6107_v58  ;;  %v10809_v51 = vld [vmem:[%s14559_s5 + $0x208] sm:$0xff]   ;;  %v14230_v58 = vld [vmem:[%s14558_s2] sm:$0x3] }
 0x50d   :  { %5824 = vmatpush1.bf16.msra.mxu1 %v10783_v32  ;;  %v10807_v32 = vld [vmem:[%s14559_s5 + $0x1f8] sm:$0xff]  }
 0x50e   :  { %5961 = vmatprep.subr.bf16.mxu1 %v14668_v38 }
 0x510   :  { %5826 = vmatmul.mubr.bf16.vlgmr.msra.gmra.mrb[32].mxu1 %v14767_v41  ;;  %v6738_v41 = vmul.f32 0.5, %v10013_v33  ;;  %v10857_v33 = vld [vmem:[%s14557_s3 + $0x94] ss:$8 sps:$4 sm:$0xff]  }
 0x511   :  { %5962 = vmatpush1.bf16.msra.mxu1 %v10786_v28 }
 0x512   :  { %5963 = vmatprep.subr.bf16.mxu1 %v14668_v38 }
 0x515   :  { %v13985_v59 = vpop.f32.mrb[48].mxu0  ;;  %5964 = vmatpush1.bf16.msra.mxu1 %v10787_v49  ;;  %v10808_v49 = vld [vmem:[%s14559_s5 + $0x200] sm:$0xff]  }
 0x516   :  { %v13990_v4 = vpop.f32.mrb[49].mxu0  ;;  %5965 = vmatprep.subr.bf16.mxu1 %v14668_v38 }
 0x517   :  { %v7639_v6 = vpop.f32.mrb[50].mxu0  ;;  %v10016_v28 = vadd.f32 %v13990_v4, %v7015_v16  ;;  %v10810_v4 = vld [vmem:[%s14559_s5 + $0x210] sm:$0xff]   ;;  %v2070_v16 = vrot.slane %v14230_v58, %v11526_v7 }
 0x518   :  { %v7640_v52 = vpop.f32.mrb[51].mxu0  ;;  %v10811_v6 = vld [vmem:[%s14559_s5 + $0x218] sm:$0xff]  }
 0x519   :  { %5966 = vmatpush1.bf16.msra.mxu1 %v10788_v27  ;;  %v7643_v27 = vmul.f32 0.5, %v10016_v28  ;;  %v14768_v28 = vld [vmem:[#allocation10_spill] sm:$0xff] }
 0x51a   :  { %5967 = vmatprep.subr.bf16.mxu1 %v14668_v38 }
 0x51d   :  { %5968 = vmatpush1.bf16.msra.mxu1 %v10789_v15 }
 0x51e   :  { %5969 = vmatprep.subr.bf16.mxu1 %v14668_v38 }
 0x521   :  { %5970 = vmatpush1.bf16.msra.mxu1 %v10790_v44  ;;  %v10812_v44 = vld [vmem:[%s14559_s5 + $0x220] sm:$0xff]  }
 0x522   :  { %5971 = vmatprep.subr.bf16.mxu1 %v14668_v38 }
 0x525   :  { %5972 = vmatpush1.bf16.msra.mxu1 %v10791_v18 }
 0x526   :  { %5973 = vmatprep.subr.bf16.mxu1 %v14668_v38 }
 0x529   :  { %5974 = vmatpush1.bf16.msra.mxu1 %v10792_v21 }
 0x52a   :  { %5975 = vmatprep.subr.bf16.mxu1 %v14668_v38 }
 0x52d   :  { %5976 = vmatpush1.bf16.msra.mxu1 %v10793_v17  ;;  %v10813_v17 = vld [vmem:[%s14559_s5 + $0x228] sm:$0xff]  }
 0x52e   :  { %5977 = vmatprep.subr.bf16.mxu1 %v14668_v38 }
 0x531   :  { %5978 = vmatpush1.bf16.msra.mxu1 %v10794_v22 }
 0x532   :  { %5979 = vmatprep.subr.bf16.mxu1 %v14668_v38 }
 0x535   :  { %5980 = vmatpush1.bf16.msra.mxu1 %v10795_v35 }
 0x536   :  { %5981 = vmatprep.subr.bf16.mxu1 %v14668_v38 }
 0x539   :  { %5982 = vmatpush1.bf16.msra.mxu1 %v10796_v1  ;;  %v10814_v1 = vld [vmem:[%s14559_s5 + $0x230] sm:$0xff]  }
 0x53a   :  { %5983 = vmatprep.subr.bf16.mxu1 %v14668_v38 }
 0x53d   :  { %5984 = vmatpush1.bf16.msra.mxu1 %v10797_v30 }
 0x53e   :  { %5985 = vmatprep.subr.bf16.mxu1 %v14668_v38 }
 0x541   :  { %5986 = vmatpush1.bf16.msra.mxu1 %v10798_v2 }
 0x542   :  { %5987 = vmatprep.subr.bf16.mxu1 %v14668_v38 }
 0x545   :  { %5988 = vmatpush1.bf16.msra.mxu1 %v10799_v50  ;;  %v10815_v50 = vld [vmem:[%s14559_s5 + $0x238] sm:$0xff]  }
 0x546   :  { %6865 = vmatprep.subr.bf16.mxu1 %v14668_v38 }
 0x5e3   :  { %v5827_v11 = vpop.f32.mrb[32].mxu1 }
 0x5e4   :  { %v10011_v46 = vadd.f32 %v5827_v11, %v5203_v25  ;;  %v5829_v55 = vpop.f32.mrb[33].mxu1  ;;  %v7011_v25 = vrot.slane %v14076_v45, %v11694_v29  ;;  %v10821_v11 = vld [vmem:[%s14559_s5 + $0x268] sm:$0xff]  }
 0x5e5   :  { %v10012_v48 = vadd.f32 %v5829_v55, %v5207_v0  ;;  %v5831_v14 = vpop.f32.mrb[34].mxu1  ;;  %v10822_v55 = vld [vmem:[%s14559_s5 + $0x270] sm:$0xff]   ;;  %v10854_v45 = vld [vmem:[%s14557_s3 + $0x84] ss:$8 sps:$4 sm:$0xff]  }
 0x5e6   :  { %v5834_v34 = vmul.f32 0.5, %v10011_v46  ;;  %v5832_v62 = vpop.f32.mrb[35].mxu1  ;;  %v10015_v0 = vadd.f32 %v13985_v59, %v7011_v25  ;;  %v10823_v59 = vld [vmem:[%s14559_s5 + $0x278] sm:$0xff]   ;;  %v10825_v14 = vld [vmem:[%s14559_s5 + $0x288] sm:$0xff]  }
 0x5e7   :  { %v5835_v3 = vmul.f32 0.5, %v10012_v48  ;;  %v10824_v48 = vld [vmem:[%s14559_s5 + $0x280] sm:$0xff]   ;;  %v10826_v62 = vld [vmem:[%s14559_s5 + $0x290] sm:$0xff]  }
 0x5e8   :  { %11048 = vtanh.f32 %v5834_v34  ;;  %v7642_v46 = vmul.f32 0.5, %v10015_v0  ;;  %v10884_v25 = vld [vmem:[%s14557_s3 + $0x124] ss:$8 sps:$4 sm:$0xff]   ;;  %v10885_v0 = vld [vmem:[%s14557_s3 + $0x130] ss:$8 sps:$4 sm:$0xff]  }
 0x5e9   :  { %11050 = vtanh.f32 %v5835_v3 }
 0x5ea   :  { %11052 = vtanh.f32 %v6738_v41  ;;  %v2190_v41 = vadd.f32 %v14768_v28, %v2070_v16  ;;  %v10923_v28 = vld [vmem:[%s14557_s3 + $0x1f4] ss:$8 sps:$4 sm:$0xff]  }
 0x5eb   :  { %11054 = vtanh.f32 %v7643_v27  ;;  %v10858_v27 = vld [vmem:[%s14557_s3 + $0xa0] ss:$8 sps:$4 sm:$0xff]  }
 0x5ec   :  { %11056 = vtanh.f32 %v7642_v46  ;;  %v10888_v46 = vld [vmem:[%s14557_s3 + $0x140] ss:$8 sps:$4 sm:$0xff]  }
 0x5f2   :  { %v11049_v12 = vpop.eup %11048 }
 0x5f3   :  { %v11051_v54 = vpop.eup %11050  ;;  %v5838_v39 = vmul.f32 0.5, %v11049_v12 }
 0x5f4   :  { %v5839_v53 = vmul.f32 0.5, %v11051_v54  ;;  %v11053_v52 = vpop.eup %11052  ;;  %v10828_v54 = vld [vmem:[%s14557_s3] ss:$8 sps:$4 sm:$0xff]  }
 0x5f5   :  { %v5840_v61 = vadd.f32 0.5, %v5838_v39  ;;  %v11055_v15 = vpop.eup %11054  ;;  %v6742_v18 = vmul.f32 0.5, %v11053_v52  ;;  %v10866_v52 = vld [vmem:[%s14557_s3 + $0xc4] ss:$8 sps:$4 sm:$0xff]  }
 0x5f6   :  { %v5841_v5 = vadd.f32 0.5, %v5839_v53  ;;  %v7647_v21 = vmul.f32 0.5, %v11055_v15  ;;  %v11057_v34 = vpop.eup %11056  ;;  %v10833_v53 = vld [vmem:[%s14557_s3 + $0x14] ss:$8 sps:$4 sm:$0xff]   ;;  %v10864_v15 = vld [vmem:[%s14557_s3 + $0xc0] ss:$8 sps:$4 sm:$0xff]  }
 0x5f7   :  { %v5842_v47 = vpack.c.bf16 %v5840_v61, %v5840_v61  ;;  %v6744_v22 = vadd.f32 0.5, %v6742_v18  ;;  %v7646_v3 = vmul.f32 0.5, %v11057_v34  ;;  %v10831_v61 = vld [vmem:[%s14557_s3 + $0x10] ss:$8 sps:$4 sm:$0xff]   ;;  %v10899_v34 = vld [vmem:[%s14557_s3 + $0x174] ss:$8 sps:$4 sm:$0xff]  }
 0x5f8   :  { %v5843_v9 = vpack.c.bf16 %v5841_v5, %v5841_v5  ;;  %v7649_v35 = vadd.f32 0.5, %v7647_v21  ;;  %v10834_v5 = vld [vmem:[%s14557_s3 + $0x20] ss:$8 sps:$4 sm:$0xff]   ;;  %v10867_v18 = vld [vmem:[%s14557_s3 + $0xd0] ss:$8 sps:$4 sm:$0xff]  }
 0x5f9   :  { %v6746_v30 = vpack.c.bf16 %v6744_v22, %v6744_v22  ;;  %v7648_v12 = vadd.f32 0.5, %v7646_v3  ;;  %v10872_v21 = vld [vmem:[%s14557_s3 + $0xe4] ss:$8 sps:$4 sm:$0xff]   ;;  %v10870_v22 = vld [vmem:[%s14557_s3 + $0xe0] ss:$8 sps:$4 sm:$0xff]  }
 0x5fa   :  { %9522 = vmatprep.mubr.msk.bf16.mxu1 %vm3245_vm0, %v5843_v9  ;;  %v7651_v2 = vpack.c.bf16 %v7649_v35, %v7649_v35  ;;  %v10839_v9 = vld [vmem:[%s14557_s3 + $0x34] ss:$8 sps:$4 sm:$0xff]   ;;  %v10902_v3 = vld [vmem:[%s14557_s3 + $0x184] ss:$8 sps:$4 sm:$0xff]  }
 0x5fb   :  { %5994 = vmatmul.mubr.bf16.vlgmr.msra.gmra.mrb[24].mxu1 %v5842_v47  ;;  %v7650_v39 = vpack.c.bf16 %v7648_v12, %v7648_v12  ;;  %v10840_v47 = vld [vmem:[%s14557_s3 + $0x40] ss:$8 sps:$4 sm:$0xff]   ;;  %v10875_v35 = vld [vmem:[%s14557_s3 + $0xf4] ss:$8 sps:$4 sm:$0xff]   ;;  %v2066_v12 = vrot.slane %v14230_v58, %v11694_v29  ;;  %v10920_v58 = vld [vmem:[%s14557_s3 + $0x1e4] ss:$8 sps:$4 sm:$0xff]  }
 0x5fc   :  { %6866 = vmatpush1.bf16.msra.mxu1 %v10800_v23  ;;  %9667 = vmatprep.mubr.msk.bf16.mxu1 %vm3245_vm0, %v6747_v37  ;;  %v10842_v23 = vld [vmem:[%s14557_s3 + $0x44] ss:$8 sps:$4 sm:$0xff]   ;;  %v10845_v37 = vld [vmem:[%s14557_s3 + $0x54] ss:$8 sps:$4 sm:$0xff]  }
 0x5fd   :  { %6867 = vmatprep.subr.bf16.mxu1 %v14668_v38 }
 0x600   :  { %6868 = vmatpush1.bf16.msra.mxu1 %v10801_v42  ;;  %v10843_v42 = vld [vmem:[%s14557_s3 + $0x50] ss:$8 sps:$4 sm:$0xff]  }
 0x601   :  { %6869 = vmatprep.subr.bf16.mxu1 %v14668_v38 }
 0x604   :  { %6870 = vmatpush1.bf16.msra.mxu1 %v10802_v43  ;;  %v10848_v43 = vld [vmem:[%s14557_s3 + $0x64] ss:$8 sps:$4 sm:$0xff]  }
 0x605   :  { %6871 = vmatprep.subr.bf16.mxu1 %v14668_v38 }
 0x608   :  { %6872 = vmatpush1.bf16.msra.mxu1 %v10803_v40  ;;  %v10846_v40 = vld [vmem:[%s14557_s3 + $0x60] ss:$8 sps:$4 sm:$0xff]  }
 0x609   :  { %6873 = vmatprep.subr.bf16.mxu1 %v14668_v38 }
 0x60c   :  { %6874 = vmatpush1.bf16.msra.mxu1 %v10804_v10  ;;  %v10851_v10 = vld [vmem:[%s14557_s3 + $0x74] ss:$8 sps:$4 sm:$0xff]  }
 0x60d   :  { %6875 = vmatprep.subr.bf16.mxu1 %v14668_v38 }
 0x610   :  { %6876 = vmatpush1.bf16.msra.mxu1 %v10805_v56  ;;  %v10849_v56 = vld [vmem:[%s14557_s3 + $0x70] ss:$8 sps:$4 sm:$0xff]  }
 0x611   :  { %6877 = vmatprep.subr.bf16.mxu1 %v14668_v38 }
 0x614   :  { %6878 = vmatpush1.bf16.msra.mxu1 %v10806_v63  ;;  %v10852_v63 = vld [vmem:[%s14557_s3 + $0x80] ss:$8 sps:$4 sm:$0xff]  }
 0x615   :  { %6879 = vmatprep.subr.bf16.mxu1 %v14668_v38 }
 0x618   :  { %6880 = vmatpush1.bf16.msra.mxu1 %v10807_v32  ;;  %v10855_v32 = vld [vmem:[%s14557_s3 + $0x90] ss:$8 sps:$4 sm:$0xff]  }
 0x619   :  { %6881 = vmatprep.subr.bf16.mxu1 %v14668_v38 }
 0x61c   :  { %6882 = vmatpush1.bf16.msra.mxu1 %v10808_v49  ;;  %v10860_v49 = vld [vmem:[%s14557_s3 + $0xa4] ss:$8 sps:$4 sm:$0xff]  }
 0x61d   :  { %6883 = vmatprep.subr.bf16.mxu1 %v14668_v38 }
 0x620   :  { %6884 = vmatpush1.bf16.msra.mxu1 %v10809_v51  ;;  %v2195_v51 = vmul.f32 0.5, %v2190_v41 }
 0x621   :  { %6885 = vmatprep.subr.bf16.mxu1 %v14668_v38 }
 0x622   :  { %11058 = vtanh.f32 %v2195_v51  ;;  %v10926_v51 = vld [vmem:[%s14557_s3 + $0x204] ss:$8 sps:$4 sm:$0xff]  }
 0x624   :  { %6886 = vmatpush1.bf16.msra.mxu1 %v10810_v4  ;;  %v10863_v4 = vld [vmem:[%s14557_s3 + $0xb4] ss:$8 sps:$4 sm:$0xff]  }
 0x625   :  { %6887 = vmatprep.subr.bf16.mxu1 %v14668_v38 }
 0x628   :  { %6888 = vmatpush1.bf16.msra.mxu1 %v10811_v6  ;;  %v10861_v6 = vld [vmem:[%s14557_s3 + $0xb0] ss:$8 sps:$4 sm:$0xff]  }
 0x629   :  { %6889 = vmatprep.subr.bf16.mxu1 %v14668_v38 }
 0x62c   :  { %6890 = vmatpush1.bf16.msra.mxu1 %v10812_v44  ;;  %v10869_v44 = vld [vmem:[%s14557_s3 + $0xd4] ss:$8 sps:$4 sm:$0xff]  }
 0x62d   :  { %6891 = vmatprep.subr.bf16.mxu1 %v14668_v38 }
 0x630   :  { %6892 = vmatpush1.bf16.msra.mxu1 %v10813_v17  ;;  %v11059_v17 = vpop.eup %11058 }
 0x631   :  { %7769 = vmatprep.subr.bf16.mxu1 %v14668_v38 }
 0x633   :  { %6898 = vmatmul.mubr.bf16.vlgmr.msra.gmra.mrb[24].mxu1 %v6746_v30  ;;  %v10873_v30 = vld [vmem:[%s14557_s3 + $0xf0] ss:$8 sps:$4 sm:$0xff]  }
 0x634   :  { %7770 = vmatpush1.bf16.msra.mxu1 %v10814_v1  ;;  %9812 = vmatprep.mubr.msk.bf16.mxu1 %vm3245_vm0, %v7651_v2  ;;  %v2199_v1 = vmul.f32 0.5, %v11059_v17  ;;  %v10878_v2 = vld [vmem:[%s14557_s3 + $0x104] ss:$8 sps:$4 sm:$0xff]   ;;  %v10930_v17 = vld [vmem:[%s14557_s3 + $0x220] ss:$8 sps:$4 sm:$0xff]  }
 0x635   :  { %7771 = vmatprep.subr.bf16.mxu1 %v14668_v38 }
 0x638   :  { %7772 = vmatpush1.bf16.msra.mxu1 %v10815_v50  ;;  %v2201_v50 = vadd.f32 0.5, %v2199_v1  ;;  %v10938_v1 = vld [vmem:[%s14557_s3 + $0x244] ss:$8 sps:$4 sm:$0xff]  }
 0x639   :  { %7773 = vmatprep.subr.bf16.mxu1 %v14668_v38 }
 0x63c   :  { %7774 = vmatpush1.bf16.msra.mxu1 %v10816_v24  ;;  %v10876_v24 = vld [vmem:[%s14557_s3 + $0x100] ss:$8 sps:$4 sm:$0xff]  }
 0x63d   :  { %7775 = vmatprep.subr.bf16.mxu1 %v14668_v38 }
 0x640   :  { %7776 = vmatpush1.bf16.msra.mxu1 %v10817_v19  ;;  %v10881_v19 = vld [vmem:[%s14557_s3 + $0x114] ss:$8 sps:$4 sm:$0xff]  }
 0x641   :  { %7777 = vmatprep.subr.bf16.mxu1 %v14668_v38 }
 0x644   :  { %7778 = vmatpush1.bf16.msra.mxu1 %v10818_v57  ;;  %v9997_v57 = vpack.c.bf16 %v2201_v50, %v2201_v50  ;;  %v10939_v50 = vld [vmem:[%s14557_s3 + $0x250] ss:$8 sps:$4 sm:$0xff]  }
 0x645   :  { %7779 = vmatprep.subr.bf16.mxu1 %v14668_v38 }
 0x648   :  { %7780 = vmatpush1.bf16.msra.mxu1 %v10819_v26  ;;  %v10879_v26 = vld [vmem:[%s14557_s3 + $0x110] ss:$8 sps:$4 sm:$0xff]  }
 0x649   :  { %7781 = vmatprep.subr.bf16.mxu1 %v14668_v38 }
 0x64c   :  { %7782 = vmatpush1.bf16.msra.mxu1 %v10820_v31  ;;  %v10882_v31 = vld [vmem:[%s14557_s3 + $0x120] ss:$8 sps:$4 sm:$0xff]  }
 0x64d   :  { %7783 = vmatprep.subr.bf16.mxu1 %v14668_v38 }
 0x650   :  { %7784 = vmatpush1.bf16.msra.mxu1 %v10821_v11  ;;  %v10890_v11 = vld [vmem:[%s14557_s3 + $0x144] ss:$8 sps:$4 sm:$0xff]  }
 0x651   :  { %7785 = vmatprep.subr.bf16.mxu1 %v14668_v38 }
 0x654   :  { %7786 = vmatpush1.bf16.msra.mxu1 %v10822_v55  ;;  %v10893_v55 = vld [vmem:[%s14557_s3 + $0x154] ss:$8 sps:$4 sm:$0xff]  }
 0x655   :  { %7787 = vmatprep.subr.bf16.mxu1 %v14668_v38 }
 0x658   :  { %7788 = vmatpush1.bf16.msra.mxu1 %v10823_v59  ;;  %v10891_v59 = vld [vmem:[%s14557_s3 + $0x150] ss:$8 sps:$4 sm:$0xff]  }
 0x659   :  { %7789 = vmatprep.subr.bf16.mxu1 %v14668_v38 }
 0x65c   :  { %7790 = vmatpush1.bf16.msra.mxu1 %v10824_v48  ;;  %v10896_v48 = vld [vmem:[%s14557_s3 + $0x164] ss:$8 sps:$4 sm:$0xff]  }
 0x65d   :  { %7791 = vmatprep.subr.bf16.mxu1 %v14668_v38 }
 0x660   :  { %7792 = vmatpush1.bf16.msra.mxu1 %v10825_v14  ;;  %v10894_v14 = vld [vmem:[%s14557_s3 + $0x160] ss:$8 sps:$4 sm:$0xff]  }
 0x661   :  { %7793 = vmatprep.subr.bf16.mxu1 %v14668_v38 }
 0x664   :  { %7794 = vmatpush1.bf16.msra.mxu1 %v10826_v62  ;;  %v10897_v62 = vld [vmem:[%s14557_s3 + $0x170] ss:$8 sps:$4 sm:$0xff]  }
 0x665   :  { %7795 = vmatprep.subr.bf16.mxu1 %v14668_v38 }
 0x668   :  { %7796 = vmatpush1.bf16.msra.mxu1 %v10827_v60  ;;  %v14335_v60 = vld [vmem:[%s14558_s2] sm:$0x3] }
 0x669   :  { %8423 = vmatprep.subr.bf16.mxu1 %v10830_v20  ;;  %v10900_v20 = vld [vmem:[%s14557_s3 + $0x180] ss:$8 sps:$4 sm:$0xff]  }
 0x66b   :  { %7802 = vmatmul.mubr.bf16.vlgmr.msra.gmra.mrb[24].mxu1 %v7650_v39  ;;  %v10905_v39 = vld [vmem:[%s14557_s3 + $0x194] ss:$8 sps:$4 sm:$0xff]  }
 0x66c   :  { %8424 = vmatpush1.bf16.msra.mxu1 %v10828_v54  ;;  %8455 = vmatprep.mubr.bf16.mxu1 %v13594_v36  ;;  %v10837_v36 = vld [vmem:[%s14557_s3 + $0x30] ss:$8 sps:$4 sm:$0xff]   ;;  %v2238_v54 = vrot.slane %v14335_v60, %v11526_v7 }
 0x66d   :  { %8425 = vmatprep.subr.bf16.mxu1 %v10833_v53  ;;  %v14769_v53 = vld [vmem:[#allocation9_spill] sm:$0xff] }
 0x670   :  { %8426 = vmatpush1.bf16.msra.mxu1 %v10831_v61  ;;  %v2188_v61 = vadd.f32 %v14769_v53, %v2066_v12  ;;  %v10965_v12 = vld [vmem:[%s14557_s3 + $0x2d4] ss:$8 sps:$4 sm:$0xff]   ;;  %v10966_v53 = vld [vmem:[%s14557_s3 + $0x2e0] ss:$8 sps:$4 sm:$0xff]  }
 0x671   :  { %8427 = vmatprep.subr.bf16.mxu1 %v10836_v13  ;;  %v10903_v13 = vld [vmem:[%s14557_s3 + $0x190] ss:$8 sps:$4 sm:$0xff]  }
 0x674   :  { %8428 = vmatpush1.bf16.msra.mxu1 %v10834_v5  ;;  %v14770_v5 = vld [vmem:[#allocation29_spill] sm:$0xff] }
 0x675   :  { %8429 = vmatprep.subr.bf16.mxu1 %v10839_v9  ;;  %v2358_v9 = vadd.f32 %v14770_v5, %v2238_v54  ;;  %v10968_v54 = vld [vmem:[%s14557_s3 + $0x2e4] ss:$8 sps:$4 sm:$0xff]   ;;  %v10969_v5 = vld [vmem:[%s14557_s3 + $0x2f0] ss:$8 sps:$4 sm:$0xff]  }
 0x678   :  { %8430 = vmatpush1.bf16.msra.mxu1 %v10837_v36  ;;  %v10908_v36 = vld [vmem:[%s14557_s3 + $0x1a4] ss:$8 sps:$4 sm:$0xff]  }
 0x679   :  { %8431 = vmatprep.subr.bf16.mxu1 %v10842_v23  ;;  %v2194_v23 = vmul.f32 0.5, %v2188_v61 }
 0x67b   :  { %11060 = vtanh.f32 %v2194_v23 }
 0x67c   :  { %8432 = vmatpush1.bf16.msra.mxu1 %v10840_v47  ;;  %v10906_v47 = vld [vmem:[%s14557_s3 + $0x1a0] ss:$8 sps:$4 sm:$0xff]  }
 0x67d   :  { %8433 = vmatprep.subr.bf16.mxu1 %v10845_v37  ;;  %v2363_v37 = vmul.f32 0.5, %v2358_v9 }
 0x67f   :  { %11062 = vtanh.f32 %v2363_v37  ;;  %v10974_v37 = vld [vmem:[%s14559_s5 + $0x2b0] sm:$0xff]  }
 0x680   :  { %8434 = vmatpush1.bf16.msra.mxu1 %v10843_v42  ;;  %v10911_v42 = vld [vmem:[%s14557_s3 + $0x1b4] ss:$8 sps:$4 sm:$0xff]  }
 0x681   :  { %8435 = vmatprep.subr.bf16.mxu1 %v10848_v43  ;;  %v10909_v43 = vld [vmem:[%s14557_s3 + $0x1b0] ss:$8 sps:$4 sm:$0xff]  }
 0x684   :  { %8436 = vmatpush1.bf16.msra.mxu1 %v10846_v40  ;;  %v10914_v40 = vld [vmem:[%s14557_s3 + $0x1c4] ss:$8 sps:$4 sm:$0xff]  }
 0x685   :  { %8437 = vmatprep.subr.bf16.mxu1 %v10851_v10  ;;  %v10912_v10 = vld [vmem:[%s14557_s3 + $0x1c0] ss:$8 sps:$4 sm:$0xff]  }
 0x688   :  { %8438 = vmatpush1.bf16.msra.mxu1 %v10849_v56  ;;  %v10917_v56 = vld [vmem:[%s14557_s3 + $0x1d4] ss:$8 sps:$4 sm:$0xff]  }
 0x689   :  { %8439 = vmatprep.subr.bf16.mxu1 %v10854_v45  ;;  %v10915_v45 = vld [vmem:[%s14557_s3 + $0x1d0] ss:$8 sps:$4 sm:$0xff]  }
 0x68c   :  { %8440 = vmatpush1.bf16.msra.mxu1 %v10852_v63  ;;  %v11061_v63 = vpop.eup %11060 }
 0x68d   :  { %8441 = vmatprep.subr.bf16.mxu1 %v10857_v33  ;;  %v11063_v16 = vpop.eup %11062  ;;  %v10918_v33 = vld [vmem:[%s14557_s3 + $0x1e0] ss:$8 sps:$4 sm:$0xff]  }
 0x68e   :  { %v2367_v41 = vmul.f32 0.5, %v11063_v16  ;;  %v10983_v16 = vld [vmem:[%s14559_s5 + $0x2f8] sm:$0xff]  }
 0x690   :  { %8442 = vmatpush1.bf16.msra.mxu1 %v10855_v32  ;;  %v2198_v32 = vmul.f32 0.5, %v11061_v63  ;;  %v10982_v63 = vld [vmem:[%s14559_s5 + $0x2f0] sm:$0xff]  }
 0x691   :  { %8443 = vmatprep.subr.bf16.mxu1 %v10860_v49  ;;  %v10921_v49 = vld [vmem:[%s14557_s3 + $0x1f0] ss:$8 sps:$4 sm:$0xff]  }
 0x694   :  { %8444 = vmatpush1.bf16.msra.mxu1 %v10858_v27  ;;  %v2200_v27 = vadd.f32 0.5, %v2198_v32  ;;  %v10985_v32 = vld [vmem:[%s14559_s5 + $0x308] sm:$0xff]  }
 0x695   :  { %8445 = vmatprep.subr.bf16.mxu1 %v10863_v4  ;;  %v2369_v4 = vadd.f32 0.5, %v2367_v41 }
 0x698   :  { %8446 = vmatpush1.bf16.msra.mxu1 %v10861_v6  ;;  %v10924_v6 = vld [vmem:[%s14557_s3 + $0x200] ss:$8 sps:$4 sm:$0xff]  }
 0x699   :  { %8447 = vmatprep.subr.bf16.mxu1 %v10866_v52  ;;  %v9996_v52 = vpack.c.bf16 %v2200_v27, %v2200_v27 }
 0x69c   :  { %8448 = vmatpush1.bf16.msra.mxu1 %v10864_v15  ;;  %v10929_v15 = vld [vmem:[%s14557_s3 + $0x214] ss:$8 sps:$4 sm:$0xff]  }
 0x69d   :  { %8449 = vmatprep.subr.bf16.mxu1 %v10869_v44  ;;  %v9999_v44 = vpack.c.bf16 %v2369_v4, %v2369_v4 }
 0x6a0   :  { %8450 = vmatpush1.bf16.msra.mxu1 %v10867_v18  ;;  %v10927_v18 = vld [vmem:[%s14557_s3 + $0x210] ss:$8 sps:$4 sm:$0xff]  }
 0x6a1   :  { %8451 = vmatprep.subr.bf16.mxu1 %v10872_v21  ;;  %v10932_v21 = vld [vmem:[%s14557_s3 + $0x224] ss:$8 sps:$4 sm:$0xff]  }
 0x6a4   :  { %8452 = vmatpush1.bf16.msra.mxu1 %v10870_v22  ;;  %v10935_v22 = vld [vmem:[%s14557_s3 + $0x234] ss:$8 sps:$4 sm:$0xff]  }
 0x6a5   :  { %8453 = vmatprep.subr.bf16.mxu1 %v10875_v35  ;;  %v10933_v35 = vld [vmem:[%s14557_s3 + $0x230] ss:$8 sps:$4 sm:$0xff]  }
 0x6a8   :  { %8454 = vmatpush1.bf16.msra.mxu1 %v10873_v30  ;;  %v10936_v30 = vld [vmem:[%s14557_s3 + $0x240] ss:$8 sps:$4 sm:$0xff]  }
 0x6a9   :  { %8464 = vmatprep.subr.bf16.mxu1 %v10878_v2  ;;  %v10941_v2 = vld [vmem:[%s14557_s3 + $0x254] ss:$8 sps:$4 sm:$0xff]  }
 0x6ab   :  { %8456 = vmatmul.mubr.bf16.vlgmr.msra.gmra.mrb[36].mxu1 %v13679_v8  ;;  %v10887_v8 = vld [vmem:[%s14557_s3 + $0x134] ss:$8 sps:$4 sm:$0xff]  }
 0x6ac   :  { %8465 = vmatpush1.bf16.msra.mxu1 %v10876_v24  ;;  %8496 = vmatprep.mubr.bf16.mxu1 %v9997_v57  ;;  %v10944_v24 = vld [vmem:[%s14557_s3 + $0x264] ss:$8 sps:$4 sm:$0xff]   ;;  %v10947_v57 = vld [vmem:[%s14557_s3 + $0x274] ss:$8 sps:$4 sm:$0xff]  }
 0x6ad   :  { %8466 = vmatprep.subr.bf16.mxu1 %v10881_v19  ;;  %v10942_v19 = vld [vmem:[%s14557_s3 + $0x260] ss:$8 sps:$4 sm:$0xff]  }
 0x6b0   :  { %8467 = vmatpush1.bf16.msra.mxu1 %v10879_v26  ;;  %v10945_v26 = vld [vmem:[%s14557_s3 + $0x270] ss:$8 sps:$4 sm:$0xff]  }
 0x6b1   :  { %8468 = vmatprep.subr.bf16.mxu1 %v10884_v25  ;;  %v10950_v25 = vld [vmem:[%s14557_s3 + $0x284] ss:$8 sps:$4 sm:$0xff]  }
 0x6b4   :  { %8469 = vmatpush1.bf16.msra.mxu1 %v10882_v31  ;;  %v2234_v31 = vrot.slane %v14335_v60, %v11694_v29  ;;  %v10960_v60 = vld [vmem:[%s14557_s3 + $0x2c0] ss:$8 sps:$4 sm:$0xff]  }
 0x6b5   :  { %8470 = vmatprep.subr.bf16.mxu1 %v10887_v8  ;;  %v10948_v8 = vld [vmem:[%s14557_s3 + $0x280] ss:$8 sps:$4 sm:$0xff]  }
 0x6b8   :  { %8471 = vmatpush1.bf16.msra.mxu1 %v10885_v0  ;;  %v10953_v0 = vld [vmem:[%s14557_s3 + $0x294] ss:$8 sps:$4 sm:$0xff]  }
 0x6b9   :  { %8472 = vmatprep.subr.bf16.mxu1 %v10890_v11  ;;  %v14771_v11 = vld [vmem:[#allocation28_spill] sm:$0xff] }
 0x6bc   :  { %8473 = vmatpush1.bf16.msra.mxu1 %v10888_v46  ;;  %v2356_v46 = vadd.f32 %v14771_v11, %v2234_v31 }
 0x6bd   :  { %8474 = vmatprep.subr.bf16.mxu1 %v10893_v55  ;;  %v10951_v55 = vld [vmem:[%s14557_s3 + $0x290] ss:$8 sps:$4 sm:$0xff]  }
 0x6c0   :  { %8475 = vmatpush1.bf16.msra.mxu1 %v10891_v59  ;;  %v10956_v59 = vld [vmem:[%s14557_s3 + $0x2a4] ss:$8 sps:$4 sm:$0xff]  }
 0x6c1   :  { %8476 = vmatprep.subr.bf16.mxu1 %v10896_v48  ;;  %v2362_v48 = vmul.f32 0.5, %v2356_v46 }
 0x6c3   :  { %11064 = vtanh.f32 %v2362_v48 }
 0x6c4   :  { %8477 = vmatpush1.bf16.msra.mxu1 %v10894_v14  ;;  %v10954_v14 = vld [vmem:[%s14557_s3 + $0x2a0] ss:$8 sps:$4 sm:$0xff]  }
 0x6c5   :  { %8478 = vmatprep.subr.bf16.mxu1 %v10899_v34  ;;  %v10959_v34 = vld [vmem:[%s14557_s3 + $0x2b4] ss:$8 sps:$4 sm:$0xff]  }
 0x6c8   :  { %8479 = vmatpush1.bf16.msra.mxu1 %v10897_v62  ;;  %v10957_v62 = vld [vmem:[%s14557_s3 + $0x2b0] ss:$8 sps:$4 sm:$0xff]  }
 0x6c9   :  { %8480 = vmatprep.subr.bf16.mxu1 %v10902_v3  ;;  %v10962_v3 = vld [vmem:[%s14557_s3 + $0x2c4] ss:$8 sps:$4 sm:$0xff]  }
 0x6cc   :  { %8481 = vmatpush1.bf16.msra.mxu1 %v10900_v20  ;;  %v10963_v20 = vld [vmem:[%s14557_s3 + $0x2d0] ss:$8 sps:$4 sm:$0xff]  }
 0x6cd   :  { %8482 = vmatprep.subr.bf16.mxu1 %v10905_v39  ;;  %v11065_v39 = vpop.eup %11064 }
 0x6ce   :  { %v2366_v61 = vmul.f32 0.5, %v11065_v39 }
 0x6d0   :  { %8483 = vmatpush1.bf16.msra.mxu1 %v10903_v13  ;;  %v10971_v13 = vld [vmem:[%s14557_s3 + $0x2f4] ss:$8 sps:$4 sm:$0xff]   ;;  %v2368_v9 = vadd.f32 0.5, %v2366_v61 }
 0x6d1   :  { %8484 = vmatprep.subr.bf16.mxu1 %v10908_v36  ;;  %v10972_v36 = vld [vmem:[%s14559_s5 + $0x2a0] sm:$0xff]  }
 0x6d2   :  { %v9998_v23 = vpack.c.bf16 %v2368_v9, %v2368_v9 }
 0x6d4   :  { %8485 = vmatpush1.bf16.msra.mxu1 %v10906_v47  ;;  %v10973_v47 = vld [vmem:[%s14559_s5 + $0x2a8] sm:$0xff]  }
 0x6d5   :  { %8486 = vmatprep.subr.bf16.mxu1 %v10911_v42  ;;  %v10975_v42 = vld [vmem:[%s14559_s5 + $0x2b8] sm:$0xff]  }
 0x6d8   :  { %8487 = vmatpush1.bf16.msra.mxu1 %v10909_v43  ;;  %v10976_v43 = vld [vmem:[%s14559_s5 + $0x2c0] sm:$0xff]  }
 0x6d9   :  { %8488 = vmatprep.subr.bf16.mxu1 %v10914_v40  ;;  %v10977_v40 = vld [vmem:[%s14559_s5 + $0x2c8] sm:$0xff]  }
 0x6dc   :  { %8489 = vmatpush1.bf16.msra.mxu1 %v10912_v10  ;;  %v10978_v10 = vld [vmem:[%s14559_s5 + $0x2d0] sm:$0xff]  }
 0x6dd   :  { %8490 = vmatprep.subr.bf16.mxu1 %v10917_v56  ;;  %v10979_v56 = vld [vmem:[%s14559_s5 + $0x2d8] sm:$0xff]  }
 0x6e0   :  { %8491 = vmatpush1.bf16.msra.mxu1 %v10915_v45  ;;  %v10980_v45 = vld [vmem:[%s14559_s5 + $0x2e0] sm:$0xff]  }
 0x6e1   :  { %8492 = vmatprep.subr.bf16.mxu1 %v10920_v58  ;;  %v10981_v58 = vld [vmem:[%s14559_s5 + $0x2e8] sm:$0xff]  }
 0x6e4   :  { %8493 = vmatpush1.bf16.msra.mxu1 %v10918_v33  ;;  %v10984_v33 = vld [vmem:[%s14559_s5 + $0x300] sm:$0xff]  }
 0x6e5   :  { %8494 = vmatprep.subr.bf16.mxu1 %v10923_v28  ;;  %v7910_v28 = vld [vmem:[%s14560_s4] sm:$0x3] }
 0x6e6   :  { %v7915_v41 = vrot.slane %v7910_v28, %v11694_v29 }
 0x6e8   :  { %8495 = vmatpush1.bf16.msra.mxu1 %v10921_v49  ;;  %v7919_v49 = vrot.slane %v7910_v28, %v11526_v7  ;;  %v8970_v7 = vld [vmem:[%s14561_s6] ss:$0 sm:$0xff] }
 0x6e9   :  { %8505 = vmatprep.subr.bf16.mxu1 %v10926_v51 }
 0x6eb   :  { %8497 = vmatmul.mubr.bf16.vlgmr.msra.gmra.mrb[36].mxu1 %v9996_v52 }
 0x6ec   :  { %8506 = vmatpush1.bf16.msra.mxu1 %v10924_v6  ;;  %8537 = vmatprep.mubr.bf16.mxu1 %v9999_v44 }
 0x6ed   :  { %8507 = vmatprep.subr.bf16.mxu1 %v10929_v15 }
 0x6f0   :  { %8508 = vmatpush1.bf16.msra.mxu1 %v10927_v18 }
 0x6f1   :  { %8509 = vmatprep.subr.bf16.mxu1 %v10932_v21 }
 0x6f4   :  { %8510 = vmatpush1.bf16.msra.mxu1 %v10930_v17 }
 0x6f5   :  { %8511 = vmatprep.subr.bf16.mxu1 %v10935_v22 }
 0x6f8   :  { %8512 = vmatpush1.bf16.msra.mxu1 %v10933_v35 }
 0x6f9   :  { %8513 = vmatprep.subr.bf16.mxu1 %v10938_v1 }
 0x6fc   :  { %8514 = vmatpush1.bf16.msra.mxu1 %v10936_v30 }
 0x6fd   :  { %8515 = vmatprep.subr.bf16.mxu1 %v10941_v2 }
 0x700   :  { %8516 = vmatpush1.bf16.msra.mxu1 %v10939_v50 }
 0x701   :  { %8517 = vmatprep.subr.bf16.mxu1 %v10944_v24 }
 0x704   :  { %8518 = vmatpush1.bf16.msra.mxu1 %v10942_v19 }
 0x705   :  { %8519 = vmatprep.subr.bf16.mxu1 %v10947_v57 }
 0x708   :  { %8520 = vmatpush1.bf16.msra.mxu1 %v10945_v26 }
 0x709   :  { %8521 = vmatprep.subr.bf16.mxu1 %v10950_v25 }
 0x70c   :  { %8522 = vmatpush1.bf16.msra.mxu1 %v10948_v8 }
 0x70d   :  { %8523 = vmatprep.subr.bf16.mxu1 %v10953_v0 }
 0x710   :  { %8524 = vmatpush1.bf16.msra.mxu1 %v10951_v55 }
 0x711   :  { %8525 = vmatprep.subr.bf16.mxu1 %v10956_v59 }
 0x714   :  { %8526 = vmatpush1.bf16.msra.mxu1 %v10954_v14 }
 0x715   :  { %8527 = vmatprep.subr.bf16.mxu1 %v10959_v34 }
 0x718   :  { %8528 = vmatpush1.bf16.msra.mxu1 %v10957_v62 }
 0x719   :  { %8529 = vmatprep.subr.bf16.mxu1 %v10962_v3 }
 0x71c   :  { %8530 = vmatpush1.bf16.msra.mxu1 %v10960_v60 }
 0x71d   :  { %8531 = vmatprep.subr.bf16.mxu1 %v10965_v12 }
 0x720   :  { %8532 = vmatpush1.bf16.msra.mxu1 %v10963_v20 }
 0x721   :  { %8533 = vmatprep.subr.bf16.mxu1 %v10968_v54 }
 0x724   :  { %8534 = vmatpush1.bf16.msra.mxu1 %v10966_v53 }
 0x725   :  { %8535 = vmatprep.subr.bf16.mxu1 %v10971_v13 }
 0x728   :  { %8536 = vmatpush1.bf16.msra.mxu1 %v10969_v5 }
 0x729   :  { %8673 = vmatprep.subr.bf16.mxu1 %v14668_v38 }
 0x72b   :  { %8538 = vmatmul.mubr.bf16.vlgmr.msra.gmra.mrb[36].mxu1 %v9998_v23 }
 0x72c   :  { %8674 = vmatpush1.bf16.msra.mxu1 %v10972_v36 }
 0x72d   :  { %8675 = vmatprep.subr.bf16.mxu1 %v14668_v38 }
 0x730   :  { %8676 = vmatpush1.bf16.msra.mxu1 %v10973_v47 }
 0x731   :  { %8677 = vmatprep.subr.bf16.mxu1 %v14668_v38 }
 0x734   :  { %8678 = vmatpush1.bf16.msra.mxu1 %v10974_v37 }
 0x735   :  { %8679 = vmatprep.subr.bf16.mxu1 %v14668_v38 }
 0x738   :  { %8680 = vmatpush1.bf16.msra.mxu1 %v10975_v42 }
 0x739   :  { %8681 = vmatprep.subr.bf16.mxu1 %v14668_v38 }
 0x73c   :  { %8682 = vmatpush1.bf16.msra.mxu1 %v10976_v43 }
 0x73d   :  { %8683 = vmatprep.subr.bf16.mxu1 %v14668_v38 }
 0x740   :  { %8684 = vmatpush1.bf16.msra.mxu1 %v10977_v40 }
 0x741   :  { %8685 = vmatprep.subr.bf16.mxu1 %v14668_v38 }
 0x744   :  { %8686 = vmatpush1.bf16.msra.mxu1 %v10978_v10 }
 0x745   :  { %8687 = vmatprep.subr.bf16.mxu1 %v14668_v38 }
 0x748   :  { %8688 = vmatpush1.bf16.msra.mxu1 %v10979_v56 }
 0x749   :  { %8689 = vmatprep.subr.bf16.mxu1 %v14668_v38 }
 0x74c   :  { %8690 = vmatpush1.bf16.msra.mxu1 %v10980_v45 }
 0x74d   :  { %8691 = vmatprep.subr.bf16.mxu1 %v14668_v38 }
 0x750   :  { %8692 = vmatpush1.bf16.msra.mxu1 %v10981_v58 }
 0x751   :  { %8693 = vmatprep.subr.bf16.mxu1 %v14668_v38 }
 0x754   :  { %8694 = vmatpush1.bf16.msra.mxu1 %v10982_v63 }
 0x755   :  { %8695 = vmatprep.subr.bf16.mxu1 %v14668_v38 }
 0x758   :  { %8696 = vmatpush1.bf16.msra.mxu1 %v10983_v16 }
 0x759   :  { %8697 = vmatprep.subr.bf16.mxu1 %v14668_v38 }
 0x75c   :  { %8698 = vmatpush1.bf16.msra.mxu1 %v10984_v33 }
 0x75d   :  { %8699 = vmatprep.subr.bf16.mxu1 %v14668_v38 }
 0x760   :  { %8700 = vmatpush1.bf16.msra.mxu1 %v10985_v32 }
 0x7fe   :  { %v8539_v27 = vpop.f32.mrb[36].mxu1 }
 0x7ff   :  { %v10017_v51 = vadd.f32 %v8539_v27, %v7915_v41  ;;  %v8541_v4 = vpop.f32.mrb[37].mxu1 }
 0x800   :  { %v10018_v6 = vadd.f32 %v8541_v4, %v7919_v49  ;;  %v8543_v52 = vpop.f32.mrb[38].mxu1 }
 0x801   :  { %v8546_v15 = vmul.f32 0.5, %v10017_v51  ;;  %v8544_v38 = vpop.f32.mrb[39].mxu1 }
 0x802   :  { %v8547_v44 = vmul.f32 0.5, %v10018_v6 }
 0x803   :  { %11066 = vtanh.f32 %v8546_v15 }
 0x804   :  { %11068 = vtanh.f32 %v8547_v44 }
 0x80d   :  { %v11067_v18 = vpop.eup %11066 }
 0x80e   :  { %v11069_v21 = vpop.eup %11068  ;;  %v8550_v17 = vmul.f32 0.5, %v11067_v18 }
 0x80f   :  { %v8551_v22 = vmul.f32 0.5, %v11069_v21 }
 0x810   :  { %v8552_v35 = vadd.f32 0.5, %v8550_v17 }
 0x811   :  { %v8553_v1 = vadd.f32 0.5, %v8551_v22 }
 0x812   :  { %v8554_v29 = vpack.c.bf16 %v8552_v35, %v8552_v35 }
 0x813   :  { %v8555_v30 = vpack.c.bf16 %v8553_v1, %v8553_v1 }
 0x815   :  { %9957 = vmatprep.mubr.msk.bf16.mxu1 %vm3245_vm0, %v8555_v30 }
 0x816   :  { %8706 = vmatmul.mubr.bf16.vlgmr.msra.gmra.mrb[24].mxu1 %v8554_v29 }
 0x8e9   :  { %v8707_v2 = vpop.f32.mrb[24].mxu1 }
 0x8ea   :  { %v10004_v50 = vadd.f32 %v8970_v7, %v8707_v2  ;;  %v8709_v24 = vpop.f32.mrb[25].mxu1 }
 0x8eb   :  { %v8710_v19 = vpop.f32.mrb[26].mxu1 }
 0x8ec   :  { %8714 = vst [vmem:[%s14562_s7] sm:$0xff] %v10004_v50  ;;  %v8711_v57 = vpop.f32.mrb[27].mxu1 }

</bundles_post_ra>
